<compile_context>
chip_gen: v7x
topology: tpu7x:2x2x1
jax: 0.10.0
libtpu: 0.0.40
codegen_flags: <defaults>
</compile_context>

<pallas_src>
import numpy as np
import jax
import jax.numpy as jnp
from jax import lax
from jax.experimental import pallas as pl
from jax.experimental.pallas import tpu as pltpu

C_IN = 4
C_OUT = 4
HID = 32
H = W = 16

# Row pitches (all multiples of 8) and padded-buffer row counts (>= (h+2)*P + 2,
# rounded up to a multiple of 8).
P1 = 16                      # stage-1 conv-output pitch (host im2col, no halo cols)
P2 = 16                      # stage-2 padded-input pitch (8x8 image + halo)
P3 = 8                       # stage-3 pitch (4x4 + halo)
P4 = 8                       # stage-4 / decoder 2x2 pitch (2x2 + halo)
R2, R3, R4 = 168, 56, 40     # pad2 / pad3 / pad4 rows
RU, RA = 40, 56              # decoder 2x2 / 4x4 padded-buffer rows


# --------------------------------------------------------------------------
# Fused Pallas kernel: whole BaseNet forward for BB lane-packed images / step.
# --------------------------------------------------------------------------
def _fused_basenet_kernel(x_ref, we1, we2, we3, we4, wt0, wt1, wt2, wt3, w11,
                          s1, s2, s3, u0m, ua, out_ref,
                          pad2, pad3, pad4, padu, pada, padb):
    f32 = jnp.float32

    def relu(v):
        return jnp.maximum(v, 0.0)

    def conv3x3(src, wb, h, pitch):
        """3x3 conv (pad=1) on a zero-padded, row-flattened image in `src`.

        One im2col lane-concat of the 9 constant-offset views + ONE MXU dot
        against the (9*cin, cout) batch-block-diagonal weight; the folded bias
        sits in the last weight row.  Rows x >= valid width are junk and are
        never consumed downstream.
        """
        cin = src.shape[-1]
        k = 9 * cin
        m = h * pitch
        patches = jnp.concatenate(
            [src[dh * pitch + dw: dh * pitch + dw + m, :]
             for dh in range(3) for dw in range(3)], axis=1)          # (m, 9*cin)
        return jnp.dot(patches, wb[0:k, :],
                       preferred_element_type=f32) + wb[k:k + 1, :]

    def pool_scatter(acc, h, pitch, s):
        """2x2/stride-2 maxpool of a conv output + scatter into the next stage's
        zero-padded flat layout: two big shifted VPU maxes and ONE selection
        matmul whose zero rows also write the halo (no buffer zero-fill)."""
        v = jnp.maximum(acc[:(h - 1) * pitch, :], acc[pitch:h * pitch, :])
        u = jnp.maximum(v[:-1, :], v[1:, :])
        return jnp.dot(s[...], u, preferred_element_type=f32)

    # ----- encoder: (conv3x3 + folded BN + ReLU) -> maxpool, x4 --------------
    k1 = x_ref.shape[-1]                                   # 9*C_IN*BB (host im2col)
    a1 = relu(jnp.dot(x_ref[...], we1[0:k1, :],
                      preferred_element_type=f32) + we1[k1:k1 + 1, :])  # (256, 4*BB)
    pad2[...] = pool_scatter(a1, 16, P1, s1)               # (168, 4*BB), one store

    a2 = relu(conv3x3(pad2, we2, 8, P2))                   # (128, 8*BB)
    pad3[...] = pool_scatter(a2, 8, P2, s2)                # (56, 8*BB)

    a3 = relu(conv3x3(pad3, we3, 4, P3))                   # (32, 16*BB)
    pad4[...] = pool_scatter(a3, 4, P3, s3)                # (40, 16*BB)

    a4 = relu(conv3x3(pad4, we4, 2, P4))                   # (16, 32*BB)
    v4 = jnp.maximum(a4[0:P4, :], a4[P4:2 * P4, :])
    p1 = jnp.maximum(v4[0:1, :], v4[1:2, :])               # (1, 32*BB): 1x1 bottleneck

    # ----- bilinear x2 (align_corners) 1x1 -> 2x2 == replicate, scattered
    #       straight into the padded 2x2 decoder layout --------------------------
    padu[...] = u0m[...] * p1                              # (40, 32*BB)

    # ----- decoder branch A: convT0 -> ReLU -> up x2 -> convT2 -> ReLU ----------
    ta = relu(conv3x3(padu, wt0, 2, P4))                   # (16, 16*BB)
    pada[...] = jnp.dot(ua[...], ta, preferred_element_type=f32)   # upsample+scatter
    ya = relu(conv3x3(pada, wt2, 4, P3))                   # (32, 4*BB)

    # ----- decoder branch B: convT1 -> ReLU -> up x2 -> convT3 -> ReLU ----------
    tb = relu(conv3x3(padu, wt1, 2, P4))                   # (16, 8*BB)
    padb[...] = jnp.dot(ua[...], tb, preferred_element_type=f32)
    yb = relu(conv3x3(padb, wt3, 4, P3))                   # (32, 4*BB)

    # ----- sum + final 1x1 conv; single lane-dense contiguous store -------------
    n11 = w11.shape[-1]
    out_ref[...] = jnp.dot(ya + yb, w11[0:n11, :],
                           preferred_element_type=f32) + w11[n11:n11 + 1, :]


# --------------------------------------------------------------------------
# Host-side operator preparation (BN folding, batch lane-packing, scatter ops)
# --------------------------------------------------------------------------
def _interp_matrix(n_in):
    """PyTorch bilinear, scale_factor=2, align_corners=True interpolation matrix."""
    n_out = 2 * n_in
    if n_in == 1:
        return np.ones((n_out, 1), np.float32)
    s = np.arange(n_out, dtype=np.float64) * (n_in - 1) / (n_out - 1)
    i0 = np.clip(np.floor(s).astype(np.int64), 0, n_in - 2)
    w1 = s - i0
    A = np.zeros((n_out, n_in), np.float64)
    A[np.arange(n_out), i0] += 1.0 - w1
    A[np.arange(n_out), i0 + 1] += w1
    return A.astype(np.float32)


def _pool_scatter_matrix(hw, p_in, p_out, rows_out):
    """Selection matrix mapping the horizontal-max vector u (len (hw-1)*p_in - 1)
    onto the next stage's padded flat buffer (pooled pixel (i,j) -> row
    (i+1)*p_out + 1 + j); all other rows are zero (the halo)."""
    L = (hw - 1) * p_in - 1
    S = np.zeros((rows_out, L), np.float32)
    for i in range(hw // 2):
        for j in range(hw // 2):
            S[(i + 1) * p_out + 1 + j, 2 * i * p_in + 2 * j] = 1.0
    return S


def _upsample_scatter_matrix(rows_out, p_src, p_dst):
    """2x2 -> 4x4 bilinear (align_corners=True) upsample fused with the scatter
    into the padded 4x4 flat layout."""
    a2 = _interp_matrix(2)                                 # (4, 2)
    U = np.zeros((rows_out, 2 * p_src), np.float32)
    for i in range(4):
        for j in range(4):
            for y in range(2):
                for x in range(2):
                    U[(i + 1) * p_dst + 1 + j, y * p_src + x] = a2[i, y] * a2[j, x]
    return U


def _replicate_mask(rows_out, p_dst):
    """1x1 -> 2x2 align_corners upsample == replicate; 0/1 column mask that puts
    the bottleneck feature at the 4 interior positions of the padded 2x2 layout."""
    m = np.zeros((rows_out, 1), np.float32)
    for i in range(2):
        for j in range(2):
            m[(i + 1) * p_dst + 1 + j, 0] = 1.0
    return m


def choose_bb(batch):
    """Largest lane-pack factor (<=4 keeps the widest layer at 128 lanes) that
    divides the batch while keeping >= 2 grid steps (v7x has 2 TensorCores)."""
    for bb in (4, 2):
        if batch % bb == 0 and batch // bb >= 2:
            return bb
    return 1


def prepare_kernel_params(params, bb, eps=1e-5):
    """Fold BN into conv weights/bias, convert to (9*cin, cout) tap layout and
    lane-pack `bb` images with block-diagonal (kron) weights."""
    eye_bb = np.eye(bb, dtype=np.float32)

    def taps_packed(w_oihw, b):
        cout, cin = w_oihw.shape[0], w_oihw.shape[1]
        t = np.transpose(np.asarray(w_oihw, np.float32), (2, 3, 1, 0)).reshape(9 * cin, cout)
        w = np.kron(t, eye_bb)                              # (9*cin*bb, cout*bb)
        bias = np.repeat(np.asarray(b, np.float32), bb)[None, :]
        return jnp.asarray(np.concatenate([w, bias], 0))

    kp = {}
    for i in range(4):                                      # encoder convs + folded BN
        w, b = params["conv"][i]
        g, bt, m, v = params["bn"][i]
        s = np.asarray(g, np.float32) / np.sqrt(np.asarray(v, np.float32) + eps)
        wf = np.asarray(w, np.float32) * s[:, None, None, None]
        bf = (np.asarray(b, np.float32) - np.asarray(m, np.float32)) * s \
            + np.asarray(bt, np.float32)
        kp[f"we{i + 1}"] = taps_packed(wf, bf)
    for j in range(4):                                      # transposed convs (k3,s1,p1)
        w_iohw, b = params["convT"][j]
        w_conv = np.transpose(np.flip(np.asarray(w_iohw, np.float32), axis=(2, 3)),
                              (1, 0, 2, 3))
        kp[f"wt{j}"] = taps_packed(w_conv, np.asarray(b, np.float32))
    w4, b4 = params["conv4"]                                # final 1x1 conv
    m4 = np.asarray(w4, np.float32).reshape(w4.shape[0], w4.shape[1]).T   # (ci, co)
    kp["w11"] = jnp.asarray(np.concatenate(
        [np.kron(m4, eye_bb),
         np.repeat(np.asarray(b4, np.float32), bb)[None, :]], 0))

    kp["s1"] = jnp.asarray(_pool_scatter_matrix(16, P1, P2, R2))   # (168, 239)
    kp["s2"] = jnp.asarray(_pool_scatter_matrix(8, P2, P3, R3))    # (56, 111)
    kp["s3"] = jnp.asarray(_pool_scatter_matrix(4, P3, P4, R4))    # (40, 23)
    kp["u0m"] = jnp.asarray(_replicate_mask(RU, P4))               # (40, 1)
    kp["ua"] = jnp.asarray(_upsample_scatter_matrix(RA, P4, P3))   # (56, 16)
    return kp


def pack_inputs(x_nchw, bb):
    """NCHW -> per-group im2col for the first conv: (G, H*W, 9*C_IN*bb) with
    lane order (tap, channel, image) matching kron(W_taps, eye(bb))."""
    B, C, Hh, Ww = x_nchw.shape
    G = B // bb
    xp = jnp.pad(x_nchw.astype(jnp.float32), ((0, 0), (0, 0), (1, 1), (1, 1)))
    taps = jnp.stack([xp[:, :, dh:dh + Hh, dw:dw + Ww]
                      for dh in range(3) for dw in range(3)], axis=1)  # (B,9,C,H,W)
    t = taps.reshape(G, bb, 9, C, Hh, Ww)
    t = jnp.transpose(t, (0, 4, 5, 2, 3, 1))                            # (G,H,W,9,C,bb)
    return t.reshape(G, Hh * Ww, 9 * C * bb)


def basenet_pallas_forward(kp, x_nchw, bb):
    """Fused BaseNet forward.  x_nchw: (B, 4, 16, 16) float32 -> (B, 4, 4, 4)."""
    B = x_nchw.shape[0]
    assert B % bb == 0
    G = B // bb
    xf = pack_inputs(x_nchw, bb)

    op_names = ("we1", "we2", "we3", "we4", "wt0", "wt1", "wt2", "wt3",
                "w11", "s1", "s2", "s3", "u0m", "ua")
    ops = [kp[n] for n in op_names]

    y = pl.pallas_call(
        _fused_basenet_kernel,
        out_shape=jax.ShapeDtypeStruct((G, 4 * P4, C_OUT * bb), jnp.float32),
        grid=(G,),
        in_specs=[pl.BlockSpec((None,) + xf.shape[1:], lambda g: (g, 0, 0))]
                 + [pl.BlockSpec(a.shape, lambda g: (0, 0)) for a in ops],
        out_specs=pl.BlockSpec((None, 4 * P4, C_OUT * bb), lambda g: (g, 0, 0)),
        scratch_shapes=[
            pltpu.VMEM((R2, (HID // 8) * bb), jnp.float32),   # pad2: 8x8 stage input
            pltpu.VMEM((R3, (HID // 4) * bb), jnp.float32),   # pad3: 4x4
            pltpu.VMEM((R4, (HID // 2) * bb), jnp.float32),   # pad4: 2x2
            pltpu.VMEM((RU, HID * bb), jnp.float32),          # padu: decoder 2x2
            pltpu.VMEM((RA, (HID // 2) * bb), jnp.float32),   # pada: branch A 4x4
            pltpu.VMEM((RA, (HID // 4) * bb), jnp.float32),   # padb: branch B 4x4
        ],
        compiler_params=pltpu.CompilerParams(
            dimension_semantics=("parallel",),
            internal_scratch_in_bytes=2 * 1024 * 1024),
    )(xf, *ops)

    # Strip junk columns (x >= 4) and unpack the lane-packed batch on the host.
    y = y.reshape(G, 4, P4, C_OUT, bb)[:, :, :4]             # (G, h, w, c, b)
    y = jnp.transpose(y, (0, 4, 3, 1, 2)).reshape(B, C_OUT, 4, 4)
    return y


# --------------------------------------------------------------------------
# Parameters (deterministic, shapes per BaseNet.__init__)
# --------------------------------------------------------------------------
def _init_conv(key, cout, cin, k):
    k1, k2 = jax.random.split(key)
    bound = 1.0 / float(np.sqrt(cin * k * k))
    w = jax.random.uniform(k1, (cout, cin, k, k), jnp.float32, -bound, bound)
    b = jax.random.uniform(k2, (cout,), jnp.float32, -bound, bound)
    return w, b


def _init_convT(key, cin, cout, k):
    k1, k2 = jax.random.split(key)
    bound = 1.0 / float(np.sqrt(cin * k * k))
    w = jax.random.uniform(k1, (cin, cout, k, k), jnp.float32, -bound, bound)
    b = jax.random.uniform(k2, (cout,), jnp.float32, -bound, bound)
    return w, b


def _init_bn(key, c):
    k1, k2, k3, k4 = jax.random.split(key, 4)
    gamma = 1.0 + 0.1 * jax.random.normal(k1, (c,), jnp.float32)
    beta = 0.1 * jax.random.normal(k2, (c,), jnp.float32)
    mean = 0.1 * jax.random.normal(k3, (c,), jnp.float32)
    var = 1.0 + 0.1 * jnp.abs(jax.random.normal(k4, (c,), jnp.float32))
    return gamma, beta, mean, var


def init_params(key, channels_in=4, channels_out=4, hidden=32):
    h = hidden
    keys = jax.random.split(key, 13)
    conv_defs = [(h // 8, channels_in), (h // 4, h // 8), (h // 2, h // 4), (h, h // 2)]
    convs = [_init_conv(keys[i], co, ci, 3) for i, (co, ci) in enumerate(conv_defs)]
    conv4 = _init_conv(keys[4], channels_out, channels_out, 1)
    convT_defs = [(h, h // 2), (h, h // 4), (h // 2, h // 8), (h // 4, channels_out)]
    convTs = [_init_convT(keys[5 + j], ci, co, 3) for j, (ci, co) in enumerate(convT_defs)]
    bns = [_init_bn(keys[9 + i], c) for i, c in enumerate([h // 8, h // 4, h // 2, h])]
    return {"conv": convs, "conv4": conv4, "convT": convTs, "bn": bns}


# --------------------------------------------------------------------------
# Pure-JAX reference (independent correctness check of the fused kernel)
# --------------------------------------------------------------------------
def _conv3x3_ref(x, w_oihw, b):
    return lax.conv_general_dilated(
        x, jnp.transpose(w_oihw, (2, 3, 1, 0)), (1, 1), ((1, 1), (1, 1)),
        dimension_numbers=("NHWC", "HWIO", "NHWC")) + b.reshape(1, 1, 1, -1)


def _convT_ref(x, w_iohw, b):
    w_conv = jnp.transpose(jnp.flip(w_iohw, axis=(2, 3)), (1, 0, 2, 3))
    return _conv3x3_ref(x, w_conv, b)


def _bn_relu_ref(x, g, bt, m, v, eps=1e-5):
    return jnp.maximum((x - m) / jnp.sqrt(v + eps) * g + bt, 0.0)


def _maxpool_ref(x):
    return lax.reduce_window(x, -jnp.inf, lax.max, (1, 2, 2, 1), (1, 2, 2, 1), "VALID")


def _upsample_ref(x):
    B, Hh, Ww, C = x.shape
    return jnp.einsum("Hh,Ww,bhwc->bHWc",
                      jnp.asarray(_interp_matrix(Hh)), jnp.asarray(_interp_matrix(Ww)), x)


def basenet_forward_ref(params, x_nchw):
    x = jnp.transpose(x_nchw, (0, 2, 3, 1)).astype(jnp.float32)
    for i in range(4):
        w, b = params["conv"][i]
        g, bt, m, v = params["bn"][i]
        x = _maxpool_ref(_bn_relu_ref(_conv3x3_ref(x, w, b), g, bt, m, v))
    u = _upsample_ref(x)
    a = jnp.maximum(_convT_ref(u, *params["convT"][0]), 0.0)
    a = jnp.maximum(_convT_ref(_upsample_ref(a), *params["convT"][2]), 0.0)
    c = jnp.maximum(_convT_ref(u, *params["convT"][1]), 0.0)
    c = jnp.maximum(_convT_ref(_upsample_ref(c), *params["convT"][3]), 0.0)
    w4, b4 = params["conv4"]
    y = jnp.einsum("bhwi,oi->bhwo", a + c, w4.reshape(w4.shape[0], w4.shape[1])) \
        + b4.reshape(1, 1, 1, -1)
    return jnp.transpose(y, (0, 3, 1, 2))


# --------------------------------------------------------------------------
if __name__ == "__main__":
    key = jax.random.PRNGKey(0)
    pk, xk = jax.random.split(key)
    params = init_params(pk, channels_in=C_IN, channels_out=C_OUT, hidden=HID)

    B = 8                                                   # demo batch
    x = jax.random.normal(xk, (B, C_IN, 16, 16), jnp.float32)   # NCHW

    bb = choose_bb(B)                                       # lane-pack factor (4 -> grid 2)
    kparams = prepare_kernel_params(params, bb)

    fwd = jax.jit(lambda inp: basenet_pallas_forward(kparams, inp, bb))
    y = jax.block_until_ready(fwd(x))

    y_ref = basenet_forward_ref(params, x)
    assert y.shape == (B, C_OUT, 4, 4), y.shape
    np.testing.assert_allclose(np.asarray(y), np.asarray(y_ref), rtol=1e-3, atol=2e-3)
    print("KERNEL_OK")
</pallas_src>

<mosaic_0001>
module attributes {stable_mosaic.version = 11 : i64} {
  func.func @_fused_basenet_kernel(%arg0: i32, %arg1: memref<1x256x144xf32, #tpu.memory_space<vmem>>, %arg2: memref<145x16xf32, #tpu.memory_space<vmem>>, %arg3: memref<145x32xf32, #tpu.memory_space<vmem>>, %arg4: memref<289x64xf32, #tpu.memory_space<vmem>>, %arg5: memref<577x128xf32, #tpu.memory_space<vmem>>, %arg6: memref<1153x64xf32, #tpu.memory_space<vmem>>, %arg7: memref<1153x32xf32, #tpu.memory_space<vmem>>, %arg8: memref<577x16xf32, #tpu.memory_space<vmem>>, %arg9: memref<289x16xf32, #tpu.memory_space<vmem>>, %arg10: memref<17x16xf32, #tpu.memory_space<vmem>>, %arg11: memref<168x239xf32, #tpu.memory_space<vmem>>, %arg12: memref<56x111xf32, #tpu.memory_space<vmem>>, %arg13: memref<40x23xf32, #tpu.memory_space<vmem>>, %arg14: memref<40x1xf32, #tpu.memory_space<vmem>>, %arg15: memref<56x16xf32, #tpu.memory_space<vmem>>, %arg16: memref<1x32x16xf32, #tpu.memory_space<vmem>>, %arg17: memref<168x16xf32, #tpu.memory_space<vmem>>, %arg18: memref<56x32xf32, #tpu.memory_space<vmem>>, %arg19: memref<40x64xf32, #tpu.memory_space<vmem>>, %arg20: memref<40x128xf32, #tpu.memory_space<vmem>>, %arg21: memref<56x64xf32, #tpu.memory_space<vmem>>, %arg22: memref<56x32xf32, #tpu.memory_space<vmem>>) attributes {dimension_semantics = [#tpu.dimension_semantics<parallel>], iteration_bounds = array<i64: 2>, scalar_prefetch = 0 : i64, scratch_operands = 6 : i64, tpu.core_type = #tpu.core_type<tc>, window_params = [{transform_indices = @transform_0, window_bounds = array<i64: 1, 256, 144>}, {pipeline_mode = #tpu.pipeline_mode<synchronous>, transform_indices = @transform_1, window_bounds = array<i64: 145, 16>}, {pipeline_mode = #tpu.pipeline_mode<synchronous>, transform_indices = @transform_2, window_bounds = array<i64: 145, 32>}, {pipeline_mode = #tpu.pipeline_mode<synchronous>, transform_indices = @transform_3, window_bounds = array<i64: 289, 64>}, {pipeline_mode = #tpu.pipeline_mode<synchronous>, transform_indices = @transform_4, window_bounds = array<i64: 577, 128>}, {pipeline_mode = #tpu.pipeline_mode<synchronous>, transform_indices = @transform_5, window_bounds = array<i64: 1153, 64>}, {pipeline_mode = #tpu.pipeline_mode<synchronous>, transform_indices = @transform_6, window_bounds = array<i64: 1153, 32>}, {pipeline_mode = #tpu.pipeline_mode<synchronous>, transform_indices = @transform_7, window_bounds = array<i64: 577, 16>}, {pipeline_mode = #tpu.pipeline_mode<synchronous>, transform_indices = @transform_8, window_bounds = array<i64: 289, 16>}, {pipeline_mode = #tpu.pipeline_mode<synchronous>, transform_indices = @transform_9, window_bounds = array<i64: 17, 16>}, {pipeline_mode = #tpu.pipeline_mode<synchronous>, transform_indices = @transform_10, window_bounds = array<i64: 168, 239>}, {pipeline_mode = #tpu.pipeline_mode<synchronous>, transform_indices = @transform_11, window_bounds = array<i64: 56, 111>}, {pipeline_mode = #tpu.pipeline_mode<synchronous>, transform_indices = @transform_12, window_bounds = array<i64: 40, 23>}, {pipeline_mode = #tpu.pipeline_mode<synchronous>, transform_indices = @transform_13, window_bounds = array<i64: 40, 1>}, {pipeline_mode = #tpu.pipeline_mode<synchronous>, transform_indices = @transform_14, window_bounds = array<i64: 56, 16>}, {transform_indices = @transform_15, window_bounds = array<i64: 1, 32, 16>}]} {
    %c0 = arith.constant 0 : index
    %c0_0 = arith.constant 0 : index
    %c0_1 = arith.constant 0 : index
    %0 = vector.load %arg1[%c0, %c0_0, %c0_1] : memref<1x256x144xf32, #tpu.memory_space<vmem>>, vector<1x256x144xf32>
    %1 = vector.shape_cast %0 : vector<1x256x144xf32> to vector<256x144xf32>
    %c0_2 = arith.constant 0 : index
    %c0_3 = arith.constant 0 : index
    %2 = vector.load %arg2[%c0_2, %c0_3] : memref<145x16xf32, #tpu.memory_space<vmem>>, vector<144x16xf32>
    %cst = arith.constant dense<0.000000e+00> : vector<256x16xf32>
    %3 = tpu.matmul %1, %2, %cst {dimension_numbers = #tpu.dot_dimension_numbers<[1], [0], [0], [1], [0, 0, 1, 1], [], []>} : vector<256x144xf32>, vector<144x16xf32>, vector<256x16xf32> -> vector<256x16xf32>
    %c144 = arith.constant 144 : index
    %c0_4 = arith.constant 0 : index
    %4 = vector.load %arg2[%c144, %c0_4] : memref<145x16xf32, #tpu.memory_space<vmem>>, vector<1x16xf32>
    %5 = vector.broadcast %4 : vector<1x16xf32> to vector<256x16xf32>
    %6 = arith.addf %3, %5 : vector<256x16xf32>
    %cst_5 = arith.constant 0.000000e+00 : f32
    %7 = vector.broadcast %cst_5 : f32 to vector<256x16xf32>
    %8 = arith.maximumf %6, %7 : vector<256x16xf32>
    %9 = vector.extract_strided_slice %8 {offsets = [0, 0], sizes = [240, 16], strides = [1, 1]} : vector<256x16xf32> to vector<240x16xf32>
    %10 = vector.extract_strided_slice %8 {offsets = [16, 0], sizes = [240, 16], strides = [1, 1]} : vector<256x16xf32> to vector<240x16xf32>
    %11 = arith.maximumf %9, %10 : vector<240x16xf32>
    %12 = vector.extract_strided_slice %11 {offsets = [0, 0], sizes = [239, 16], strides = [1, 1]} : vector<240x16xf32> to vector<239x16xf32>
    %13 = vector.extract_strided_slice %11 {offsets = [1, 0], sizes = [239, 16], strides = [1, 1]} : vector<240x16xf32> to vector<239x16xf32>
    %14 = arith.maximumf %12, %13 : vector<239x16xf32>
    %c0_6 = arith.constant 0 : index
    %c0_7 = arith.constant 0 : index
    %15 = vector.load %arg11[%c0_6, %c0_7] : memref<168x239xf32, #tpu.memory_space<vmem>>, vector<168x239xf32>
    %cst_8 = arith.constant dense<0.000000e+00> : vector<168x16xf32>
    %16 = tpu.matmul %15, %14, %cst_8 {dimension_numbers = #tpu.dot_dimension_numbers<[1], [0], [0], [1], [0, 0, 1, 1], [], []>} : vector<168x239xf32>, vector<239x16xf32>, vector<168x16xf32> -> vector<168x16xf32>
    %c0_9 = arith.constant 0 : index
    %c0_10 = arith.constant 0 : index
    %17 = vector.load %arg17[%c0_9, %c0_10] : memref<168x16xf32, #tpu.memory_space<vmem>>, vector<168x16xf32>
    tpu.vector_store %arg17[%c0_9, %c0_10], %16 {strides = array<i32>} : memref<168x16xf32, #tpu.memory_space<vmem>>, vector<168x16xf32>,
    %c0_11 = arith.constant 0 : index
    %c0_12 = arith.constant 0 : index
    %18 = vector.load %arg17[%c0_11, %c0_12] : memref<168x16xf32, #tpu.memory_space<vmem>>, vector<128x16xf32>
    %c1 = arith.constant 1 : index
    %c0_13 = arith.constant 0 : index
    %19 = vector.load %arg17[%c1, %c0_13] : memref<168x16xf32, #tpu.memory_space<vmem>>, vector<128x16xf32>
    %c2 = arith.constant 2 : index
    %c0_14 = arith.constant 0 : index
    %20 = vector.load %arg17[%c2, %c0_14] : memref<168x16xf32, #tpu.memory_space<vmem>>, vector<128x16xf32>
    %c16 = arith.constant 16 : index
    %c0_15 = arith.constant 0 : index
    %21 = vector.load %arg17[%c16, %c0_15] : memref<168x16xf32, #tpu.memory_space<vmem>>, vector<128x16xf32>
    %c17 = arith.constant 17 : index
    %c0_16 = arith.constant 0 : index
    %22 = vector.load %arg17[%c17, %c0_16] : memref<168x16xf32, #tpu.memory_space<vmem>>, vector<128x16xf32>
    %c18 = arith.constant 18 : index
    %c0_17 = arith.constant 0 : index
    %23 = vector.load %arg17[%c18, %c0_17] : memref<168x16xf32, #tpu.memory_space<vmem>>, vector<128x16xf32>
    %c32 = arith.constant 32 : index
    %c0_18 = arith.constant 0 : index
    %24 = vector.load %arg17[%c32, %c0_18] : memref<168x16xf32, #tpu.memory_space<vmem>>, vector<128x16xf32>
    %c33 = arith.constant 33 : index
    %c0_19 = arith.constant 0 : index
    %25 = vector.load %arg17[%c33, %c0_19] : memref<168x16xf32, #tpu.memory_space<vmem>>, vector<128x16xf32>
    %c34 = arith.constant 34 : index
    %c0_20 = arith.constant 0 : index
    %26 = vector.load %arg17[%c34, %c0_20] : memref<168x16xf32, #tpu.memory_space<vmem>>, vector<128x16xf32>
    %27 = tpu.concatenate %18, %19, %20, %21, %22, %23, %24, %25, %26 in 1 : vector<128x16xf32>, vector<128x16xf32>, vector<128x16xf32>, vector<128x16xf32>, vector<128x16xf32>, vector<128x16xf32>, vector<128x16xf32>, vector<128x16xf32>, vector<128x16xf32> -> vector<128x144xf32>
    %c0_21 = arith.constant 0 : index
    %c0_22 = arith.constant 0 : index
    %28 = vector.load %arg3[%c0_21, %c0_22] : memref<145x32xf32, #tpu.memory_space<vmem>>, vector<144x32xf32>
    %cst_23 = arith.constant dense<0.000000e+00> : vector<128x32xf32>
    %29 = tpu.matmul %27, %28, %cst_23 {dimension_numbers = #tpu.dot_dimension_numbers<[1], [0], [0], [1], [0, 0, 1, 1], [], []>} : vector<128x144xf32>, vector<144x32xf32>, vector<128x32xf32> -> vector<128x32xf32>
    %c144_24 = arith.constant 144 : index
    %c0_25 = arith.constant 0 : index
    %30 = vector.load %arg3[%c144_24, %c0_25] : memref<145x32xf32, #tpu.memory_space<vmem>>, vector<1x32xf32>
    %31 = vector.broadcast %30 : vector<1x32xf32> to vector<128x32xf32>
    %32 = arith.addf %29, %31 : vector<128x32xf32>
    %cst_26 = arith.constant 0.000000e+00 : f32
    %33 = vector.broadcast %cst_26 : f32 to vector<128x32xf32>
    %34 = arith.maximumf %32, %33 : vector<128x32xf32>
    %35 = vector.extract_strided_slice %34 {offsets = [0, 0], sizes = [112, 32], strides = [1, 1]} : vector<128x32xf32> to vector<112x32xf32>
    %36 = vector.extract_strided_slice %34 {offsets = [16, 0], sizes = [112, 32], strides = [1, 1]} : vector<128x32xf32> to vector<112x32xf32>
    %37 = arith.maximumf %35, %36 : vector<112x32xf32>
    %38 = vector.extract_strided_slice %37 {offsets = [0, 0], sizes = [111, 32], strides = [1, 1]} : vector<112x32xf32> to vector<111x32xf32>
    %39 = vector.extract_strided_slice %37 {offsets = [1, 0], sizes = [111, 32], strides = [1, 1]} : vector<112x32xf32> to vector<111x32xf32>
    %40 = arith.maximumf %38, %39 : vector<111x32xf32>
    %c0_27 = arith.constant 0 : index
    %c0_28 = arith.constant 0 : index
    %41 = vector.load %arg12[%c0_27, %c0_28] : memref<56x111xf32, #tpu.memory_space<vmem>>, vector<56x111xf32>
    %cst_29 = arith.constant dense<0.000000e+00> : vector<56x32xf32>
    %42 = tpu.matmul %41, %40, %cst_29 {dimension_numbers = #tpu.dot_dimension_numbers<[1], [0], [0], [1], [0, 0, 1, 1], [], []>} : vector<56x111xf32>, vector<111x32xf32>, vector<56x32xf32> -> vector<56x32xf32>
    %c0_30 = arith.constant 0 : index
    %c0_31 = arith.constant 0 : index
    %43 = vector.load %arg18[%c0_30, %c0_31] : memref<56x32xf32, #tpu.memory_space<vmem>>, vector<56x32xf32>
    tpu.vector_store %arg18[%c0_30, %c0_31], %42 {strides = array<i32>} : memref<56x32xf32, #tpu.memory_space<vmem>>, vector<56x32xf32>,
    %c0_32 = arith.constant 0 : index
    %c0_33 = arith.constant 0 : index
    %44 = vector.load %arg18[%c0_32, %c0_33] : memref<56x32xf32, #tpu.memory_space<vmem>>, vector<32x32xf32>
    %c1_34 = arith.constant 1 : index
    %c0_35 = arith.constant 0 : index
    %45 = vector.load %arg18[%c1_34, %c0_35] : memref<56x32xf32, #tpu.memory_space<vmem>>, vector<32x32xf32>
    %c2_36 = arith.constant 2 : index
    %c0_37 = arith.constant 0 : index
    %46 = vector.load %arg18[%c2_36, %c0_37] : memref<56x32xf32, #tpu.memory_space<vmem>>, vector<32x32xf32>
    %c8 = arith.constant 8 : index
    %c0_38 = arith.constant 0 : index
    %47 = vector.load %arg18[%c8, %c0_38] : memref<56x32xf32, #tpu.memory_space<vmem>>, vector<32x32xf32>
    %c9 = arith.constant 9 : index
    %c0_39 = arith.constant 0 : index
    %48 = vector.load %arg18[%c9, %c0_39] : memref<56x32xf32, #tpu.memory_space<vmem>>, vector<32x32xf32>
    %c10 = arith.constant 10 : index
    %c0_40 = arith.constant 0 : index
    %49 = vector.load %arg18[%c10, %c0_40] : memref<56x32xf32, #tpu.memory_space<vmem>>, vector<32x32xf32>
    %c16_41 = arith.constant 16 : index
    %c0_42 = arith.constant 0 : index
    %50 = vector.load %arg18[%c16_41, %c0_42] : memref<56x32xf32, #tpu.memory_space<vmem>>, vector<32x32xf32>
    %c17_43 = arith.constant 17 : index
    %c0_44 = arith.constant 0 : index
    %51 = vector.load %arg18[%c17_43, %c0_44] : memref<56x32xf32, #tpu.memory_space<vmem>>, vector<32x32xf32>
    %c18_45 = arith.constant 18 : index
    %c0_46 = arith.constant 0 : index
    %52 = vector.load %arg18[%c18_45, %c0_46] : memref<56x32xf32, #tpu.memory_space<vmem>>, vector<32x32xf32>
    %53 = tpu.concatenate %44, %45, %46, %47, %48, %49, %50, %51, %52 in 1 : vector<32x32xf32>, vector<32x32xf32>, vector<32x32xf32>, vector<32x32xf32>, vector<32x32xf32>, vector<32x32xf32>, vector<32x32xf32>, vector<32x32xf32>, vector<32x32xf32> -> vector<32x288xf32>
    %c0_47 = arith.constant 0 : index
    %c0_48 = arith.constant 0 : index
    %54 = vector.load %arg4[%c0_47, %c0_48] : memref<289x64xf32, #tpu.memory_space<vmem>>, vector<288x64xf32>
    %cst_49 = arith.constant dense<0.000000e+00> : vector<32x64xf32>
    %55 = tpu.matmul %53, %54, %cst_49 {dimension_numbers = #tpu.dot_dimension_numbers<[1], [0], [0], [1], [0, 0, 1, 1], [], []>} : vector<32x288xf32>, vector<288x64xf32>, vector<32x64xf32> -> vector<32x64xf32>
    %c288 = arith.constant 288 : index
    %c0_50 = arith.constant 0 : index
    %56 = vector.load %arg4[%c288, %c0_50] : memref<289x64xf32, #tpu.memory_space<vmem>>, vector<1x64xf32>
    %57 = vector.broadcast %56 : vector<1x64xf32> to vector<32x64xf32>
    %58 = arith.addf %55, %57 : vector<32x64xf32>
    %cst_51 = arith.constant 0.000000e+00 : f32
    %59 = vector.broadcast %cst_51 : f32 to vector<32x64xf32>
    %60 = arith.maximumf %58, %59 : vector<32x64xf32>
    %61 = vector.extract_strided_slice %60 {offsets = [0, 0], sizes = [24, 64], strides = [1, 1]} : vector<32x64xf32> to vector<24x64xf32>
    %62 = vector.extract_strided_slice %60 {offsets = [8, 0], sizes = [24, 64], strides = [1, 1]} : vector<32x64xf32> to vector<24x64xf32>
    %63 = arith.maximumf %61, %62 : vector<24x64xf32>
    %64 = vector.extract_strided_slice %63 {offsets = [0, 0], sizes = [23, 64], strides = [1, 1]} : vector<24x64xf32> to vector<23x64xf32>
    %65 = vector.extract_strided_slice %63 {offsets = [1, 0], sizes = [23, 64], strides = [1, 1]} : vector<24x64xf32> to vector<23x64xf32>
    %66 = arith.maximumf %64, %65 : vector<23x64xf32>
    %c0_52 = arith.constant 0 : index
    %c0_53 = arith.constant 0 : index
    %67 = vector.load %arg13[%c0_52, %c0_53] : memref<40x23xf32, #tpu.memory_space<vmem>>, vector<40x23xf32>
    %cst_54 = arith.constant dense<0.000000e+00> : vector<40x64xf32>
    %68 = tpu.matmul %67, %66, %cst_54 {dimension_numbers = #tpu.dot_dimension_numbers<[1], [0], [0], [1], [0, 0, 1, 1], [], []>} : vector<40x23xf32>, vector<23x64xf32>, vector<40x64xf32> -> vector<40x64xf32>
    %c0_55 = arith.constant 0 : index
    %c0_56 = arith.constant 0 : index
    %69 = vector.load %arg19[%c0_55, %c0_56] : memref<40x64xf32, #tpu.memory_space<vmem>>, vector<40x64xf32>
    tpu.vector_store %arg19[%c0_55, %c0_56], %68 {strides = array<i32>} : memref<40x64xf32, #tpu.memory_space<vmem>>, vector<40x64xf32>,
    %c0_57 = arith.constant 0 : index
    %c0_58 = arith.constant 0 : index
    %70 = vector.load %arg19[%c0_57, %c0_58] : memref<40x64xf32, #tpu.memory_space<vmem>>, vector<16x64xf32>
    %c1_59 = arith.constant 1 : index
    %c0_60 = arith.constant 0 : index
    %71 = vector.load %arg19[%c1_59, %c0_60] : memref<40x64xf32, #tpu.memory_space<vmem>>, vector<16x64xf32>
    %c2_61 = arith.constant 2 : index
    %c0_62 = arith.constant 0 : index
    %72 = vector.load %arg19[%c2_61, %c0_62] : memref<40x64xf32, #tpu.memory_space<vmem>>, vector<16x64xf32>
    %c8_63 = arith.constant 8 : index
    %c0_64 = arith.constant 0 : index
    %73 = vector.load %arg19[%c8_63, %c0_64] : memref<40x64xf32, #tpu.memory_space<vmem>>, vector<16x64xf32>
    %c9_65 = arith.constant 9 : index
    %c0_66 = arith.constant 0 : index
    %74 = vector.load %arg19[%c9_65, %c0_66] : memref<40x64xf32, #tpu.memory_space<vmem>>, vector<16x64xf32>
    %c10_67 = arith.constant 10 : index
    %c0_68 = arith.constant 0 : index
    %75 = vector.load %arg19[%c10_67, %c0_68] : memref<40x64xf32, #tpu.memory_space<vmem>>, vector<16x64xf32>
    %c16_69 = arith.constant 16 : index
    %c0_70 = arith.constant 0 : index
    %76 = vector.load %arg19[%c16_69, %c0_70] : memref<40x64xf32, #tpu.memory_space<vmem>>, vector<16x64xf32>
    %c17_71 = arith.constant 17 : index
    %c0_72 = arith.constant 0 : index
    %77 = vector.load %arg19[%c17_71, %c0_72] : memref<40x64xf32, #tpu.memory_space<vmem>>, vector<16x64xf32>
    %c18_73 = arith.constant 18 : index
    %c0_74 = arith.constant 0 : index
    %78 = vector.load %arg19[%c18_73, %c0_74] : memref<40x64xf32, #tpu.memory_space<vmem>>, vector<16x64xf32>
    %79 = tpu.concatenate %70, %71, %72, %73, %74, %75, %76, %77, %78 in 1 : vector<16x64xf32>, vector<16x64xf32>, vector<16x64xf32>, vector<16x64xf32>, vector<16x64xf32>, vector<16x64xf32>, vector<16x64xf32>, vector<16x64xf32>, vector<16x64xf32> -> vector<16x576xf32>
    %c0_75 = arith.constant 0 : index
    %c0_76 = arith.constant 0 : index
    %80 = vector.load %arg5[%c0_75, %c0_76] : memref<577x128xf32, #tpu.memory_space<vmem>>, vector<576x128xf32>
    %cst_77 = arith.constant dense<0.000000e+00> : vector<16x128xf32>
    %81 = tpu.matmul %79, %80, %cst_77 {dimension_numbers = #tpu.dot_dimension_numbers<[1], [0], [0], [1], [0, 0, 1, 1], [], []>} : vector<16x576xf32>, vector<576x128xf32>, vector<16x128xf32> -> vector<16x128xf32>
    %c576 = arith.constant 576 : index
    %c0_78 = arith.constant 0 : index
    %82 = vector.load %arg5[%c576, %c0_78] : memref<577x128xf32, #tpu.memory_space<vmem>>, vector<1x128xf32>
    %83 = vector.broadcast %82 : vector<1x128xf32> to vector<16x128xf32>
    %84 = arith.addf %81, %83 : vector<16x128xf32>
    %cst_79 = arith.constant 0.000000e+00 : f32
    %85 = vector.broadcast %cst_79 : f32 to vector<16x128xf32>
    %86 = arith.maximumf %84, %85 : vector<16x128xf32>
    %87 = vector.extract_strided_slice %86 {offsets = [0, 0], sizes = [8, 128], strides = [1, 1]} : vector<16x128xf32> to vector<8x128xf32>
    %88 = vector.extract_strided_slice %86 {offsets = [8, 0], sizes = [8, 128], strides = [1, 1]} : vector<16x128xf32> to vector<8x128xf32>
    %89 = arith.maximumf %87, %88 : vector<8x128xf32>
    %90 = vector.extract_strided_slice %89 {offsets = [0, 0], sizes = [1, 128], strides = [1, 1]} : vector<8x128xf32> to vector<1x128xf32>
    %91 = vector.extract_strided_slice %89 {offsets = [1, 0], sizes = [1, 128], strides = [1, 1]} : vector<8x128xf32> to vector<1x128xf32>
    %92 = arith.maximumf %90, %91 : vector<1x128xf32>
    %c0_80 = arith.constant 0 : index
    %c0_81 = arith.constant 0 : index
    %93 = vector.load %arg14[%c0_80, %c0_81] : memref<40x1xf32, #tpu.memory_space<vmem>>, vector<40x1xf32>
    %94 = vector.broadcast %93 : vector<40x1xf32> to vector<40x128xf32>
    %95 = vector.broadcast %92 : vector<1x128xf32> to vector<40x128xf32>
    %96 = arith.mulf %94, %95 : vector<40x128xf32>
    %c0_82 = arith.constant 0 : index
    %c0_83 = arith.constant 0 : index
    %97 = vector.load %arg20[%c0_82, %c0_83] : memref<40x128xf32, #tpu.memory_space<vmem>>, vector<40x128xf32>
    tpu.vector_store %arg20[%c0_82, %c0_83], %96 {strides = array<i32>} : memref<40x128xf32, #tpu.memory_space<vmem>>, vector<40x128xf32>,
    %c0_84 = arith.constant 0 : index
    %c0_85 = arith.constant 0 : index
    %98 = vector.load %arg20[%c0_84, %c0_85] : memref<40x128xf32, #tpu.memory_space<vmem>>, vector<16x128xf32>
    %c1_86 = arith.constant 1 : index
    %c0_87 = arith.constant 0 : index
    %99 = vector.load %arg20[%c1_86, %c0_87] : memref<40x128xf32, #tpu.memory_space<vmem>>, vector<16x128xf32>
    %c2_88 = arith.constant 2 : index
    %c0_89 = arith.constant 0 : index
    %100 = vector.load %arg20[%c2_88, %c0_89] : memref<40x128xf32, #tpu.memory_space<vmem>>, vector<16x128xf32>
    %c8_90 = arith.constant 8 : index
    %c0_91 = arith.constant 0 : index
    %101 = vector.load %arg20[%c8_90, %c0_91] : memref<40x128xf32, #tpu.memory_space<vmem>>, vector<16x128xf32>
    %c9_92 = arith.constant 9 : index
    %c0_93 = arith.constant 0 : index
    %102 = vector.load %arg20[%c9_92, %c0_93] : memref<40x128xf32, #tpu.memory_space<vmem>>, vector<16x128xf32>
    %c10_94 = arith.constant 10 : index
    %c0_95 = arith.constant 0 : index
    %103 = vector.load %arg20[%c10_94, %c0_95] : memref<40x128xf32, #tpu.memory_space<vmem>>, vector<16x128xf32>
    %c16_96 = arith.constant 16 : index
    %c0_97 = arith.constant 0 : index
    %104 = vector.load %arg20[%c16_96, %c0_97] : memref<40x128xf32, #tpu.memory_space<vmem>>, vector<16x128xf32>
    %c17_98 = arith.constant 17 : index
    %c0_99 = arith.constant 0 : index
    %105 = vector.load %arg20[%c17_98, %c0_99] : memref<40x128xf32, #tpu.memory_space<vmem>>, vector<16x128xf32>
    %c18_100 = arith.constant 18 : index
    %c0_101 = arith.constant 0 : index
    %106 = vector.load %arg20[%c18_100, %c0_101] : memref<40x128xf32, #tpu.memory_space<vmem>>, vector<16x128xf32>
    %107 = tpu.concatenate %98, %99, %100, %101, %102, %103, %104, %105, %106 in 1 : vector<16x128xf32>, vector<16x128xf32>, vector<16x128xf32>, vector<16x128xf32>, vector<16x128xf32>, vector<16x128xf32>, vector<16x128xf32>, vector<16x128xf32>, vector<16x128xf32> -> vector<16x1152xf32>
    %c0_102 = arith.constant 0 : index
    %c0_103 = arith.constant 0 : index
    %108 = vector.load %arg6[%c0_102, %c0_103] : memref<1153x64xf32, #tpu.memory_space<vmem>>, vector<1152x64xf32>
    %cst_104 = arith.constant dense<0.000000e+00> : vector<16x64xf32>
    %109 = tpu.matmul %107, %108, %cst_104 {dimension_numbers = #tpu.dot_dimension_numbers<[1], [0], [0], [1], [0, 0, 1, 1], [], []>} : vector<16x1152xf32>, vector<1152x64xf32>, vector<16x64xf32> -> vector<16x64xf32>
    %c1152 = arith.constant 1152 : index
    %c0_105 = arith.constant 0 : index
    %110 = vector.load %arg6[%c1152, %c0_105] : memref<1153x64xf32, #tpu.memory_space<vmem>>, vector<1x64xf32>
    %111 = vector.broadcast %110 : vector<1x64xf32> to vector<16x64xf32>
    %112 = arith.addf %109, %111 : vector<16x64xf32>
    %cst_106 = arith.constant 0.000000e+00 : f32
    %113 = vector.broadcast %cst_106 : f32 to vector<16x64xf32>
    %114 = arith.maximumf %112, %113 : vector<16x64xf32>
    %c0_107 = arith.constant 0 : index
    %c0_108 = arith.constant 0 : index
    %115 = vector.load %arg15[%c0_107, %c0_108] : memref<56x16xf32, #tpu.memory_space<vmem>>, vector<56x16xf32>
    %cst_109 = arith.constant dense<0.000000e+00> : vector<56x64xf32>
    %116 = tpu.matmul %115, %114, %cst_109 {dimension_numbers = #tpu.dot_dimension_numbers<[1], [0], [0], [1], [0, 0, 1, 1], [], []>} : vector<56x16xf32>, vector<16x64xf32>, vector<56x64xf32> -> vector<56x64xf32>
    %c0_110 = arith.constant 0 : index
    %c0_111 = arith.constant 0 : index
    %117 = vector.load %arg21[%c0_110, %c0_111] : memref<56x64xf32, #tpu.memory_space<vmem>>, vector<56x64xf32>
    tpu.vector_store %arg21[%c0_110, %c0_111], %116 {strides = array<i32>} : memref<56x64xf32, #tpu.memory_space<vmem>>, vector<56x64xf32>,
    %c0_112 = arith.constant 0 : index
    %c0_113 = arith.constant 0 : index
    %118 = vector.load %arg21[%c0_112, %c0_113] : memref<56x64xf32, #tpu.memory_space<vmem>>, vector<32x64xf32>
    %c1_114 = arith.constant 1 : index
    %c0_115 = arith.constant 0 : index
    %119 = vector.load %arg21[%c1_114, %c0_115] : memref<56x64xf32, #tpu.memory_space<vmem>>, vector<32x64xf32>
    %c2_116 = arith.constant 2 : index
    %c0_117 = arith.constant 0 : index
    %120 = vector.load %arg21[%c2_116, %c0_117] : memref<56x64xf32, #tpu.memory_space<vmem>>, vector<32x64xf32>
    %c8_118 = arith.constant 8 : index
    %c0_119 = arith.constant 0 : index
    %121 = vector.load %arg21[%c8_118, %c0_119] : memref<56x64xf32, #tpu.memory_space<vmem>>, vector<32x64xf32>
    %c9_120 = arith.constant 9 : index
    %c0_121 = arith.constant 0 : index
    %122 = vector.load %arg21[%c9_120, %c0_121] : memref<56x64xf32, #tpu.memory_space<vmem>>, vector<32x64xf32>
    %c10_122 = arith.constant 10 : index
    %c0_123 = arith.constant 0 : index
    %123 = vector.load %arg21[%c10_122, %c0_123] : memref<56x64xf32, #tpu.memory_space<vmem>>, vector<32x64xf32>
    %c16_124 = arith.constant 16 : index
    %c0_125 = arith.constant 0 : index
    %124 = vector.load %arg21[%c16_124, %c0_125] : memref<56x64xf32, #tpu.memory_space<vmem>>, vector<32x64xf32>
    %c17_126 = arith.constant 17 : index
    %c0_127 = arith.constant 0 : index
    %125 = vector.load %arg21[%c17_126, %c0_127] : memref<56x64xf32, #tpu.memory_space<vmem>>, vector<32x64xf32>
    %c18_128 = arith.constant 18 : index
    %c0_129 = arith.constant 0 : index
    %126 = vector.load %arg21[%c18_128, %c0_129] : memref<56x64xf32, #tpu.memory_space<vmem>>, vector<32x64xf32>
    %127 = tpu.concatenate %118, %119, %120, %121, %122, %123, %124, %125, %126 in 1 : vector<32x64xf32>, vector<32x64xf32>, vector<32x64xf32>, vector<32x64xf32>, vector<32x64xf32>, vector<32x64xf32>, vector<32x64xf32>, vector<32x64xf32>, vector<32x64xf32> -> vector<32x576xf32>
    %c0_130 = arith.constant 0 : index
    %c0_131 = arith.constant 0 : index
    %128 = vector.load %arg8[%c0_130, %c0_131] : memref<577x16xf32, #tpu.memory_space<vmem>>, vector<576x16xf32>
    %cst_132 = arith.constant dense<0.000000e+00> : vector<32x16xf32>
    %129 = tpu.matmul %127, %128, %cst_132 {dimension_numbers = #tpu.dot_dimension_numbers<[1], [0], [0], [1], [0, 0, 1, 1], [], []>} : vector<32x576xf32>, vector<576x16xf32>, vector<32x16xf32> -> vector<32x16xf32>
    %c576_133 = arith.constant 576 : index
    %c0_134 = arith.constant 0 : index
    %130 = vector.load %arg8[%c576_133, %c0_134] : memref<577x16xf32, #tpu.memory_space<vmem>>, vector<1x16xf32>
    %131 = vector.broadcast %130 : vector<1x16xf32> to vector<32x16xf32>
    %132 = arith.addf %129, %131 : vector<32x16xf32>
    %cst_135 = arith.constant 0.000000e+00 : f32
    %133 = vector.broadcast %cst_135 : f32 to vector<32x16xf32>
    %134 = arith.maximumf %132, %133 : vector<32x16xf32>
    %c0_136 = arith.constant 0 : index
    %c0_137 = arith.constant 0 : index
    %135 = vector.load %arg20[%c0_136, %c0_137] : memref<40x128xf32, #tpu.memory_space<vmem>>, vector<16x128xf32>
    %c1_138 = arith.constant 1 : index
    %c0_139 = arith.constant 0 : index
    %136 = vector.load %arg20[%c1_138, %c0_139] : memref<40x128xf32, #tpu.memory_space<vmem>>, vector<16x128xf32>
    %c2_140 = arith.constant 2 : index
    %c0_141 = arith.constant 0 : index
    %137 = vector.load %arg20[%c2_140, %c0_141] : memref<40x128xf32, #tpu.memory_space<vmem>>, vector<16x128xf32>
    %c8_142 = arith.constant 8 : index
    %c0_143 = arith.constant 0 : index
    %138 = vector.load %arg20[%c8_142, %c0_143] : memref<40x128xf32, #tpu.memory_space<vmem>>, vector<16x128xf32>
    %c9_144 = arith.constant 9 : index
    %c0_145 = arith.constant 0 : index
    %139 = vector.load %arg20[%c9_144, %c0_145] : memref<40x128xf32, #tpu.memory_space<vmem>>, vector<16x128xf32>
    %c10_146 = arith.constant 10 : index
    %c0_147 = arith.constant 0 : index
    %140 = vector.load %arg20[%c10_146, %c0_147] : memref<40x128xf32, #tpu.memory_space<vmem>>, vector<16x128xf32>
    %c16_148 = arith.constant 16 : index
    %c0_149 = arith.constant 0 : index
    %141 = vector.load %arg20[%c16_148, %c0_149] : memref<40x128xf32, #tpu.memory_space<vmem>>, vector<16x128xf32>
    %c17_150 = arith.constant 17 : index
    %c0_151 = arith.constant 0 : index
    %142 = vector.load %arg20[%c17_150, %c0_151] : memref<40x128xf32, #tpu.memory_space<vmem>>, vector<16x128xf32>
    %c18_152 = arith.constant 18 : index
    %c0_153 = arith.constant 0 : index
    %143 = vector.load %arg20[%c18_152, %c0_153] : memref<40x128xf32, #tpu.memory_space<vmem>>, vector<16x128xf32>
    %144 = tpu.concatenate %135, %136, %137, %138, %139, %140, %141, %142, %143 in 1 : vector<16x128xf32>, vector<16x128xf32>, vector<16x128xf32>, vector<16x128xf32>, vector<16x128xf32>, vector<16x128xf32>, vector<16x128xf32>, vector<16x128xf32>, vector<16x128xf32> -> vector<16x1152xf32>
    %c0_154 = arith.constant 0 : index
    %c0_155 = arith.constant 0 : index
    %145 = vector.load %arg7[%c0_154, %c0_155] : memref<1153x32xf32, #tpu.memory_space<vmem>>, vector<1152x32xf32>
    %cst_156 = arith.constant dense<0.000000e+00> : vector<16x32xf32>
    %146 = tpu.matmul %144, %145, %cst_156 {dimension_numbers = #tpu.dot_dimension_numbers<[1], [0], [0], [1], [0, 0, 1, 1], [], []>} : vector<16x1152xf32>, vector<1152x32xf32>, vector<16x32xf32> -> vector<16x32xf32>
    %c1152_157 = arith.constant 1152 : index
    %c0_158 = arith.constant 0 : index
    %147 = vector.load %arg7[%c1152_157, %c0_158] : memref<1153x32xf32, #tpu.memory_space<vmem>>, vector<1x32xf32>
    %148 = vector.broadcast %147 : vector<1x32xf32> to vector<16x32xf32>
    %149 = arith.addf %146, %148 : vector<16x32xf32>
    %cst_159 = arith.constant 0.000000e+00 : f32
    %150 = vector.broadcast %cst_159 : f32 to vector<16x32xf32>
    %151 = arith.maximumf %149, %150 : vector<16x32xf32>
    %c0_160 = arith.constant 0 : index
    %c0_161 = arith.constant 0 : index
    %152 = vector.load %arg15[%c0_160, %c0_161] : memref<56x16xf32, #tpu.memory_space<vmem>>, vector<56x16xf32>
    %cst_162 = arith.constant dense<0.000000e+00> : vector<56x32xf32>
    %153 = tpu.matmul %152, %151, %cst_162 {dimension_numbers = #tpu.dot_dimension_numbers<[1], [0], [0], [1], [0, 0, 1, 1], [], []>} : vector<56x16xf32>, vector<16x32xf32>, vector<56x32xf32> -> vector<56x32xf32>
    %c0_163 = arith.constant 0 : index
    %c0_164 = arith.constant 0 : index
    %154 = vector.load %arg22[%c0_163, %c0_164] : memref<56x32xf32, #tpu.memory_space<vmem>>, vector<56x32xf32>
    tpu.vector_store %arg22[%c0_163, %c0_164], %153 {strides = array<i32>} : memref<56x32xf32, #tpu.memory_space<vmem>>, vector<56x32xf32>,
    %c0_165 = arith.constant 0 : index
    %c0_166 = arith.constant 0 : index
    %155 = vector.load %arg22[%c0_165, %c0_166] : memref<56x32xf32, #tpu.memory_space<vmem>>, vector<32x32xf32>
    %c1_167 = arith.constant 1 : index
    %c0_168 = arith.constant 0 : index
    %156 = vector.load %arg22[%c1_167, %c0_168] : memref<56x32xf32, #tpu.memory_space<vmem>>, vector<32x32xf32>
    %c2_169 = arith.constant 2 : index
    %c0_170 = arith.constant 0 : index
    %157 = vector.load %arg22[%c2_169, %c0_170] : memref<56x32xf32, #tpu.memory_space<vmem>>, vector<32x32xf32>
    %c8_171 = arith.constant 8 : index
    %c0_172 = arith.constant 0 : index
    %158 = vector.load %arg22[%c8_171, %c0_172] : memref<56x32xf32, #tpu.memory_space<vmem>>, vector<32x32xf32>
    %c9_173 = arith.constant 9 : index
    %c0_174 = arith.constant 0 : index
    %159 = vector.load %arg22[%c9_173, %c0_174] : memref<56x32xf32, #tpu.memory_space<vmem>>, vector<32x32xf32>
    %c10_175 = arith.constant 10 : index
    %c0_176 = arith.constant 0 : index
    %160 = vector.load %arg22[%c10_175, %c0_176] : memref<56x32xf32, #tpu.memory_space<vmem>>, vector<32x32xf32>
    %c16_177 = arith.constant 16 : index
    %c0_178 = arith.constant 0 : index
    %161 = vector.load %arg22[%c16_177, %c0_178] : memref<56x32xf32, #tpu.memory_space<vmem>>, vector<32x32xf32>
    %c17_179 = arith.constant 17 : index
    %c0_180 = arith.constant 0 : index
    %162 = vector.load %arg22[%c17_179, %c0_180] : memref<56x32xf32, #tpu.memory_space<vmem>>, vector<32x32xf32>
    %c18_181 = arith.constant 18 : index
    %c0_182 = arith.constant 0 : index
    %163 = vector.load %arg22[%c18_181, %c0_182] : memref<56x32xf32, #tpu.memory_space<vmem>>, vector<32x32xf32>
    %164 = tpu.concatenate %155, %156, %157, %158, %159, %160, %161, %162, %163 in 1 : vector<32x32xf32>, vector<32x32xf32>, vector<32x32xf32>, vector<32x32xf32>, vector<32x32xf32>, vector<32x32xf32>, vector<32x32xf32>, vector<32x32xf32>, vector<32x32xf32> -> vector<32x288xf32>
    %c0_183 = arith.constant 0 : index
    %c0_184 = arith.constant 0 : index
    %165 = vector.load %arg9[%c0_183, %c0_184] : memref<289x16xf32, #tpu.memory_space<vmem>>, vector<288x16xf32>
    %cst_185 = arith.constant dense<0.000000e+00> : vector<32x16xf32>
    %166 = tpu.matmul %164, %165, %cst_185 {dimension_numbers = #tpu.dot_dimension_numbers<[1], [0], [0], [1], [0, 0, 1, 1], [], []>} : vector<32x288xf32>, vector<288x16xf32>, vector<32x16xf32> -> vector<32x16xf32>
    %c288_186 = arith.constant 288 : index
    %c0_187 = arith.constant 0 : index
    %167 = vector.load %arg9[%c288_186, %c0_187] : memref<289x16xf32, #tpu.memory_space<vmem>>, vector<1x16xf32>
    %168 = vector.broadcast %167 : vector<1x16xf32> to vector<32x16xf32>
    %169 = arith.addf %166, %168 : vector<32x16xf32>
    %cst_188 = arith.constant 0.000000e+00 : f32
    %170 = vector.broadcast %cst_188 : f32 to vector<32x16xf32>
    %171 = arith.maximumf %169, %170 : vector<32x16xf32>
    %172 = arith.addf %134, %171 : vector<32x16xf32>
    %c0_189 = arith.constant 0 : index
    %c0_190 = arith.constant 0 : index
    %173 = vector.load %arg10[%c0_189, %c0_190] : memref<17x16xf32, #tpu.memory_space<vmem>>, vector<16x16xf32>
    %cst_191 = arith.constant dense<0.000000e+00> : vector<32x16xf32>
    %174 = tpu.matmul %172, %173, %cst_191 {dimension_numbers = #tpu.dot_dimension_numbers<[1], [0], [0], [1], [0, 0, 1, 1], [], []>} : vector<32x16xf32>, vector<16x16xf32>, vector<32x16xf32> -> vector<32x16xf32>
    %c16_192 = arith.constant 16 : index
    %c0_193 = arith.constant 0 : index
    %175 = vector.load %arg10[%c16_192, %c0_193] : memref<17x16xf32, #tpu.memory_space<vmem>>, vector<1x16xf32>
    %176 = vector.broadcast %175 : vector<1x16xf32> to vector<32x16xf32>
    %177 = arith.addf %174, %176 : vector<32x16xf32>
    %c0_194 = arith.constant 0 : index
    %c0_195 = arith.constant 0 : index
    %c0_196 = arith.constant 0 : index
    %178 = vector.load %arg16[%c0_194, %c0_195, %c0_196] : memref<1x32x16xf32, #tpu.memory_space<vmem>>, vector<1x32x16xf32>
    %179 = vector.shape_cast %178 : vector<1x32x16xf32> to vector<32x16xf32>
    %180 = vector.shape_cast %177 : vector<32x16xf32> to vector<1x32x16xf32>
    tpu.vector_store %arg16[%c0_194, %c0_195, %c0_196], %180 {strides = array<i32>} : memref<1x32x16xf32, #tpu.memory_space<vmem>>, vector<1x32x16xf32>,
    return
  }
  func.func @transform_0(%arg0: i32) -> (i32, i32, i32) {
    %c0_i32 = arith.constant 0 : i32
    %c0_i32_0 = arith.constant 0 : i32
    %c0_i32_1 = arith.constant 0 : i32
    return %arg0, %c0_i32, %c0_i32_0 : i32, i32, i32
  }
  func.func @transform_1(%arg0: i32) -> (i32, i32) {
    %c0_i32 = arith.constant 0 : i32
    %c0_i32_0 = arith.constant 0 : i32
    %c0_i32_1 = arith.constant 0 : i32
    return %c0_i32, %c0_i32_0 : i32, i32
  }
  func.func @transform_2(%arg0: i32) -> (i32, i32) {
    %c0_i32 = arith.constant 0 : i32
    %c0_i32_0 = arith.constant 0 : i32
    %c0_i32_1 = arith.constant 0 : i32
    return %c0_i32, %c0_i32_0 : i32, i32
  }
  func.func @transform_3(%arg0: i32) -> (i32, i32) {
    %c0_i32 = arith.constant 0 : i32
    %c0_i32_0 = arith.constant 0 : i32
    %c0_i32_1 = arith.constant 0 : i32
    return %c0_i32, %c0_i32_0 : i32, i32
  }
  func.func @transform_4(%arg0: i32) -> (i32, i32) {
    %c0_i32 = arith.constant 0 : i32
    %c0_i32_0 = arith.constant 0 : i32
    %c0_i32_1 = arith.constant 0 : i32
    return %c0_i32, %c0_i32_0 : i32, i32
  }
  func.func @transform_5(%arg0: i32) -> (i32, i32) {
    %c0_i32 = arith.constant 0 : i32
    %c0_i32_0 = arith.constant 0 : i32
    %c0_i32_1 = arith.constant 0 : i32
    return %c0_i32, %c0_i32_0 : i32, i32
  }
  func.func @transform_6(%arg0: i32) -> (i32, i32) {
    %c0_i32 = arith.constant 0 : i32
    %c0_i32_0 = arith.constant 0 : i32
    %c0_i32_1 = arith.constant 0 : i32
    return %c0_i32, %c0_i32_0 : i32, i32
  }
  func.func @transform_7(%arg0: i32) -> (i32, i32) {
    %c0_i32 = arith.constant 0 : i32
    %c0_i32_0 = arith.constant 0 : i32
    %c0_i32_1 = arith.constant 0 : i32
    return %c0_i32, %c0_i32_0 : i32, i32
  }
  func.func @transform_8(%arg0: i32) -> (i32, i32) {
    %c0_i32 = arith.constant 0 : i32
    %c0_i32_0 = arith.constant 0 : i32
    %c0_i32_1 = arith.constant 0 : i32
    return %c0_i32, %c0_i32_0 : i32, i32
  }
  func.func @transform_9(%arg0: i32) -> (i32, i32) {
    %c0_i32 = arith.constant 0 : i32
    %c0_i32_0 = arith.constant 0 : i32
    %c0_i32_1 = arith.constant 0 : i32
    return %c0_i32, %c0_i32_0 : i32, i32
  }
  func.func @transform_10(%arg0: i32) -> (i32, i32) {
    %c0_i32 = arith.constant 0 : i32
    %c0_i32_0 = arith.constant 0 : i32
    %c0_i32_1 = arith.constant 0 : i32
    return %c0_i32, %c0_i32_0 : i32, i32
  }
  func.func @transform_11(%arg0: i32) -> (i32, i32) {
    %c0_i32 = arith.constant 0 : i32
    %c0_i32_0 = arith.constant 0 : i32
    %c0_i32_1 = arith.constant 0 : i32
    return %c0_i32, %c0_i32_0 : i32, i32
  }
  func.func @transform_12(%arg0: i32) -> (i32, i32) {
    %c0_i32 = arith.constant 0 : i32
    %c0_i32_0 = arith.constant 0 : i32
    %c0_i32_1 = arith.constant 0 : i32
    return %c0_i32, %c0_i32_0 : i32, i32
  }
  func.func @transform_13(%arg0: i32) -> (i32, i32) {
    %c0_i32 = arith.constant 0 : i32
    %c0_i32_0 = arith.constant 0 : i32
    %c0_i32_1 = arith.constant 0 : i32
    return %c0_i32, %c0_i32_0 : i32, i32
  }
  func.func @transform_14(%arg0: i32) -> (i32, i32) {
    %c0_i32 = arith.constant 0 : i32
    %c0_i32_0 = arith.constant 0 : i32
    %c0_i32_1 = arith.constant 0 : i32
    return %c0_i32, %c0_i32_0 : i32, i32
  }
  func.func @transform_15(%arg0: i32) -> (i32, i32, i32) {
    %c0_i32 = arith.constant 0 : i32
    %c0_i32_0 = arith.constant 0 : i32
    %c0_i32_1 = arith.constant 0 : i32
    return %arg0, %c0_i32, %c0_i32_0 : i32, i32, i32
  }
}

</mosaic_0001>

<bundles_post_ra>
// kernel: _lambda_.1
= control target key start
LH: loop header
LB: loop body
LE: loop exit
PB: predicated region body
PF: predicated region fallthrough
CT: control target
= control target key end

     0   :  { %s7972_s18 = smov 0   ;;  %s10827_s0 = inlined_call_operand.vmem [shape: f32[2,256,144], index: 0, kind: input, shape index: {}]   ;;  %s10828_s1 = inlined_call_operand.vmem [shape: f32[145,16], index: 1, kind: input, shape index: {}]   ;;  %s10829_s2 = inlined_call_operand.vmem [shape: f32[145,32], index: 2, kind: input, shape index: {}]   ;;  %s10830_s3 = inlined_call_operand.vmem [shape: f32[289,64], index: 3, kind: input, shape index: {}]   ;;  %s10831_s4 = inlined_call_operand.vmem [shape: f32[577,128], index: 4, kind: input, shape index: {}]   ;;  %s10832_s5 = inlined_call_operand.vmem [shape: f32[1153,64], index: 5, kind: input, shape index: {}]   ;;  %s10833_s6 = inlined_call_operand.vmem [shape: f32[1153,32], index: 6, kind: input, shape index: {}]   ;;  %s10834_s7 = inlined_call_operand.vmem [shape: f32[577,16], index: 7, kind: input, shape index: {}]   ;;  %s10835_s8 = inlined_call_operand.vmem [shape: f32[289,16], index: 8, kind: input, shape index: {}]   ;;  %s10836_s9 = inlined_call_operand.vmem [shape: f32[17,16], index: 9, kind: input, shape index: {}]   ;;  %s10837_s10 = inlined_call_operand.vmem [shape: f32[168,239], index: 10, kind: input, shape index: {}]   ;;  %s10838_s11 = inlined_call_operand.vmem [shape: f32[56,111], index: 11, kind: input, shape index: {}]   ;;  %s10839_s12 = inlined_call_operand.vmem [shape: f32[40,23], index: 12, kind: input, shape index: {}]   ;;  %s10840_s13 = inlined_call_operand.vmem [shape: f32[40,1], index: 13, kind: input, shape index: {}]   ;;  %s10841_s14 = inlined_call_operand.vmem [shape: f32[56,16], index: 14, kind: input, shape index: {}]   ;;  %s10842_s15 = inlined_call_operand.vmem [shape: f32[2,32,16], index: 15, kind: output, shape index: {}]  }
   0x1   :  { %10849 = sst [smem:[#allocation8_spill]] %s10827_s0 }
   0x2 LB: > { %s5625_s19 = sadd.s32 4294967295, %s7878_s18   ;;  %p5629_p0 = scmp.ge.s32.totalorder %s7878_s18, 1  ;;  %s7878_s18 = sphi %s7972_s18, %s25_s18  }
   0x3   : > { %p437_p1 = scmp.lt.s32.totalorder %s7878_s18, 3 }
   0x5   : > { %p438_p2 = pnand %p5629_p0, %p437_p1 }
   0x6   : > { %v559_v0 = vld [vmem:[%s10828_s1] sm:$0xff] (!%p438_p2)  ;;  %v560_v1 = vld [vmem:[%s10828_s1 + $0x8] sm:$0xff] (!%p438_p2)  ;;  %v561_v2 = vld [vmem:[%s10828_s1 + $0x10] sm:$0xff] (!%p438_p2)  ;;  %p485_p3 = scmp.lt.s32.totalorder (!%p438_p2), %s5625_s19, 1  ;;  %v7880_v3 = vmov (!%p438_p2), 0.0|0.0   ;;  %vm582_vm0 = vcmask (!%p438_p2), 130048  }
   0x7   : > { %441 = sbr.rel (%p438_p2) target bundleno = 4062 (0xfde), region = 80  ;;  %6715 = vmatprep.subr.bf16.mxu0 (!%p438_p2), %v7880_v3  ;;  %v6716_v4 = vpack.c.bf16 (!%p438_p2), %v560_v1, %v559_v0  ;;  %v562_v5 = vld [vmem:[%s10828_s1 + $0x18] sm:$0xff] (!%p438_p2)  ;;  %6742 = vmatprep.subr.bf16.mxu1 (!%p438_p2), %v7880_v3  ;;  %v563_v7 = vld [vmem:[%s10828_s1 + $0x20] sm:$0xff] (!%p438_p2)  ;;  %v564_v8 = vld [vmem:[%s10828_s1 + $0x28] sm:$0xff] (!%p438_p2)  ;;  %s10850_s0 = sld [smem:[#allocation8_spill]] (!%p438_p2)  ;;  %vm1158_vm1 = vcmask (!%p438_p2), 908288  }
   0x8   : > { %v6719_v6 = vpack.c.bf16 (!%p438_p2), %v562_v5, %v561_v2  ;;  %v6722_v10 = vpack.c.bf16 (!%p438_p2), %v564_v8, %v563_v7  ;;  %v565_v11 = vld [vmem:[%s10828_s1 + $0x30] sm:$0xff] (!%p438_p2)  ;;  %v566_v12 = vld [vmem:[%s10828_s1 + $0x38] sm:$0xff] (!%p438_p2)  ;;  %v567_v14 = vld [vmem:[%s10828_s1 + $0x40] sm:$0xff] (!%p438_p2)  ;;  %vm996_vm2 = vcmask (!%p438_p2), 1046528   ;;  %vm7881_vm3 = vmmov (!%p438_p2), 1   ;;  %s7882_s24 = smov (!%p438_p2), 16  }
   0x9   : > { %6717 = vmatpush1.bf16.msra.mxu0 (!%p438_p2), %v6716_v4  ;;  %v6725_v13 = vpack.c.bf16 (!%p438_p2), %v566_v12, %v565_v11  ;;  %v568_v15 = vld [vmem:[%s10828_s1 + $0x48] sm:$0xff] (!%p438_p2)  ;;  %v569_v17 = vld [vmem:[%s10828_s1 + $0x50] sm:$0xff] (!%p438_p2)  ;;  %v570_v18 = vld [vmem:[%s10828_s1 + $0x58] sm:$0xff] (!%p438_p2)  ;;  %s10845_s28 = smov (!%p438_p2), 32   ;;  %s7884_s29 = smov (!%p438_p2), 48   ;;  %vm1884_vm5 = vcmask (!%p438_p2), 261120  }
   0xa   : > { %6718 = vmatprep.subr.bf16.mxu0 (!%p438_p2), %v7880_v3  ;;  %v6728_v16 = vpack.c.bf16 (!%p438_p2), %v568_v15, %v567_v14  ;;  %v6731_v19 = vpack.c.bf16 (!%p438_p2), %v570_v18, %v569_v17  ;;  %v571_v20 = vld [vmem:[%s10828_s1 + $0x60] sm:$0xff] (!%p438_p2)  ;;  %v572_v21 = vld [vmem:[%s10828_s1 + $0x68] sm:$0xff] (!%p438_p2)  ;;  %v573_v23 = vld [vmem:[%s10828_s1 + $0x70] sm:$0xff] (!%p438_p2)  ;;  %s7885_s30 = smov (!%p438_p2), 80   ;;  %s10847_s16 = smov (!%p438_p2), 64   ;;  %vm1901_vm6 = vcmask (!%p438_p2), 392192  }
   0xb   : > { %v6734_v22 = vpack.c.bf16 (!%p438_p2), %v572_v21, %v571_v20  ;;  %v574_v24 = vld [vmem:[%s10828_s1 + $0x78] sm:$0xff] (!%p438_p2)  ;;  %v575_v26 = vld [vmem:[%s10828_s1 + $0x80] sm:$0xff] (!%p438_p2)  ;;  %v576_v27 = vld [vmem:[%s10828_s1 + $0x88] sm:$0xff] (!%p438_p2)  ;;  %s7888_s20 = smov (!%p438_p2), 112   ;;  %vm1918_vm7 = vcmask (!%p438_p2), 523264   ;;  %vm1935_vm8 = vcmask (!%p438_p2), 654336  }
   0xc   : > { %v6737_v25 = vpack.c.bf16 (!%p438_p2), %v574_v24, %v573_v23  ;;  %v6740_v28 = vpack.c.bf16 (!%p438_p2), %v576_v27, %v575_v26  ;;  %vm8234_vm4 = vmpackc.low (!%p438_p2), %vm996_vm2, %vm7881_vm3  ;;  %vm1952_vm9 = vcmask (!%p438_p2), 785408   ;;  %vm1969_vm10 = vcmask (!%p438_p2), 916480   ;;  %s10854_s23 = smov (!%p438_p2), 64  }
   0xd   : > { %6720 = vmatpush1.bf16.msra.mxu0 (!%p438_p2), %v6719_v6  ;;  %vm7889_vm11 = vmmov (!%p438_p2), 0   ;;  %vm2801_vm12 = vcmask (!%p438_p2), 187392  }
   0xe   : > { %s10857_s19 = smov (!%p485_p3, %s5625_s19), 1  ;;  %6721 = vmatprep.subr.bf16.mxu0 %v7880_v3 }
   0xf   : > { %s5761_s17 = sshll.u32 %s10857_s19, 9 }
  0x10   : > { %s8007_s22 = scalar_lea.vmem %s10850_s0, %s5761_s17  ;;  %s10843_s17 = smov 96  }
  0x11   : > { %v496_v9 = vld [vmem:[%s8007_s22 + $0x8] sm:$0xff]  ;;  %6723 = vmatpush1.bf16.msra.mxu0 %v6722_v10  ;;  %v495_v29 = vld [vmem:[%s8007_s22] sm:$0xff]  ;;  %v498_v30 = vld [vmem:[%s8007_s22 + $0x18] sm:$0xff] }
  0x12   : > { %5635 = vmatprep.mubr.msk.f32.mxu0 %vm582_vm0, %v496_v9  ;;  %6724 = vmatprep.subr.bf16.mxu0 %v7880_v3  ;;  %v497_v31 = vld [vmem:[%s8007_s22 + $0x10] sm:$0xff]  ;;  %v500_v32 = vld [vmem:[%s8007_s22 + $0x28] sm:$0xff]  ;;  %v499_v33 = vld [vmem:[%s8007_s22 + $0x20] sm:$0xff] }
  0x13   : > { %v502_v34 = vld [vmem:[%s8007_s22 + $0x38] sm:$0xff]  ;;  %v501_v35 = vld [vmem:[%s8007_s22 + $0x30] sm:$0xff]  ;;  %v504_v36 = vld [vmem:[%s8007_s22 + $0x48] sm:$0xff] }
  0x14   : > { %v503_v37 = vld [vmem:[%s8007_s22 + $0x40] sm:$0xff]  ;;  %v506_v38 = vld [vmem:[%s8007_s22 + $0x58] sm:$0xff]  ;;  %v505_v39 = vld [vmem:[%s8007_s22 + $0x50] sm:$0xff] }
  0x15   : > { %6726 = vmatpush1.bf16.msra.mxu0 %v6725_v13  ;;  %v508_v40 = vld [vmem:[%s8007_s22 + $0x68] sm:$0xff]  ;;  %v507_v41 = vld [vmem:[%s8007_s22 + $0x60] sm:$0xff]  ;;  %v510_v42 = vld [vmem:[%s8007_s22 + $0x78] sm:$0xff] }
  0x16   : > { %6727 = vmatprep.subr.bf16.mxu0 %v7880_v3  ;;  %v509_v43 = vld [vmem:[%s8007_s22 + $0x70] sm:$0xff]  ;;  %v512_v44 = vld [vmem:[%s8007_s22 + $0x88] sm:$0xff]  ;;  %v511_v45 = vld [vmem:[%s8007_s22 + $0x80] sm:$0xff] }
  0x17   : > { %v514_v46 = vld [vmem:[%s8007_s22 + $0x98] sm:$0xff]  ;;  %v513_v47 = vld [vmem:[%s8007_s22 + $0x90] sm:$0xff]  ;;  %v516_v48 = vld [vmem:[%s8007_s22 + $0xa8] sm:$0xff] }
  0x18   : > { %v515_v49 = vld [vmem:[%s8007_s22 + $0xa0] sm:$0xff]  ;;  %v518_v50 = vld [vmem:[%s8007_s22 + $0xb8] sm:$0xff]  ;;  %v517_v51 = vld [vmem:[%s8007_s22 + $0xb0] sm:$0xff] }
  0x19   : > { %6729 = vmatpush1.bf16.msra.mxu0 %v6728_v16  ;;  %v520_v52 = vld [vmem:[%s8007_s22 + $0xc8] sm:$0xff]  ;;  %v519_v53 = vld [vmem:[%s8007_s22 + $0xc0] sm:$0xff]  ;;  %v522_v54 = vld [vmem:[%s8007_s22 + $0xd8] sm:$0xff] }
  0x1a   : > { %6730 = vmatprep.subr.bf16.mxu0 %v7880_v3  ;;  %v521_v55 = vld [vmem:[%s8007_s22 + $0xd0] sm:$0xff]  ;;  %v524_v56 = vld [vmem:[%s8007_s22 + $0xe8] sm:$0xff]  ;;  %v523_v57 = vld [vmem:[%s8007_s22 + $0xe0] sm:$0xff] }
  0x1b   : > { %v526_v58 = vld [vmem:[%s8007_s22 + $0xf8] sm:$0xff]  ;;  %v525_v59 = vld [vmem:[%s8007_s22 + $0xf0] sm:$0xff]  ;;  %v528_v60 = vld [vmem:[%s8007_s22 + $0x108] sm:$0xff] }
  0x1c   : > { %v527_v61 = vld [vmem:[%s8007_s22 + $0x100] sm:$0xff]  ;;  %v530_v62 = vld [vmem:[%s8007_s22 + $0x118] sm:$0xff]  ;;  %v529_v63 = vld [vmem:[%s8007_s22 + $0x110] sm:$0xff] }
  0x1d   : > { %6732 = vmatpush1.bf16.msra.mxu0 %v6731_v19  ;;  %v532_v0 = vld [vmem:[%s8007_s22 + $0x128] sm:$0xff]  ;;  %v531_v1 = vld [vmem:[%s8007_s22 + $0x120] sm:$0xff]  ;;  %v534_v2 = vld [vmem:[%s8007_s22 + $0x138] sm:$0xff] }
  0x1e   : > { %6733 = vmatprep.subr.bf16.mxu0 %v7880_v3  ;;  %v533_v4 = vld [vmem:[%s8007_s22 + $0x130] sm:$0xff]  ;;  %v536_v5 = vld [vmem:[%s8007_s22 + $0x148] sm:$0xff]  ;;  %v535_v6 = vld [vmem:[%s8007_s22 + $0x140] sm:$0xff] }
  0x1f   : > { %v538_v7 = vld [vmem:[%s8007_s22 + $0x158] sm:$0xff]  ;;  %v537_v8 = vld [vmem:[%s8007_s22 + $0x150] sm:$0xff]  ;;  %v540_v9 = vld [vmem:[%s8007_s22 + $0x168] sm:$0xff] }
  0x20   : > { %v539_v10 = vld [vmem:[%s8007_s22 + $0x160] sm:$0xff]  ;;  %v542_v11 = vld [vmem:[%s8007_s22 + $0x178] sm:$0xff]  ;;  %v541_v12 = vld [vmem:[%s8007_s22 + $0x170] sm:$0xff] }
  0x21   : > { %6735 = vmatpush1.bf16.msra.mxu0 %v6734_v22  ;;  %v544_v13 = vld [vmem:[%s8007_s22 + $0x188] sm:$0xff]  ;;  %v543_v14 = vld [vmem:[%s8007_s22 + $0x180] sm:$0xff]  ;;  %v546_v15 = vld [vmem:[%s8007_s22 + $0x198] sm:$0xff] }
  0x22   : > { %6736 = vmatprep.subr.bf16.mxu0 %v7880_v3  ;;  %v545_v16 = vld [vmem:[%s8007_s22 + $0x190] sm:$0xff]  ;;  %v548_v17 = vld [vmem:[%s8007_s22 + $0x1a8] sm:$0xff]  ;;  %v547_v18 = vld [vmem:[%s8007_s22 + $0x1a0] sm:$0xff] }
  0x23   : > { %v550_v19 = vld [vmem:[%s8007_s22 + $0x1b8] sm:$0xff]  ;;  %v549_v20 = vld [vmem:[%s8007_s22 + $0x1b0] sm:$0xff]  ;;  %v552_v21 = vld [vmem:[%s8007_s22 + $0x1c8] sm:$0xff] }
  0x24   : > { %v551_v22 = vld [vmem:[%s8007_s22 + $0x1c0] sm:$0xff]  ;;  %v554_v23 = vld [vmem:[%s8007_s22 + $0x1d8] sm:$0xff]  ;;  %v553_v24 = vld [vmem:[%s8007_s22 + $0x1d0] sm:$0xff] }
  0x25   : > { %6738 = vmatpush1.bf16.msra.mxu0 %v6737_v25  ;;  %v556_v25 = vld [vmem:[%s8007_s22 + $0x1e8] sm:$0xff]  ;;  %v555_v26 = vld [vmem:[%s8007_s22 + $0x1e0] sm:$0xff]  ;;  %v558_v27 = vld [vmem:[%s8007_s22 + $0x1f8] sm:$0xff] }
  0x26   : > { %6739 = vmatprep.subr.bf16.mxu0 %v7880_v3 }
  0x29   : > { %6741 = vmatpush1.bf16.msra.mxu0 %v6740_v28  ;;  %v557_v28 = vld [vmem:[%s8007_s22 + $0x1f0] sm:$0xff]  ;;  %s5762_s22 = sshll.u32 %s10857_s19, 5 }
  0x2a   : > { %6815 = vmatprep.subr.bf16.mxu0 %v7880_v3  ;;  %s494_s21 = scalar_lea.vmem %s10842_s15, %s5762_s22 }
  0x2c   : > { %744 = vmatmul.mubr.f32.vlgmr.msra.gmra.mrb[0].mxu0 %v495_v29 }
  0x2d   : > { %5636 = vmatprep.mubr.msk.f32.mxu0 %vm582_vm0, %v498_v30 }
  0x30   : > { %749 = vmatmul.mubr.f32.gmra.mrb[2].mxu0 %v497_v31  ;;  %v8152_v31 = vld [vmem:[%s10828_s1 + $0x90] ss:$0 sm:$0xff] }
  0x31   : > { %5637 = vmatprep.mubr.msk.f32.mxu0 %vm582_vm0, %v500_v32 }
  0x34   : > { %754 = vmatmul.mubr.f32.gmra.mrb[4].mxu0 %v499_v33 }
  0x35   : > { %5638 = vmatprep.mubr.msk.f32.mxu0 %vm582_vm0, %v502_v34 }
  0x38   : > { %759 = vmatmul.mubr.f32.gmra.mrb[6].mxu0 %v501_v35 }
  0x39   : > { %5639 = vmatprep.mubr.msk.f32.mxu0 %vm582_vm0, %v504_v36 }
  0x3c   : > { %764 = vmatmul.mubr.f32.gmra.mrb[8].mxu0 %v503_v37 }
  0x3d   : > { %5640 = vmatprep.mubr.msk.f32.mxu0 %vm582_vm0, %v506_v38  ;;  %v1117_v38 = vld [vmem:[%s10837_s10 + $0x8] sm:$0xff] }
  0x3e   : > { %5668 = vmatprep.mubr.msk.f32.mxu1 %vm1158_vm1, %v1117_v38 }
  0x40   : > { %769 = vmatmul.mubr.f32.gmra.mrb[10].mxu0 %v505_v39 }
  0x41   : > { %5641 = vmatprep.mubr.msk.f32.mxu0 %vm582_vm0, %v508_v40 }
  0x44   : > { %774 = vmatmul.mubr.f32.gmra.mrb[12].mxu0 %v507_v41 }
  0x45   : > { %5642 = vmatprep.mubr.msk.f32.mxu0 %vm582_vm0, %v510_v42 }
  0x48   : > { %779 = vmatmul.mubr.f32.gmra.mrb[14].mxu0 %v509_v43 }
  0x49   : > { %5643 = vmatprep.mubr.msk.f32.mxu0 %vm582_vm0, %v512_v44 }
  0x4c   : > { %784 = vmatmul.mubr.f32.gmra.mrb[16].mxu0 %v511_v45 }
  0x4d   : > { %5644 = vmatprep.mubr.msk.f32.mxu0 %vm582_vm0, %v514_v46 }
  0x50   : > { %789 = vmatmul.mubr.f32.gmra.mrb[18].mxu0 %v513_v47 }
  0x51   : > { %5645 = vmatprep.mubr.msk.f32.mxu0 %vm582_vm0, %v516_v48 }
  0x54   : > { %794 = vmatmul.mubr.f32.gmra.mrb[20].mxu0 %v515_v49 }
  0x55   : > { %5646 = vmatprep.mubr.msk.f32.mxu0 %vm582_vm0, %v518_v50 }
  0x58   : > { %799 = vmatmul.mubr.f32.gmra.mrb[22].mxu0 %v517_v51 }
  0x59   : > { %5647 = vmatprep.mubr.msk.f32.mxu0 %vm582_vm0, %v520_v52 }
  0x5c   : > { %804 = vmatmul.mubr.f32.gmra.mrb[24].mxu0 %v519_v53 }
  0x5d   : > { %5648 = vmatprep.mubr.msk.f32.mxu0 %vm582_vm0, %v522_v54 }
  0x60   : > { %809 = vmatmul.mubr.f32.gmra.mrb[26].mxu0 %v521_v55 }
  0x61   : > { %5649 = vmatprep.mubr.msk.f32.mxu0 %vm582_vm0, %v524_v56 }
  0x64   : > { %814 = vmatmul.mubr.f32.gmra.mrb[28].mxu0 %v523_v57 }
  0x65   : > { %5650 = vmatprep.mubr.msk.f32.mxu0 %vm582_vm0, %v526_v58 }
  0x68   : > { %819 = vmatmul.mubr.f32.gmra.mrb[30].mxu0 %v525_v59 }
  0x69   : > { %5651 = vmatprep.mubr.msk.f32.mxu0 %vm582_vm0, %v528_v60 }
  0x6c   : > { %824 = vmatmul.mubr.f32.gmra.mrb[32].mxu0 %v527_v61 }
  0x6d   : > { %5652 = vmatprep.mubr.msk.f32.mxu0 %vm582_vm0, %v530_v62 }
  0x70   : > { %829 = vmatmul.mubr.f32.gmra.mrb[34].mxu0 %v529_v63 }
  0x71   : > { %5653 = vmatprep.mubr.msk.f32.mxu0 %vm582_vm0, %v532_v0 }
  0x74   : > { %834 = vmatmul.mubr.f32.gmra.mrb[36].mxu0 %v531_v1 }
  0x75   : > { %5654 = vmatprep.mubr.msk.f32.mxu0 %vm582_vm0, %v534_v2 }
  0x78   : > { %839 = vmatmul.mubr.f32.gmra.mrb[38].mxu0 %v533_v4 }
  0x79   : > { %5655 = vmatprep.mubr.msk.f32.mxu0 %vm582_vm0, %v536_v5 }
  0x7c   : > { %844 = vmatmul.mubr.f32.gmra.mrb[40].mxu0 %v535_v6 }
  0x7d   : > { %5656 = vmatprep.mubr.msk.f32.mxu0 %vm582_vm0, %v538_v7 }
  0x80   : > { %849 = vmatmul.mubr.f32.gmra.mrb[42].mxu0 %v537_v8 }
  0x81   : > { %5657 = vmatprep.mubr.msk.f32.mxu0 %vm582_vm0, %v540_v9 }
  0x84   : > { %854 = vmatmul.mubr.f32.gmra.mrb[44].mxu0 %v539_v10 }
  0x85   : > { %5658 = vmatprep.mubr.msk.f32.mxu0 %vm582_vm0, %v542_v11 }
  0x88   : > { %859 = vmatmul.mubr.f32.gmra.mrb[46].mxu0 %v541_v12 }
  0x89   : > { %5659 = vmatprep.mubr.msk.f32.mxu0 %vm582_vm0, %v544_v13 }
  0x8c   : > { %864 = vmatmul.mubr.f32.gmra.mrb[48].mxu0 %v543_v14 }
  0x8d   : > { %5660 = vmatprep.mubr.msk.f32.mxu0 %vm582_vm0, %v546_v15 }
  0x90   : > { %869 = vmatmul.mubr.f32.gmra.mrb[50].mxu0 %v545_v16 }
  0x91   : > { %5661 = vmatprep.mubr.msk.f32.mxu0 %vm582_vm0, %v548_v17 }
  0x94   : > { %874 = vmatmul.mubr.f32.gmra.mrb[52].mxu0 %v547_v18 }
  0x95   : > { %5662 = vmatprep.mubr.msk.f32.mxu0 %vm582_vm0, %v550_v19 }
  0x98   : > { %879 = vmatmul.mubr.f32.gmra.mrb[54].mxu0 %v549_v20 }
  0x99   : > { %5663 = vmatprep.mubr.msk.f32.mxu0 %vm582_vm0, %v552_v21 }
  0x9c   : > { %884 = vmatmul.mubr.f32.gmra.mrb[56].mxu0 %v551_v22 }
  0x9d   : > { %5664 = vmatprep.mubr.msk.f32.mxu0 %vm582_vm0, %v554_v23 }
  0xa0   : > { %889 = vmatmul.mubr.f32.gmra.mrb[58].mxu0 %v553_v24 }
  0xa1   : > { %5665 = vmatprep.mubr.msk.f32.mxu0 %vm582_vm0, %v556_v25 }
  0xa4   : > { %894 = vmatmul.mubr.f32.gmra.mrb[60].mxu0 %v555_v26 }
  0xa5   : > { %5666 = vmatprep.mubr.msk.f32.mxu0 %vm582_vm0, %v558_v27 }
  0xa8   : > { %899 = vmatmul.mubr.f32.gmra.mrb[62].mxu0 %v557_v28 }
  0xff   : > { %v745_v29 = vpop.f32.mrb[0].mxu0 }
 0x100   : > { %v747_v30 = vpop.f32.mrb[1].mxu0  ;;  %v746_v34 = vadd.f32 %v8152_v31, %v745_v29 }
 0x102   : > { %v904_v39 = vmax.f32 %v746_v34, 0.0 }
 0x103   : > { %v750_v32 = vpop.f32.mrb[2].mxu0 }
 0x104   : > { %v752_v33 = vpop.f32.mrb[3].mxu0  ;;  %v751_v40 = vadd.f32 %v8152_v31, %v750_v32 }
 0x106   : > { %v905_v46 = vmax.f32 %v751_v40, 0.0 }
 0x107   : > { %v755_v35 = vpop.f32.mrb[4].mxu0 }
 0x108   : > { %v756_v36 = vadd.f32 %v8152_v31, %v755_v35  ;;  %v757_v37 = vpop.f32.mrb[5].mxu0 }
 0x10a   : > { %v906_v41 = vmax.f32 %v756_v36, 0.0 }
 0x10b   : > { %v760_v42 = vpop.f32.mrb[6].mxu0 }
 0x10c   : > { %v936_v43 = vmax.f32 %v904_v39, %v906_v41  ;;  %v761_v44 = vadd.f32 %v8152_v31, %v760_v42  ;;  %v762_v45 = vpop.f32.mrb[7].mxu0 }
 0x10e   : > { %v907_v47 = vmax.f32 %v761_v44, 0.0  ;;  %v997_v52 = vrot.slane %v936_v43, 1 }
 0x10f   : > { %v765_v48 = vpop.f32.mrb[8].mxu0 }
 0x110   : > { %v937_v49 = vmax.f32 %v905_v46, %v907_v47  ;;  %v766_v50 = vadd.f32 %v8152_v31, %v765_v48  ;;  %v767_v51 = vpop.f32.mrb[9].mxu0 }
 0x112   : > { %v998_v53 = vrot.slane %v937_v49, 1  ;;  %v908_v54 = vmax.f32 %v766_v50, 0.0 }
 0x113   : > { %v770_v55 = vpop.f32.mrb[10].mxu0 }
 0x114   : > { %v938_v56 = vmax.f32 %v906_v41, %v908_v54  ;;  %v771_v57 = vadd.f32 %v8152_v31, %v770_v55  ;;  %v772_v58 = vpop.f32.mrb[11].mxu0  ;;  %v999_v59 = vsel %vm996_vm2, %v997_v52, %v998_v53 }
 0x115   : > { %v1086_v60 = vmax.f32 %v936_v43, %v999_v59 }
 0x116   : > { %v1000_v61 = vrot.slane %v938_v56, 1  ;;  %v909_v62 = vmax.f32 %v771_v57, 0.0 }
 0x117   : > { %v775_v63 = vpop.f32.mrb[12].mxu0 }
 0x118   : > { %v939_v0 = vmax.f32 %v907_v47, %v909_v62  ;;  %v776_v1 = vadd.f32 %v8152_v31, %v775_v63  ;;  %v777_v2 = vpop.f32.mrb[13].mxu0  ;;  %v1001_v4 = vsel %vm996_vm2, %v998_v53, %v1000_v61 }
 0x119   : > { %v1087_v5 = vmax.f32 %v937_v49, %v1001_v4 }
 0x11a   : > { %v1002_v6 = vrot.slane %v939_v0, 1  ;;  %v910_v7 = vmax.f32 %v776_v1, 0.0 }
 0x11b   : > { %v780_v8 = vpop.f32.mrb[14].mxu0  ;;  %v6743_v9 = vpack.c.bf16 %v1087_v5, %v1086_v60 }
 0x11c   : > { %v940_v10 = vmax.f32 %v908_v54, %v910_v7  ;;  %v781_v11 = vadd.f32 %v8152_v31, %v780_v8  ;;  %v782_v12 = vpop.f32.mrb[15].mxu0  ;;  %v1003_v13 = vsel %vm996_vm2, %v1000_v61, %v1002_v6 }
 0x11d   : > { %6744 = vmatpush1.bf16.msra.mxu1 %v6743_v9  ;;  %v1088_v14 = vmax.f32 %v938_v56, %v1003_v13 }
 0x11e   : > { %v1004_v15 = vrot.slane %v940_v10, 1  ;;  %v911_v16 = vmax.f32 %v781_v11, 0.0  ;;  %6745 = vmatprep.subr.bf16.mxu1 %v7880_v3 }
 0x11f   : > { %v785_v17 = vpop.f32.mrb[16].mxu0 }
 0x120   : > { %v941_v18 = vmax.f32 %v909_v62, %v911_v16  ;;  %v786_v19 = vadd.f32 %v8152_v31, %v785_v17  ;;  %v787_v20 = vpop.f32.mrb[17].mxu0  ;;  %v1005_v21 = vsel %vm996_vm2, %v1002_v6, %v1004_v15 }
 0x121   : > { %v1089_v22 = vmax.f32 %v939_v0, %v1005_v21 }
 0x122   : > { %v1006_v23 = vrot.slane %v941_v18, 1  ;;  %v912_v24 = vmax.f32 %v786_v19, 0.0 }
 0x123   : > { %v790_v25 = vpop.f32.mrb[18].mxu0  ;;  %v6746_v26 = vpack.c.bf16 %v1089_v22, %v1088_v14 }
 0x124   : > { %v942_v27 = vmax.f32 %v910_v7, %v912_v24  ;;  %v791_v28 = vadd.f32 %v8152_v31, %v790_v25  ;;  %v792_v29 = vpop.f32.mrb[19].mxu0  ;;  %v1007_v30 = vsel %vm996_vm2, %v1004_v15, %v1006_v23 }
 0x125   : > { %6747 = vmatpush1.bf16.msra.mxu1 %v6746_v26  ;;  %v1090_v32 = vmax.f32 %v940_v10, %v1007_v30 }
 0x126   : > { %v1008_v33 = vrot.slane %v942_v27, 1  ;;  %v913_v34 = vmax.f32 %v791_v28, 0.0  ;;  %6748 = vmatprep.subr.bf16.mxu1 %v7880_v3 }
 0x127   : > { %v795_v35 = vpop.f32.mrb[20].mxu0 }
 0x128   : > { %v943_v36 = vmax.f32 %v911_v16, %v913_v34  ;;  %v796_v37 = vadd.f32 %v8152_v31, %v795_v35  ;;  %v797_v38 = vpop.f32.mrb[21].mxu0  ;;  %v1009_v39 = vsel %vm996_vm2, %v1006_v23, %v1008_v33 }
 0x129   : > { %v1091_v40 = vmax.f32 %v941_v18, %v1009_v39 }
 0x12a   : > { %v1010_v41 = vrot.slane %v943_v36, 1  ;;  %v914_v42 = vmax.f32 %v796_v37, 0.0 }
 0x12b   : > { %v800_v43 = vpop.f32.mrb[22].mxu0  ;;  %v6749_v44 = vpack.c.bf16 %v1091_v40, %v1090_v32 }
 0x12c   : > { %v944_v45 = vmax.f32 %v912_v24, %v914_v42  ;;  %v801_v46 = vadd.f32 %v8152_v31, %v800_v43  ;;  %v802_v47 = vpop.f32.mrb[23].mxu0  ;;  %v1011_v48 = vsel %vm996_vm2, %v1008_v33, %v1010_v41 }
 0x12d   : > { %6750 = vmatpush1.bf16.msra.mxu1 %v6749_v44  ;;  %v1092_v49 = vmax.f32 %v942_v27, %v1011_v48 }
 0x12e   : > { %v1012_v50 = vrot.slane %v944_v45, 1  ;;  %v915_v51 = vmax.f32 %v801_v46, 0.0  ;;  %6751 = vmatprep.subr.bf16.mxu1 %v7880_v3 }
 0x12f   : > { %v805_v52 = vpop.f32.mrb[24].mxu0 }
 0x130   : > { %v945_v53 = vmax.f32 %v913_v34, %v915_v51  ;;  %v806_v54 = vadd.f32 %v8152_v31, %v805_v52  ;;  %v807_v55 = vpop.f32.mrb[25].mxu0  ;;  %v1013_v56 = vsel %vm996_vm2, %v1010_v41, %v1012_v50 }
 0x131   : > { %v1093_v57 = vmax.f32 %v943_v36, %v1013_v56 }
 0x132   : > { %v1014_v58 = vrot.slane %v945_v53, 1  ;;  %v916_v59 = vmax.f32 %v806_v54, 0.0 }
 0x133   : > { %v810_v60 = vpop.f32.mrb[26].mxu0  ;;  %v6752_v61 = vpack.c.bf16 %v1093_v57, %v1092_v49 }
 0x134   : > { %v946_v62 = vmax.f32 %v914_v42, %v916_v59  ;;  %v811_v63 = vadd.f32 %v8152_v31, %v810_v60  ;;  %v812_v0 = vpop.f32.mrb[27].mxu0  ;;  %v1015_v1 = vsel %vm996_vm2, %v1012_v50, %v1014_v58 }
 0x135   : > { %6753 = vmatpush1.bf16.msra.mxu1 %v6752_v61  ;;  %v1094_v2 = vmax.f32 %v944_v45, %v1015_v1 }
 0x136   : > { %v1016_v4 = vrot.slane %v946_v62, 1  ;;  %v917_v5 = vmax.f32 %v811_v63, 0.0  ;;  %6754 = vmatprep.subr.bf16.mxu1 %v7880_v3 }
 0x137   : > { %v815_v6 = vpop.f32.mrb[28].mxu0 }
 0x138   : > { %v947_v7 = vmax.f32 %v915_v51, %v917_v5  ;;  %v816_v8 = vadd.f32 %v8152_v31, %v815_v6  ;;  %v817_v9 = vpop.f32.mrb[29].mxu0  ;;  %v1017_v10 = vsel %vm996_vm2, %v1014_v58, %v1016_v4 }
 0x139   : > { %v1095_v11 = vmax.f32 %v945_v53, %v1017_v10 }
 0x13a   : > { %v1018_v12 = vrot.slane %v947_v7, 1  ;;  %v918_v13 = vmax.f32 %v816_v8, 0.0 }
 0x13b   : > { %v820_v14 = vpop.f32.mrb[30].mxu0  ;;  %v6755_v15 = vpack.c.bf16 %v1095_v11, %v1094_v2 }
 0x13c   : > { %v948_v16 = vmax.f32 %v916_v59, %v918_v13  ;;  %v821_v17 = vadd.f32 %v8152_v31, %v820_v14  ;;  %v822_v18 = vpop.f32.mrb[31].mxu0  ;;  %v1019_v19 = vsel %vm996_vm2, %v1016_v4, %v1018_v12 }
 0x13d   : > { %6756 = vmatpush1.bf16.msra.mxu1 %v6755_v15  ;;  %v1096_v20 = vmax.f32 %v946_v62, %v1019_v19 }
 0x13e   : > { %v1020_v21 = vrot.slane %v948_v16, 1  ;;  %v919_v22 = vmax.f32 %v821_v17, 0.0  ;;  %6757 = vmatprep.subr.bf16.mxu1 %v7880_v3 }
 0x13f   : > { %v825_v23 = vpop.f32.mrb[32].mxu0 }
 0x140   : > { %v949_v24 = vmax.f32 %v917_v5, %v919_v22  ;;  %v826_v25 = vadd.f32 %v8152_v31, %v825_v23  ;;  %v827_v26 = vpop.f32.mrb[33].mxu0  ;;  %v1021_v27 = vsel %vm996_vm2, %v1018_v12, %v1020_v21 }
 0x141   : > { %v1097_v28 = vmax.f32 %v947_v7, %v1021_v27 }
 0x142   : > { %v1022_v29 = vrot.slane %v949_v24, 1  ;;  %v920_v30 = vmax.f32 %v826_v25, 0.0 }
 0x143   : > { %v830_v32 = vpop.f32.mrb[34].mxu0  ;;  %v6758_v33 = vpack.c.bf16 %v1097_v28, %v1096_v20 }
 0x144   : > { %v950_v34 = vmax.f32 %v918_v13, %v920_v30  ;;  %v831_v35 = vadd.f32 %v8152_v31, %v830_v32  ;;  %v832_v36 = vpop.f32.mrb[35].mxu0  ;;  %v1023_v37 = vsel %vm996_vm2, %v1020_v21, %v1022_v29 }
 0x145   : > { %6759 = vmatpush1.bf16.msra.mxu1 %v6758_v33  ;;  %v1098_v38 = vmax.f32 %v948_v16, %v1023_v37 }
 0x146   : > { %v1024_v39 = vrot.slane %v950_v34, 1  ;;  %v921_v40 = vmax.f32 %v831_v35, 0.0  ;;  %6760 = vmatprep.subr.bf16.mxu1 %v7880_v3 }
 0x147   : > { %v835_v41 = vpop.f32.mrb[36].mxu0 }
 0x148   : > { %v951_v42 = vmax.f32 %v919_v22, %v921_v40  ;;  %v836_v43 = vadd.f32 %v8152_v31, %v835_v41  ;;  %v837_v44 = vpop.f32.mrb[37].mxu0  ;;  %v1025_v45 = vsel %vm996_vm2, %v1022_v29, %v1024_v39 }
 0x149   : > { %v1099_v46 = vmax.f32 %v949_v24, %v1025_v45 }
 0x14a   : > { %v1026_v47 = vrot.slane %v951_v42, 1  ;;  %v922_v48 = vmax.f32 %v836_v43, 0.0 }
 0x14b   : > { %v840_v49 = vpop.f32.mrb[38].mxu0  ;;  %v6761_v50 = vpack.c.bf16 %v1099_v46, %v1098_v38 }
 0x14c   : > { %v952_v51 = vmax.f32 %v920_v30, %v922_v48  ;;  %v841_v52 = vadd.f32 %v8152_v31, %v840_v49  ;;  %v842_v53 = vpop.f32.mrb[39].mxu0  ;;  %v1027_v54 = vsel %vm996_vm2, %v1024_v39, %v1026_v47 }
 0x14d   : > { %6762 = vmatpush1.bf16.msra.mxu1 %v6761_v50  ;;  %v1100_v55 = vmax.f32 %v950_v34, %v1027_v54 }
 0x14e   : > { %v1028_v56 = vrot.slane %v952_v51, 1  ;;  %v923_v57 = vmax.f32 %v841_v52, 0.0  ;;  %6763 = vmatprep.subr.bf16.mxu1 %v7880_v3 }
 0x14f   : > { %v845_v58 = vpop.f32.mrb[40].mxu0 }
 0x150   : > { %v953_v59 = vmax.f32 %v921_v40, %v923_v57  ;;  %v846_v60 = vadd.f32 %v8152_v31, %v845_v58  ;;  %v847_v61 = vpop.f32.mrb[41].mxu0  ;;  %v1029_v62 = vsel %vm996_vm2, %v1026_v47, %v1028_v56 }
 0x151   : > { %v1101_v63 = vmax.f32 %v951_v42, %v1029_v62 }
 0x152   : > { %v1030_v0 = vrot.slane %v953_v59, 1  ;;  %v924_v1 = vmax.f32 %v846_v60, 0.0 }
 0x153   : > { %v850_v2 = vpop.f32.mrb[42].mxu0  ;;  %v6764_v4 = vpack.c.bf16 %v1101_v63, %v1100_v55 }
 0x154   : > { %v954_v5 = vmax.f32 %v922_v48, %v924_v1  ;;  %v851_v6 = vadd.f32 %v8152_v31, %v850_v2  ;;  %v852_v7 = vpop.f32.mrb[43].mxu0  ;;  %v1031_v8 = vsel %vm996_vm2, %v1028_v56, %v1030_v0 }
 0x155   : > { %6765 = vmatpush1.bf16.msra.mxu1 %v6764_v4  ;;  %v1102_v9 = vmax.f32 %v952_v51, %v1031_v8 }
 0x156   : > { %v1032_v10 = vrot.slane %v954_v5, 1  ;;  %v925_v11 = vmax.f32 %v851_v6, 0.0  ;;  %6766 = vmatprep.subr.bf16.mxu1 %v7880_v3 }
 0x157   : > { %v855_v12 = vpop.f32.mrb[44].mxu0 }
 0x158   : > { %v955_v13 = vmax.f32 %v923_v57, %v925_v11  ;;  %v856_v14 = vadd.f32 %v8152_v31, %v855_v12  ;;  %v857_v15 = vpop.f32.mrb[45].mxu0  ;;  %v1033_v16 = vsel %vm996_vm2, %v1030_v0, %v1032_v10 }
 0x159   : > { %v1103_v17 = vmax.f32 %v953_v59, %v1033_v16 }
 0x15a   : > { %v1034_v18 = vrot.slane %v955_v13, 1  ;;  %v926_v19 = vmax.f32 %v856_v14, 0.0 }
 0x15b   : > { %v860_v20 = vpop.f32.mrb[46].mxu0  ;;  %v6767_v21 = vpack.c.bf16 %v1103_v17, %v1102_v9 }
 0x15c   : > { %v956_v22 = vmax.f32 %v924_v1, %v926_v19  ;;  %v861_v23 = vadd.f32 %v8152_v31, %v860_v20  ;;  %v862_v24 = vpop.f32.mrb[47].mxu0  ;;  %v1035_v25 = vsel %vm996_vm2, %v1032_v10, %v1034_v18 }
 0x15d   : > { %6768 = vmatpush1.bf16.msra.mxu1 %v6767_v21  ;;  %v1104_v26 = vmax.f32 %v954_v5, %v1035_v25 }
 0x15e   : > { %v1036_v27 = vrot.slane %v956_v22, 1  ;;  %v927_v28 = vmax.f32 %v861_v23, 0.0  ;;  %6769 = vmatprep.subr.bf16.mxu1 %v7880_v3 }
 0x15f   : > { %v865_v29 = vpop.f32.mrb[48].mxu0 }
 0x160   : > { %v957_v30 = vmax.f32 %v925_v11, %v927_v28  ;;  %v866_v32 = vadd.f32 %v8152_v31, %v865_v29  ;;  %v867_v33 = vpop.f32.mrb[49].mxu0  ;;  %v1037_v34 = vsel %vm996_vm2, %v1034_v18, %v1036_v27 }
 0x161   : > { %v1105_v35 = vmax.f32 %v955_v13, %v1037_v34 }
 0x162   : > { %v1038_v36 = vrot.slane %v957_v30, 1  ;;  %v928_v37 = vmax.f32 %v866_v32, 0.0 }
 0x163   : > { %v870_v38 = vpop.f32.mrb[50].mxu0  ;;  %v6770_v39 = vpack.c.bf16 %v1105_v35, %v1104_v26 }
 0x164   : > { %v958_v40 = vmax.f32 %v926_v19, %v928_v37  ;;  %v871_v41 = vadd.f32 %v8152_v31, %v870_v38  ;;  %v872_v42 = vpop.f32.mrb[51].mxu0  ;;  %v1039_v43 = vsel %vm996_vm2, %v1036_v27, %v1038_v36 }
 0x165   : > { %6771 = vmatpush1.bf16.msra.mxu1 %v6770_v39  ;;  %v1106_v44 = vmax.f32 %v956_v22, %v1039_v43 }
 0x166   : > { %v1040_v45 = vrot.slane %v958_v40, 1  ;;  %v929_v46 = vmax.f32 %v871_v41, 0.0  ;;  %6772 = vmatprep.subr.bf16.mxu1 %v7880_v3 }
 0x167   : > { %v875_v47 = vpop.f32.mrb[52].mxu0 }
 0x168   : > { %v959_v48 = vmax.f32 %v927_v28, %v929_v46  ;;  %v876_v49 = vadd.f32 %v8152_v31, %v875_v47  ;;  %v877_v50 = vpop.f32.mrb[53].mxu0  ;;  %v1041_v51 = vsel %vm996_vm2, %v1038_v36, %v1040_v45  ;;  %v1118_v47 = vld [vmem:[%s10837_s10 + $0x10] sm:$0xff] }
 0x169   : > { %v1107_v52 = vmax.f32 %v957_v30, %v1041_v51  ;;  %v1123_v50 = vld [vmem:[%s10837_s10 + $0x38] sm:$0xff]  ;;  %v1122_v51 = vld [vmem:[%s10837_s10 + $0x30] sm:$0xff] }
 0x16a   : > { %v1042_v53 = vrot.slane %v959_v48, 1  ;;  %v930_v54 = vmax.f32 %v876_v49, 0.0  ;;  %v1120_v49 = vld [vmem:[%s10837_s10 + $0x20] sm:$0xff] }
 0x16b   : > { %v880_v55 = vpop.f32.mrb[54].mxu0  ;;  %v6773_v56 = vpack.c.bf16 %v1107_v52, %v1106_v44  ;;  %v1125_v52 = vld [vmem:[%s10837_s10 + $0x48] sm:$0xff] }
 0x16c   : > { %v960_v57 = vmax.f32 %v928_v37, %v930_v54  ;;  %v881_v58 = vadd.f32 %v8152_v31, %v880_v55  ;;  %v882_v59 = vpop.f32.mrb[55].mxu0  ;;  %v1043_v60 = vsel %vm996_vm2, %v1040_v45, %v1042_v53  ;;  %v1116_v45 = vld [vmem:[%s10837_s10] sm:$0xff]  ;;  %v1126_v55 = vld [vmem:[%s10837_s10 + $0x50] sm:$0xff] }
 0x16d   : > { %6774 = vmatpush1.bf16.msra.mxu1 %v6773_v56  ;;  %v1108_v61 = vmax.f32 %v958_v40, %v1043_v60  ;;  %v1129_v56 = vld [vmem:[%s10837_s10 + $0x68] sm:$0xff]  ;;  %v1130_v59 = vld [vmem:[%s10837_s10 + $0x70] sm:$0xff] }
 0x16e   : > { %v1044_v62 = vrot.slane %v960_v57, 1  ;;  %v931_v63 = vmax.f32 %v881_v58, 0.0  ;;  %6775 = vmatprep.subr.bf16.mxu1 %v7880_v3  ;;  %v1131_v58 = vld [vmem:[%s10837_s10 + $0x78] sm:$0xff]  ;;  %v1133_v60 = vld [vmem:[%s10837_s10 + $0x88] sm:$0xff] }
 0x16f   : > { %v885_v0 = vpop.f32.mrb[56].mxu0 }
 0x170   : > { %v961_v1 = vmax.f32 %v929_v46, %v931_v63  ;;  %v886_v2 = vadd.f32 %v8152_v31, %v885_v0  ;;  %v887_v4 = vpop.f32.mrb[57].mxu0  ;;  %v1045_v5 = vsel %vm996_vm2, %v1042_v53, %v1044_v62  ;;  %v1119_v46 = vld [vmem:[%s10837_s10 + $0x18] sm:$0xff]  ;;  %v1124_v53 = vld [vmem:[%s10837_s10 + $0x40] sm:$0xff]  ;;  %v1137_v0 = vld [vmem:[%s10837_s10 + $0xa8] sm:$0xff] }
 0x171   : > { %v1109_v6 = vmax.f32 %v959_v48, %v1045_v5  ;;  %v1121_v48 = vld [vmem:[%s10837_s10 + $0x28] sm:$0xff]  ;;  %v1138_v4 = vld [vmem:[%s10837_s10 + $0xb0] sm:$0xff] }
 0x172   : > { %v1046_v7 = vrot.slane %v961_v1, 1  ;;  %v932_v8 = vmax.f32 %v886_v2, 0.0  ;;  %v1139_v2 = vld [vmem:[%s10837_s10 + $0xb8] sm:$0xff]  ;;  %v1141_v5 = vld [vmem:[%s10837_s10 + $0xc8] sm:$0xff] }
 0x173   : > { %v890_v9 = vpop.f32.mrb[58].mxu0  ;;  %v6776_v10 = vpack.c.bf16 %v1109_v6, %v1108_v61  ;;  %v1132_v61 = vld [vmem:[%s10837_s10 + $0x80] sm:$0xff] }
 0x174   : > { %v962_v11 = vmax.f32 %v930_v54, %v932_v8  ;;  %v891_v12 = vadd.f32 %v8152_v31, %v890_v9  ;;  %v892_v13 = vpop.f32.mrb[59].mxu0  ;;  %v1047_v14 = vsel %vm996_vm2, %v1044_v62, %v1046_v7  ;;  %v1127_v54 = vld [vmem:[%s10837_s10 + $0x58] sm:$0xff]  ;;  %v1140_v6 = vld [vmem:[%s10837_s10 + $0xc0] sm:$0xff]  ;;  %v1145_v9 = vld [vmem:[%s10837_s10 + $0xe8] sm:$0xff] }
 0x175   : > { %6777 = vmatpush1.bf16.msra.mxu1 %v6776_v10  ;;  %v1110_v15 = vmax.f32 %v960_v57, %v1047_v14  ;;  %v1128_v57 = vld [vmem:[%s10837_s10 + $0x60] sm:$0xff]  ;;  %v1135_v62 = vld [vmem:[%s10837_s10 + $0x98] sm:$0xff]  ;;  %v1149_v13 = vld [vmem:[%s10837_s10 + $0x108] sm:$0xff] }
 0x176   : > { %v1048_v16 = vrot.slane %v962_v11, 1  ;;  %v933_v17 = vmax.f32 %v891_v12, 0.0  ;;  %6778 = vmatprep.subr.bf16.mxu1 %v7880_v3  ;;  %v1144_v10 = vld [vmem:[%s10837_s10 + $0xe0] sm:$0xff]  ;;  %v1146_v12 = vld [vmem:[%s10837_s10 + $0xf0] sm:$0xff] }
 0x177   : > { %v895_v18 = vpop.f32.mrb[60].mxu0  ;;  %v1148_v14 = vld [vmem:[%s10837_s10 + $0x100] sm:$0xff] }
 0x178   : > { %v963_v19 = vmax.f32 %v931_v63, %v933_v17  ;;  %v896_v20 = vadd.f32 %v8152_v31, %v895_v18  ;;  %v897_v21 = vpop.f32.mrb[61].mxu0  ;;  %v1049_v22 = vsel %vm996_vm2, %v1046_v7, %v1048_v16  ;;  %v1134_v63 = vld [vmem:[%s10837_s10 + $0x90] sm:$0xff]  ;;  %v1143_v7 = vld [vmem:[%s10837_s10 + $0xd8] sm:$0xff]  ;;  %v1152_v18 = vld [vmem:[%s10837_s10 + $0x120] sm:$0xff] }
 0x179   : > { %v1111_v23 = vmax.f32 %v961_v1, %v1049_v22  ;;  %v1136_v1 = vld [vmem:[%s10837_s10 + $0xa0] sm:$0xff]  ;;  %v1157_v21 = vld [vmem:[%s10837_s10 + $0x148] sm:$0xff] }
 0x17a   : > { %v1050_v24 = vrot.slane %v963_v19, 1  ;;  %v934_v25 = vmax.f32 %v896_v20, 0.0  ;;  %v1154_v20 = vld [vmem:[%s10837_s10 + $0x130] sm:$0xff]  ;;  %v1156_v22 = vld [vmem:[%s10837_s10 + $0x140] sm:$0xff] }
 0x17b   : > { %v900_v26 = vpop.f32.mrb[62].mxu0  ;;  %v6779_v27 = vpack.c.bf16 %v1111_v23, %v1110_v15  ;;  %v1151_v15 = vld [vmem:[%s10837_s10 + $0x118] sm:$0xff]  ;;  %v1986_v23 = vld [vmem:[%s10829_s2] sm:$0xff] }
 0x17c   : > { %v964_v28 = vmax.f32 %v932_v8, %v934_v25  ;;  %v901_v29 = vadd.f32 %v8152_v31, %v900_v26  ;;  %v902_v30 = vpop.f32.mrb[63].mxu0  ;;  %v1051_v32 = vsel %vm996_vm2, %v1048_v16, %v1050_v24  ;;  %v1142_v8 = vld [vmem:[%s10837_s10 + $0xd0] sm:$0xff] }
 0x17d   : > { %6780 = vmatpush1.bf16.msra.mxu1 %v6779_v27  ;;  %v1112_v33 = vmax.f32 %v962_v11, %v1051_v32  ;;  %v1147_v11 = vld [vmem:[%s10837_s10 + $0xf8] sm:$0xff]  ;;  %v1150_v16 = vld [vmem:[%s10837_s10 + $0x110] sm:$0xff]  ;;  %v1991_v30 = vld [vmem:[%s10829_s2 + $0x28] sm:$0xff] }
 0x17e   : > { %v1052_v34 = vrot.slane %v964_v28, 1  ;;  %v935_v35 = vmax.f32 %v901_v29, 0.0  ;;  %6781 = vmatprep.subr.bf16.mxu1 %v7880_v3  ;;  %v1988_v26 = vld [vmem:[%s10829_s2 + $0x10] sm:$0xff]  ;;  %v1989_v27 = vld [vmem:[%s10829_s2 + $0x18] sm:$0xff]  ;;  %v1990_v29 = vld [vmem:[%s10829_s2 + $0x20] sm:$0xff] }
 0x17f   : > { %v6795_v32 = vpack.c.bf16 %v1991_v30, %v1990_v29  ;;  %v2289_v31 = vld [vmem:[%s10838_s11 + $0x10] sm:$0xff] }
 0x180   : > { %v965_v36 = vmax.f32 %v933_v17, %v935_v35  ;;  %v1053_v37 = vsel %vm996_vm2, %v1050_v24, %v1052_v34  ;;  %v1153_v17 = vld [vmem:[%s10837_s10 + $0x128] sm:$0xff] }
 0x181   : > { %v1113_v38 = vmax.f32 %v963_v19, %v1053_v37  ;;  %v1155_v19 = vld [vmem:[%s10837_s10 + $0x138] sm:$0xff]  ;;  %v1987_v24 = vld [vmem:[%s10829_s2 + $0x8] sm:$0xff] }
 0x182   : > { %v1054_v39 = vrot.slane %v965_v36, 1  ;;  %v6789_v25 = vpack.c.bf16 %v1987_v24, %v1986_v23 }
 0x183   : > { %v6782_v40 = vpack.c.bf16 %v1113_v38, %v1112_v33  ;;  %v1992_v33 = vld [vmem:[%s10829_s2 + $0x30] sm:$0xff] }
 0x184   : > { %v1055_v41 = vsel %vm996_vm2, %v1052_v34, %v1054_v39  ;;  %v1115_v42 = vmax.f32 %v965_v36, %v1054_v39  ;;  %v1993_v34 = vld [vmem:[%s10829_s2 + $0x38] sm:$0xff] }
 0x185   : > { %v1114_v43 = vmax.f32 %v964_v28, %v1055_v41  ;;  %6783 = vmatpush1.bf16.msra.mxu1 %v6782_v40  ;;  %v6792_v28 = vpack.c.bf16 %v1989_v27, %v1988_v26  ;;  %v6798_v36 = vpack.c.bf16 %v1993_v34, %v1992_v33  ;;  %v1994_v40 = vld [vmem:[%s10829_s2 + $0x40] sm:$0xff]  ;;  %v1995_v41 = vld [vmem:[%s10829_s2 + $0x48] sm:$0xff] }
 0x186   : > { %6784 = vmatprep.subr.bf16.mxu1 %v7880_v3 }
 0x187   : > { %v6785_v44 = vpack.c.bf16 %v1115_v42, %v1114_v43  ;;  %v6801_v42 = vpack.c.bf16 %v1995_v41, %v1994_v40 }
 0x189   : > { %6787 = vmatpush1.bf16.msk.msra.mxu1 %vm8234_vm4, %v6785_v44 }
 0x18a   : > { %6788 = vmatprep.subr.bf16.mxu1 %v7880_v3 }
 0x18c   : > { %1290 = vmatmul.mubr.f32.vlgmr.msra.gmra.mrb[0].mxu1 %v1116_v45  ;;  %v1996_v45 = vld [vmem:[%s10829_s2 + $0x50] sm:$0xff] }
 0x18d   : > { %5669 = vmatprep.mubr.msk.f32.mxu1 %vm1158_vm1, %v1119_v46  ;;  %6790 = vmatpush1.bf16.msra.mxu1 %v6789_v25  ;;  %v1997_v46 = vld [vmem:[%s10829_s2 + $0x58] sm:$0xff] }
 0x18e   : > { %6791 = vmatprep.subr.bf16.mxu1 %v7880_v3 }
 0x190   : > { %1295 = vmatmul.mubr.f32.gmra.mrb[2].mxu1 %v1118_v47  ;;  %v6804_v47 = vpack.c.bf16 %v1997_v46, %v1996_v45 }
 0x191   : > { %5670 = vmatprep.mubr.msk.f32.mxu1 %vm1158_vm1, %v1121_v48  ;;  %6793 = vmatpush1.bf16.msra.mxu1 %v6792_v28 }
 0x192   : > { %6794 = vmatprep.subr.bf16.mxu1 %v7880_v3 }
 0x194   : > { %1300 = vmatmul.mubr.f32.gmra.mrb[4].mxu1 %v1120_v49 }
 0x195   : > { %5671 = vmatprep.mubr.msk.f32.mxu1 %vm1158_vm1, %v1123_v50  ;;  %6796 = vmatpush1.bf16.msra.mxu1 %v6795_v32  ;;  %v1998_v50 = vld [vmem:[%s10829_s2 + $0x60] sm:$0xff] }
 0x196   : > { %6797 = vmatprep.subr.bf16.mxu1 %v7880_v3 }
 0x198   : > { %1305 = vmatmul.mubr.f32.gmra.mrb[6].mxu1 %v1122_v51  ;;  %v1999_v51 = vld [vmem:[%s10829_s2 + $0x68] sm:$0xff] }
 0x199   : > { %5672 = vmatprep.mubr.msk.f32.mxu1 %vm1158_vm1, %v1125_v52  ;;  %6799 = vmatpush1.bf16.msra.mxu1 %v6798_v36  ;;  %v6807_v52 = vpack.c.bf16 %v1999_v51, %v1998_v50 }
 0x19a   : > { %6800 = vmatprep.subr.bf16.mxu1 %v7880_v3 }
 0x19c   : > { %1310 = vmatmul.mubr.f32.gmra.mrb[8].mxu1 %v1124_v53 }
 0x19d   : > { %5673 = vmatprep.mubr.msk.f32.mxu1 %vm1158_vm1, %v1127_v54  ;;  %6802 = vmatpush1.bf16.msra.mxu1 %v6801_v42 }
 0x19e   : > { %6803 = vmatprep.subr.bf16.mxu1 %v7880_v3 }
 0x1a0   : > { %1315 = vmatmul.mubr.f32.gmra.mrb[10].mxu1 %v1126_v55 }
 0x1a1   : > { %5674 = vmatprep.mubr.msk.f32.mxu1 %vm1158_vm1, %v1129_v56  ;;  %6805 = vmatpush1.bf16.msra.mxu1 %v6804_v47 }
 0x1a2   : > { %6806 = vmatprep.subr.bf16.mxu1 %v7880_v3 }
 0x1a4   : > { %1320 = vmatmul.mubr.f32.gmra.mrb[12].mxu1 %v1128_v57 }
 0x1a5   : > { %5675 = vmatprep.mubr.msk.f32.mxu1 %vm1158_vm1, %v1131_v58  ;;  %6808 = vmatpush1.bf16.msra.mxu1 %v6807_v52  ;;  %v2000_v58 = vld [vmem:[%s10829_s2 + $0x70] sm:$0xff] }
 0x1a6   : > { %6809 = vmatprep.subr.bf16.mxu1 %v7880_v3 }
 0x1a8   : > { %1325 = vmatmul.mubr.f32.gmra.mrb[14].mxu1 %v1130_v59  ;;  %v2001_v59 = vld [vmem:[%s10829_s2 + $0x78] sm:$0xff] }
 0x1a9   : > { %5676 = vmatprep.mubr.msk.f32.mxu1 %vm1158_vm1, %v1133_v60 }
 0x1ac   : > { %1330 = vmatmul.mubr.f32.gmra.mrb[16].mxu1 %v1132_v61  ;;  %v6810_v61 = vpack.c.bf16 %v2001_v59, %v2000_v58 }
 0x1ad   : > { %5677 = vmatprep.mubr.msk.f32.mxu1 %vm1158_vm1, %v1135_v62 }
 0x1ae   : > { %6811 = vmatpush1.bf16.msra.mxu1 %v6810_v61 }
 0x1af   : > { %6812 = vmatprep.subr.bf16.mxu1 %v7880_v3 }
 0x1b0   : > { %1335 = vmatmul.mubr.f32.gmra.mrb[18].mxu1 %v1134_v63 }
 0x1b1   : > { %5678 = vmatprep.mubr.msk.f32.mxu1 %vm1158_vm1, %v1137_v0 }
 0x1b4   : > { %1340 = vmatmul.mubr.f32.gmra.mrb[20].mxu1 %v1136_v1 }
 0x1b5   : > { %5679 = vmatprep.mubr.msk.f32.mxu1 %vm1158_vm1, %v1139_v2 }
 0x1b8   : > { %1345 = vmatmul.mubr.f32.gmra.mrb[22].mxu1 %v1138_v4 }
 0x1b9   : > { %5680 = vmatprep.mubr.msk.f32.mxu1 %vm1158_vm1, %v1141_v5 }
 0x1bc   : > { %1350 = vmatmul.mubr.f32.gmra.mrb[24].mxu1 %v1140_v6  ;;  %v2002_v6 = vld [vmem:[%s10829_s2 + $0x80] sm:$0xff] }
 0x1bd   : > { %5681 = vmatprep.mubr.msk.f32.mxu1 %vm1158_vm1, %v1143_v7  ;;  %v2003_v7 = vld [vmem:[%s10829_s2 + $0x88] sm:$0xff] }
 0x1c0   : > { %1355 = vmatmul.mubr.f32.gmra.mrb[26].mxu1 %v1142_v8  ;;  %v6813_v8 = vpack.c.bf16 %v2003_v7, %v2002_v6 }
 0x1c1   : > { %5682 = vmatprep.mubr.msk.f32.mxu1 %vm1158_vm1, %v1145_v9 }
 0x1c2   : > { %6814 = vmatpush1.bf16.msra.mxu1 %v6813_v8 }
 0x1c4   : > { %1360 = vmatmul.mubr.f32.gmra.mrb[28].mxu1 %v1144_v10 }
 0x1c5   : > { %5683 = vmatprep.mubr.msk.f32.mxu1 %vm1158_vm1, %v1147_v11 }
 0x1c8   : > { %1365 = vmatmul.mubr.f32.gmra.mrb[30].mxu1 %v1146_v12 }
 0x1c9   : > { %5684 = vmatprep.mubr.msk.f32.mxu1 %vm1158_vm1, %v1149_v13 }
 0x1cc   : > { %1370 = vmatmul.mubr.f32.gmra.mrb[32].mxu1 %v1148_v14 }
 0x1cd   : > { %5685 = vmatprep.mubr.msk.f32.mxu1 %vm1158_vm1, %v1151_v15 }
 0x1d0   : > { %1375 = vmatmul.mubr.f32.gmra.mrb[34].mxu1 %v1150_v16 }
 0x1d1   : > { %5686 = vmatprep.mubr.msk.f32.mxu1 %vm1158_vm1, %v1153_v17 }
 0x1d4   : > { %1380 = vmatmul.mubr.f32.gmra.mrb[36].mxu1 %v1152_v18 }
 0x1d5   : > { %5687 = vmatprep.mubr.msk.f32.mxu1 %vm1158_vm1, %v1155_v19 }
 0x1d8   : > { %1385 = vmatmul.mubr.f32.gmra.mrb[38].mxu1 %v1154_v20 }
 0x1d9   : > { %5688 = vmatprep.mubr.msk.f32.mxu1 %vm1158_vm1, %v1157_v21 }
 0x1dc   : > { %1390 = vmatmul.mubr.f32.gmra.mrb[40].mxu1 %v1156_v22 }
 0x25f   : > { %v1291_v35 = vpop.f32.mrb[0].mxu1 }
 0x260   : > { %1395 = vst.msk [vmem:[#allocation2] sm:$0xff] %vm582_vm0, %v1291_v35  ;;  %v1293_v37 = vpop.f32.mrb[1].mxu1 }
 0x263   : > { %v1296_v38 = vpop.f32.mrb[2].mxu1 }
 0x264   : > { %1396 = vst.msk [vmem:[#allocation2 + $0x8] sm:$0xff] %vm582_vm0, %v1296_v38  ;;  %v1298_v39 = vpop.f32.mrb[3].mxu1 }
 0x267   : > { %v1301_v43 = vpop.f32.mrb[4].mxu1 }
 0x268   : > { %1397 = vst.msk [vmem:[#allocation2 + $0x10] sm:$0xff] %vm582_vm0, %v1301_v43  ;;  %v1303_v44 = vpop.f32.mrb[5].mxu1 }
 0x26b   : > { %v1306_v48 = vpop.f32.mrb[6].mxu1  ;;  %v1432_v54 = vld [vmem:[#allocation2 + $0x1] sm:$0xff] }
 0x26c   : > { %1398 = vst.msk [vmem:[#allocation2 + $0x18] sm:$0xff] %vm582_vm0, %v1306_v48  ;;  %v1308_v49 = vpop.f32.mrb[7].mxu1  ;;  %v1448_v63 = vld [vmem:[#allocation2 + $0x2] sm:$0xff] }
 0x26f   : > { %v1311_v53 = vpop.f32.mrb[8].mxu1  ;;  %v1433_v55 = vld [vmem:[#allocation2 + $0x9] sm:$0xff] }
 0x270   : > { %1399 = vst.msk [vmem:[#allocation2 + $0x20] sm:$0xff] %vm582_vm0, %v1311_v53  ;;  %v1313_v56 = vpop.f32.mrb[9].mxu1  ;;  %v7430_v57 = vpack.i.bf16 %v1433_v55, %v1432_v54  ;;  %v1449_v60 = vld [vmem:[#allocation2 + $0xa] sm:$0xff] }
 0x271   : > { %v8445_v0 = vld [vmem:[#allocation2 + $0x10] sm:$0xff]  ;;  %v7435_v4 = vpack.i.bf16 %v1449_v60, %v1448_v63 }
 0x272   : > { %7431 = vrot.lane.b32.xlu0 %v7430_v57, %s7882_s24 }
 0x273   : > { %v1316_v62 = vpop.f32.mrb[10].mxu1  ;;  %v8447_v1 = vld [vmem:[#allocation2 + $0x18] sm:$0xff] }
 0x274   : > { %1400 = vst.msk [vmem:[#allocation2 + $0x28] sm:$0xff] %vm582_vm0, %v1316_v62  ;;  %v1318_v2 = vpop.f32.mrb[11].mxu1  ;;  %v7440_v5 = vpack.i.bf16 %v8447_v1, %v8445_v0  ;;  %v1450_v9 = vld [vmem:[#allocation2 + $0x12] sm:$0xff] }
 0x275   : > { %v1434_v12 = vld [vmem:[#allocation2 + $0x11] sm:$0xff] }
 0x276   : > { %7436 = vrot.lane.b32.xlu0 %v7435_v4, %s10845_s28  ;;  %7441 = vrot.lane.b32.xlu1 %v7440_v5, %s7884_s29 }
 0x277   : > { %v1321_v10 = vpop.f32.mrb[12].mxu1  ;;  %v1451_v11 = vld [vmem:[#allocation2 + $0x1a] sm:$0xff] }
 0x278   : > { %v1435_v13 = vld [vmem:[#allocation2 + $0x19] sm:$0xff]  ;;  %1401 = vst.msk [vmem:[#allocation2 + $0x30] sm:$0xff] %vm582_vm0, %v1321_v10  ;;  %v1323_v14 = vpop.f32.mrb[13].mxu1  ;;  %v7450_v15 = vpack.i.bf16 %v1451_v11, %v1450_v9 }
 0x279   : > { %v7445_v16 = vpack.i.bf16 %v1435_v13, %v1434_v12  ;;  %v8470_v22 = vld [vmem:[#allocation2 + $0x20] sm:$0xff] }
 0x27a   : > { %7451 = vrot.lane.b32.xlu0 %v7450_v15, %s7885_s30 }
 0x27b   : > { %7446 = vrot.lane.b32.xlu1 %v7445_v16, %s10847_s16  ;;  %v1326_v17 = vpop.f32.mrb[14].mxu1  ;;  %v1452_v18 = vld [vmem:[#allocation2 + $0x22] sm:$0xff] }
 0x27c   : > { %1402 = vst.msk [vmem:[#allocation2 + $0x38] sm:$0xff] %vm582_vm0, %v1326_v17  ;;  %5690 = vmatprep.mubr.msk.f32.mxu1 %vm582_vm0, %v1452_v18  ;;  %v1328_v19 = vpop.f32.mrb[15].mxu1  ;;  %v8466_v20 = vld [vmem:[#allocation2 + $0x28] sm:$0xff] }
 0x27d   : > { %v1436_v23 = vld [vmem:[#allocation2 + $0x21] sm:$0xff]  ;;  %v7465_v25 = vpack.i.bf16 %v8466_v20, %v8470_v22 }
 0x27e   : > { %7461 = vrot.lane.b32.xlu0 %v7450_v15, %s10845_s28 }
 0x27f   : > { %7456 = vrot.lane.b32.xlu1 %v7445_v16, %s7882_s24  ;;  %v1331_v21 = vpop.f32.mrb[16].mxu1  ;;  %v1437_v24 = vld [vmem:[#allocation2 + $0x29] sm:$0xff] }
 0x280   : > { %1403 = vst.msk [vmem:[#allocation2 + $0x40] sm:$0xff] %vm582_vm0, %v1331_v21  ;;  %v7475_v26 = vpack.i.bf16 %v1437_v24, %v1436_v23  ;;  %v1333_v27 = vpop.f32.mrb[17].mxu1  ;;  %v8478_v30 = vld [vmem:[#allocation2 + $0x2a] sm:$0xff] }
 0x281   : > { %v7485_v33 = vpack.i.bf16 %v8478_v30, %v1452_v18  ;;  %v8488_v36 = vld [vmem:[#allocation2 + $0x30] sm:$0xff] }
 0x282   : > { %7476 = vrot.lane.b32.xlu0 %v7475_v26, %s7888_s20 }
 0x283   : > { %7466 = vrot.lane.b32.xlu1 %v7465_v25, %s10843_s17  ;;  %v1336_v28 = vpop.f32.mrb[18].mxu1  ;;  %v8484_v35 = vld [vmem:[#allocation2 + $0x38] sm:$0xff] }
 0x284   : > { %1404 = vst.msk [vmem:[#allocation2 + $0x48] sm:$0xff] %vm582_vm0, %v1336_v28  ;;  %v1338_v29 = vpop.f32.mrb[19].mxu1  ;;  %v7500_v38 = vpack.i.bf16 %v8484_v35, %v8488_v36  ;;  %v1438_v41 = vld [vmem:[#allocation2 + $0x31] sm:$0xff] }
 0x285   : > { %v8500_v46 = vld [vmem:[#allocation2 + $0x32] sm:$0xff] }
 0x286   : > { %7481 = vrot.lane.b32.xlu0 %v7475_v26, %s10847_s16 }
 0x287   : > { %7471 = vrot.lane.b32.xlu1 %v7465_v25, %s7884_s29  ;;  %v1341_v32 = vpop.f32.mrb[20].mxu1  ;;  %v1439_v40 = vld [vmem:[#allocation2 + $0x39] sm:$0xff] }
 0x288   : > { %1405 = vst.msk [vmem:[#allocation2 + $0x50] sm:$0xff] %vm582_vm0, %v1341_v32  ;;  %v1343_v34 = vpop.f32.mrb[21].mxu1  ;;  %v7510_v43 = vpack.i.bf16 %v1439_v40, %v1438_v41  ;;  %v8496_v45 = vld [vmem:[#allocation2 + $0x3a] sm:$0xff] }
 0x289   : > { %v7520_v48 = vpack.i.bf16 %v8496_v45, %v8500_v46  ;;  %v8507_v51 = vld [vmem:[#allocation2 + $0x40] sm:$0xff] }
 0x28a   : > { %7491 = vrot.lane.b32.xlu0 %v7475_v26, %s7882_s24 }
 0x28b   : > { %7486 = vrot.lane.b32.xlu1 %v7485_v33, %s7885_s30  ;;  %v1346_v37 = vpop.f32.mrb[22].mxu1  ;;  %v8510_v53 = vld [vmem:[#allocation2 + $0x48] sm:$0xff] }
 0x28c   : > { %1406 = vst.msk [vmem:[#allocation2 + $0x58] sm:$0xff] %vm582_vm0, %v1346_v37  ;;  %v1348_v39 = vpop.f32.mrb[23].mxu1  ;;  %v1440_v54 = vld [vmem:[#allocation2 + $0x41] sm:$0xff]  ;;  %v7535_v57 = vpack.i.bf16 %v8510_v53, %v8507_v51 }
 0x28d   : > { %v8520_v62 = vld [vmem:[#allocation2 + $0x42] sm:$0xff] }
 0x28e   : > { %7501 = vrot.lane.b32.xlu0 %v7500_v38, %s10843_s17 }
 0x28f   : > { %7496 = vrot.lane.b32.xlu1 %v7485_v33, %s10845_s28  ;;  %v1351_v42 = vpop.f32.mrb[24].mxu1  ;;  %v1441_v55 = vld [vmem:[#allocation2 + $0x49] sm:$0xff] }
 0x290   : > { %1407 = vst.msk [vmem:[#allocation2 + $0x60] sm:$0xff] %vm582_vm0, %v1351_v42  ;;  %v1353_v44 = vpop.f32.mrb[25].mxu1  ;;  %v7545_v58 = vpack.i.bf16 %v1441_v55, %v1440_v54  ;;  %v8522_v63 = vld [vmem:[#allocation2 + $0x4a] sm:$0xff] }
 0x291   : > { %v7555_v4 = vpack.i.bf16 %v8522_v63, %v8520_v62  ;;  %v8529_v6 = vld [vmem:[#allocation2 + $0x50] sm:$0xff] }
 0x292   : > { %7506 = vrot.lane.b32.xlu0 %v7500_v38, %s7884_s29 }
 0x293   : > { %7511 = vrot.lane.b32.xlu1 %v7510_v43, %s7888_s20  ;;  %v1356_v47 = vpop.f32.mrb[26].mxu1  ;;  %v8531_v7 = vld [vmem:[#allocation2 + $0x58] sm:$0xff] }
 0x294   : > { %1408 = vst.msk [vmem:[#allocation2 + $0x68] sm:$0xff] %vm582_vm0, %v1356_v47  ;;  %v1358_v49 = vpop.f32.mrb[27].mxu1  ;;  %v7570_v9 = vpack.i.bf16 %v8531_v7, %v8529_v6  ;;  %v1442_v11 = vld [vmem:[#allocation2 + $0x51] sm:$0xff] }
 0x295   : > { %v8541_v16 = vld [vmem:[#allocation2 + $0x52] sm:$0xff] }
 0x296   : > { %7521 = vrot.lane.b32.xlu0 %v7520_v48, %s7885_s30 }
 0x297   : > { %7516 = vrot.lane.b32.xlu1 %v7510_v43, %s10847_s16  ;;  %v1361_v50 = vpop.f32.mrb[28].mxu1  ;;  %v1443_v12 = vld [vmem:[#allocation2 + $0x59] sm:$0xff] }
 0x298   : > { %1409 = vst.msk [vmem:[#allocation2 + $0x70] sm:$0xff] %vm582_vm0, %v1361_v50  ;;  %v1363_v52 = vpop.f32.mrb[29].mxu1  ;;  %v7580_v14 = vpack.i.bf16 %v1443_v12, %v1442_v11  ;;  %v8543_v17 = vld [vmem:[#allocation2 + $0x5a] sm:$0xff] }
 0x299   : > { %v7590_v19 = vpack.i.bf16 %v8543_v17, %v8541_v16  ;;  %v8552_v23 = vld [vmem:[#allocation2 + $0x60] sm:$0xff] }
 0x29a   : > { %7531 = vrot.lane.b32.xlu0 %v7520_v48, %s10845_s28  ;;  %v1416_v12 = vld [vmem:[#allocation2] sm:$0xff] }
 0x29b   : > { %7526 = vrot.lane.b32.xlu1 %v7510_v43, %s7882_s24  ;;  %v1366_v56 = vpop.f32.mrb[30].mxu1  ;;  %v8554_v24 = vld [vmem:[#allocation2 + $0x68] sm:$0xff] }
 0x29c   : > { %1410 = vst.msk [vmem:[#allocation2 + $0x78] sm:$0xff] %vm582_vm0, %v1366_v56  ;;  %v1368_v59 = vpop.f32.mrb[31].mxu1  ;;  %v1444_v25 = vld [vmem:[#allocation2 + $0x61] sm:$0xff]  ;;  %v7605_v27 = vpack.i.bf16 %v8554_v24, %v8552_v23 }
 0x29d   : > { %v8562_v29 = vld [vmem:[#allocation2 + $0x62] sm:$0xff] }
 0x29e   : > { %7546 = vrot.lane.b32.xlu0 %v7545_v58, %s7888_s20 }
 0x29f   : > { %7536 = vrot.lane.b32.xlu1 %v7535_v57, %s10843_s17  ;;  %v1371_v60 = vpop.f32.mrb[32].mxu1  ;;  %v1445_v26 = vld [vmem:[#allocation2 + $0x69] sm:$0xff] }
 0x2a0   : > { %1411 = vst.msk [vmem:[#allocation2 + $0x80] sm:$0xff] %vm582_vm0, %v1371_v60  ;;  %v1373_v61 = vpop.f32.mrb[33].mxu1  ;;  %v7615_v28 = vpack.i.bf16 %v1445_v26, %v1444_v25  ;;  %v8564_v32 = vld [vmem:[#allocation2 + $0x6a] sm:$0xff] }
 0x2a1   : > { %v7625_v33 = vpack.i.bf16 %v8564_v32, %v8562_v29  ;;  %v8570_v34 = vld [vmem:[#allocation2 + $0x70] sm:$0xff] }
 0x2a2   : > { %7551 = vrot.lane.b32.xlu0 %v7545_v58, %s10847_s16 }
 0x2a3   : > { %7541 = vrot.lane.b32.xlu1 %v7535_v57, %s7884_s29  ;;  %v1376_v2 = vpop.f32.mrb[34].mxu1  ;;  %v8572_v37 = vld [vmem:[#allocation2 + $0x78] sm:$0xff] }
 0x2a4   : > { %1412 = vst.msk [vmem:[#allocation2 + $0x88] sm:$0xff] %vm582_vm0, %v1376_v2  ;;  %v1378_v5 = vpop.f32.mrb[35].mxu1  ;;  %v7640_v38 = vpack.i.bf16 %v8572_v37, %v8570_v34  ;;  %v1446_v39 = vld [vmem:[#allocation2 + $0x71] sm:$0xff] }
 0x2a5   : > { %v8580_v42 = vld [vmem:[#allocation2 + $0x72] sm:$0xff] }
 0x2a6   : > { %7561 = vrot.lane.b32.xlu0 %v7545_v58, %s7882_s24 }
 0x2a7   : > { %7556 = vrot.lane.b32.xlu1 %v7555_v4, %s7885_s30  ;;  %v1381_v8 = vpop.f32.mrb[36].mxu1  ;;  %v1447_v40 = vld [vmem:[#allocation2 + $0x79] sm:$0xff] }
 0x2a8   : > { %1413 = vst.msk [vmem:[#allocation2 + $0x90] sm:$0xff] %vm582_vm0, %v1381_v8  ;;  %v1383_v10 = vpop.f32.mrb[37].mxu1  ;;  %v7650_v41 = vpack.i.bf16 %v1447_v40, %v1446_v39  ;;  %v8582_v43 = vld [vmem:[#allocation2 + $0x7a] sm:$0xff] }
 0x2a9   : > { %v7660_v44 = vpack.i.bf16 %v8582_v43, %v8580_v42  ;;  %v1464_v47 = vld [vmem:[#allocation2 + $0x80] sm:$0xff] }
 0x2aa   : > { %7571 = vrot.lane.b32.xlu0 %v7570_v9, %s10843_s17 }
 0x2ab   : > { %7566 = vrot.lane.b32.xlu1 %v7555_v4, %s10845_s28  ;;  %v1386_v13 = vpop.f32.mrb[38].mxu1  ;;  %v1465_v48 = vld [vmem:[#allocation2 + $0x88] sm:$0xff] }
 0x2ac   : > { %1414 = vst.msk [vmem:[#allocation2 + $0x98] sm:$0xff] %vm582_vm0, %v1386_v13  ;;  %v1388_v15 = vpop.f32.mrb[39].mxu1  ;;  %v1466_v49 = vld [vmem:[#allocation2 + $0x81] sm:$0xff]  ;;  %v7675_v52 = vpack.i.bf16 %v1465_v48, %v1464_v47 }
 0x2ad   : > { %v8596_v55 = vld [vmem:[#allocation2 + $0x82] sm:$0xff] }
 0x2ae   : > { %7576 = vrot.lane.b32.xlu0 %v7570_v9, %s7884_s29 }
 0x2af   : > { %7581 = vrot.lane.b32.xlu1 %v7580_v14, %s7888_s20  ;;  %v1391_v18 = vpop.f32.mrb[40].mxu1  ;;  %v1467_v50 = vld [vmem:[#allocation2 + $0x89] sm:$0xff] }
 0x2b0   : > { %1415 = vst.msk [vmem:[#allocation2 + $0xa0] sm:$0xff] %vm582_vm0, %v1391_v18  ;;  %v1393_v21 = vpop.f32.mrb[41].mxu1  ;;  %v7685_v54 = vpack.i.bf16 %v1467_v50, %v1466_v49  ;;  %v1470_v56 = vld [vmem:[#allocation2 + $0x90] sm:$0xff]  ;;  %v1417_v18 = vld [vmem:[#allocation2 + $0x8] sm:$0xff] }
 0x2b1   : > { %v8601_v57 = vld [vmem:[#allocation2 + $0x8a] sm:$0xff] }
 0x2b2   : > { %7591 = vrot.lane.b32.xlu0 %v7590_v19, %s7885_s30 }
 0x2b3   : > { %7586 = vrot.lane.b32.xlu1 %v7580_v14, %s10847_s16  ;;  %v1472_v58 = vld [vmem:[#allocation2 + $0x91] sm:$0xff] }
 0x2b4   : > { %v1471_v60 = vld [vmem:[#allocation2 + $0x98] sm:$0xff] }
 0x2b6   : > { %7601 = vrot.lane.b32.xlu0 %v7590_v19, %s10845_s28 }
 0x2b7   : > { %7596 = vrot.lane.b32.xlu1 %v7580_v14, %s7882_s24  ;;  %v1473_v61 = vld [vmem:[#allocation2 + $0x99] sm:$0xff] }
 0x2ba   : > { %7616 = vrot.lane.b32.xlu0 %v7615_v28, %s7888_s20 }
 0x2bb   : > { %7606 = vrot.lane.b32.xlu1 %v7605_v27, %s10843_s17 }
 0x2be   : > { %7621 = vrot.lane.b32.xlu0 %v7615_v28, %s10847_s16 }
 0x2bf   : > { %7611 = vrot.lane.b32.xlu1 %v7605_v27, %s7884_s29 }
 0x2c2   : > { %7631 = vrot.lane.b32.xlu0 %v7615_v28, %s7882_s24 }
 0x2c3   : > { %7626 = vrot.lane.b32.xlu1 %v7625_v33, %s7885_s30 }
 0x2c6   : > { %7641 = vrot.lane.b32.xlu0 %v7640_v38, %s10843_s17 }
 0x2c7   : > { %7636 = vrot.lane.b32.xlu1 %v7625_v33, %s10845_s28 }
 0x2ca   : > { %7646 = vrot.lane.b32.xlu0 %v7640_v38, %s7884_s29 }
 0x2cb   : > { %7651 = vrot.lane.b32.xlu1 %v7650_v41, %s7888_s20 }
 0x2ce   : > { %7661 = vrot.lane.b32.xlu0 %v7660_v44, %s7885_s30 }
 0x2cf   : > { %7656 = vrot.lane.b32.xlu1 %v7650_v41, %s10847_s16 }
 0x2d2   : > { %7671 = vrot.lane.b32.xlu0 %v7660_v44, %s10845_s28 }
 0x2d3   : > { %7666 = vrot.lane.b32.xlu1 %v7650_v41, %s7882_s24 }
 0x2d6   : > { %7686 = vrot.lane.b32.xlu0 %v7685_v54, %s7888_s20 }
 0x2d7   : > { %7676 = vrot.lane.b32.xlu1 %v7675_v52, %s10843_s17 }
 0x2da   : > { %7691 = vrot.lane.b32.xlu0 %v7685_v54, %s10847_s16 }
 0x2db   : > { %7681 = vrot.lane.b32.xlu1 %v7675_v52, %s7884_s29 }
 0x2de   : > { %1798 = vrot.lane.b32.xlu0 %v1470_v56, %s10843_s17 }
 0x2df   : > { %1748 = vrot.lane.b32.xlu1 %v8596_v55, %s7885_s30 }
 0x2e2   : > { %1750 = vrot.lane.b32.xlu0 %v8601_v57, %s7885_s30 }
 0x2e3   : > { %1848 = vrot.lane.b32.xlu1 %v1472_v58, %s7888_s20 }
 0x2e4   : > { %v7432_v59 = vpop.permute.xlu0 %7431 }
 0x2e5   : > { %v7433_v5 = vunpack.i.l.bf16 %v7432_v59  ;;  %v7434_v9 = vunpack.i.h.bf16 %v7432_v59 }
 0x2e6   : > { %1850 = vrot.lane.b32.xlu0 %v1473_v61, %s7888_s20 }
 0x2e7   : > { %1800 = vrot.lane.b32.xlu1 %v1471_v60, %s10843_s17  ;;  %v1868_v14 = vsel %vm582_vm0, %v1416_v12, %v7433_v5  ;;  %v1869_v25 = vsel %vm582_vm0, %v1417_v18, %v7434_v9  ;;  %s10853_s17 = smov 96  }
 0x2e8   : > { %v7437_v2 = vpop.permute.xlu0 %7436  ;;  %v7442_v4 = vpop.permute.xlu1 %7441 }
 0x2e9   : > { %v7438_v8 = vunpack.i.l.bf16 %v7437_v2  ;;  %v7439_v13 = vunpack.i.h.bf16 %v7437_v2  ;;  %v7443_v15 = vunpack.i.l.bf16 %v7442_v4  ;;  %v7444_v26 = vunpack.i.h.bf16 %v7442_v4 }
 0x2eb   : > { %v1885_v19 = vsel %vm1884_vm5, %v1868_v14, %v7438_v8  ;;  %v1886_v33 = vsel %vm1884_vm5, %v1869_v25, %v7439_v13 }
 0x2ec   : > { %v7452_v10 = vpop.permute.xlu0 %7451  ;;  %v1902_v39 = vsel %vm1901_vm6, %v1885_v19, %v7443_v15  ;;  %v1903_v44 = vsel %vm1901_vm6, %v1886_v33, %v7444_v26 }
 0x2ed   : > { %v7447_v11 = vpop.permute.xlu1 %7446  ;;  %v7453_v40 = vunpack.i.l.bf16 %v7452_v10  ;;  %v7454_v47 = vunpack.i.h.bf16 %v7452_v10 }
 0x2ee   : > { %v7448_v21 = vunpack.i.l.bf16 %v7447_v11  ;;  %v7449_v38 = vunpack.i.h.bf16 %v7447_v11 }
 0x2f0   : > { %v7462_v27 = vpop.permute.xlu0 %7461  ;;  %v1919_v41 = vsel %vm1918_vm7, %v1902_v39, %v7448_v21  ;;  %v1920_v50 = vsel %vm1918_vm7, %v1903_v44, %v7449_v38 }
 0x2f1   : > { %v7457_v28 = vpop.permute.xlu1 %7456  ;;  %v1936_v58 = vsel %vm1935_vm8, %v1919_v41, %v7453_v40  ;;  %v1937_v5 = vsel %vm1935_vm8, %v1920_v50, %v7454_v47  ;;  %v7463_v10 = vunpack.i.l.bf16 %v7462_v27  ;;  %v7464_v19 = vunpack.i.h.bf16 %v7462_v27 }
 0x2f2   : > { %v7458_v8 = vunpack.i.l.bf16 %v7457_v28  ;;  %v7459_v14 = vunpack.i.h.bf16 %v7457_v28 }
 0x2f4   : > { %v7477_v49 = vpop.permute.xlu0 %7476  ;;  %v1870_v15 = vsel %vm582_vm0, %v8445_v0, %v7458_v8  ;;  %v1871_v33 = vsel %vm582_vm0, %v8447_v1, %v7459_v14 }
 0x2f5   : > { %v7467_v48 = vpop.permute.xlu1 %7466  ;;  %v7478_v56 = vunpack.i.l.bf16 %v7477_v49  ;;  %v7479_v60 = vunpack.i.h.bf16 %v7477_v49  ;;  %v1887_v21 = vsel %vm1884_vm5, %v1870_v15, %v7463_v10  ;;  %v1888_v0 = vsel %vm1884_vm5, %v1871_v33, %v7464_v19 }
 0x2f6   : > { %v7469_v52 = vunpack.i.h.bf16 %v7467_v48  ;;  %v7468_v54 = vunpack.i.l.bf16 %v7467_v48 }
 0x2f8   : > { %v1953_v59 = vsel %vm1952_vm9, %v1936_v58, %v7468_v54  ;;  %v7482_v2 = vpop.permute.xlu0 %7481  ;;  %v1954_v9 = vsel %vm1952_vm9, %v1937_v5, %v7469_v52 }
 0x2f9   : > { %v7472_v61 = vpop.permute.xlu1 %7471  ;;  %v1970_v4 = vsel %vm1969_vm10, %v1953_v59, %v7478_v56  ;;  %v1971_v13 = vsel %vm1969_vm10, %v1954_v9, %v7479_v60  ;;  %v7483_v25 = vunpack.i.l.bf16 %v7482_v2  ;;  %v7484_v41 = vunpack.i.h.bf16 %v7482_v2 }
 0x2fa   : > { %2108 = vmatmul.mubr.f32.vlgmr.msra.gmra.mrb[42].mxu1 %v1970_v4  ;;  %v7473_v18 = vunpack.i.l.bf16 %v7472_v61  ;;  %v7474_v38 = vunpack.i.h.bf16 %v7472_v61 }
 0x2fb   : > { %5691 = vmatprep.mubr.msk.f32.mxu1 %vm582_vm0, %v8478_v30 }
 0x2fc   : > { %v7492_v12 = vpop.permute.xlu0 %7491  ;;  %v1904_v28 = vsel %vm1901_vm6, %v1887_v21, %v7473_v18  ;;  %v1905_v47 = vsel %vm1901_vm6, %v1888_v0, %v7474_v38 }
 0x2fd   : > { %v7487_v11 = vpop.permute.xlu1 %7486  ;;  %v1921_v44 = vsel %vm1918_vm7, %v1904_v28, %v7483_v25  ;;  %v1922_v58 = vsel %vm1918_vm7, %v1905_v47, %v7484_v41  ;;  %v7493_v59 = vunpack.i.l.bf16 %v7492_v12  ;;  %v7494_v5 = vunpack.i.h.bf16 %v7492_v12 }
 0x2fe   : > { %2113 = vmatmul.mubr.f32.gmra.mrb[44].mxu1 %v1971_v13  ;;  %v7488_v39 = vunpack.i.l.bf16 %v7487_v11  ;;  %v7489_v48 = vunpack.i.h.bf16 %v7487_v11 }
 0x2ff   : > { %5692 = vmatprep.mubr.msk.f32.mxu1 %vm582_vm0, %v8500_v46  ;;  %v1872_v14 = vsel %vm582_vm0, %v8470_v22, %v7493_v59  ;;  %v1873_v12 = vsel %vm582_vm0, %v8466_v20, %v7494_v5 }
 0x300   : > { %v7502_v30 = vpop.permute.xlu0 %7501  ;;  %v1938_v50 = vsel %vm1935_vm8, %v1921_v44, %v7488_v39  ;;  %v1939_v4 = vsel %vm1935_vm8, %v1922_v58, %v7489_v48 }
 0x301   : > { %v7497_v26 = vpop.permute.xlu1 %7496  ;;  %v7503_v40 = vunpack.i.l.bf16 %v7502_v30  ;;  %v7504_v52 = vunpack.i.h.bf16 %v7502_v30 }
 0x302   : > { %v7498_v2 = vunpack.i.l.bf16 %v7497_v26  ;;  %v7499_v10 = vunpack.i.h.bf16 %v7497_v26 }
 0x303   : > { %v1955_v1 = vsel %vm1952_vm9, %v1938_v50, %v7503_v40  ;;  %v1956_v9 = vsel %vm1952_vm9, %v1939_v4, %v7504_v52 }
 0x304   : > { %v7507_v46 = vpop.permute.xlu0 %7506  ;;  %v1889_v21 = vsel %vm1884_vm5, %v1872_v14, %v7498_v2  ;;  %v1890_v30 = vsel %vm1884_vm5, %v1873_v12, %v7499_v10 }
 0x305   : > { %v7512_v27 = vpop.permute.xlu1 %7511  ;;  %v7508_v8 = vunpack.i.l.bf16 %v7507_v46  ;;  %v7509_v15 = vunpack.i.h.bf16 %v7507_v46 }
 0x306   : > { %v7513_v49 = vunpack.i.l.bf16 %v7512_v27  ;;  %v7514_v54 = vunpack.i.h.bf16 %v7512_v27 }
 0x307   : > { %v1906_v25 = vsel %vm1901_vm6, %v1889_v21, %v7508_v8  ;;  %v1907_v33 = vsel %vm1901_vm6, %v1890_v30, %v7509_v15 }
 0x308   : > { %v1972_v56 = vsel %vm1969_vm10, %v1955_v1, %v7513_v49  ;;  %v7522_v60 = vpop.permute.xlu0 %7521  ;;  %v1973_v13 = vsel %vm1969_vm10, %v1956_v9, %v7514_v54 }
 0x309   : > { %v7517_v61 = vpop.permute.xlu1 %7516  ;;  %2118 = vmatmul.mubr.f32.gmra.mrb[46].mxu1 %v1972_v56  ;;  %v7523_v26 = vunpack.i.l.bf16 %v7522_v60  ;;  %v7524_v38 = vunpack.i.h.bf16 %v7522_v60 }
 0x30a   : > { %5693 = vmatprep.mubr.msk.f32.mxu1 %vm582_vm0, %v8496_v45  ;;  %v7518_v11 = vunpack.i.l.bf16 %v7517_v61  ;;  %v7519_v45 = vunpack.i.h.bf16 %v7517_v61 }
 0x30c   : > { %v7532_v18 = vpop.permute.xlu0 %7531  ;;  %v1923_v22 = vsel %vm1918_vm7, %v1906_v25, %v7518_v11  ;;  %v1924_v40 = vsel %vm1918_vm7, %v1907_v33, %v7519_v45 }
 0x30d   : > { %v7527_v19 = vpop.permute.xlu1 %7526  ;;  %2123 = vmatmul.mubr.f32.gmra.mrb[48].mxu1 %v1973_v13  ;;  %v1940_v44 = vsel %vm1935_vm8, %v1923_v22, %v7523_v26  ;;  %v1941_v49 = vsel %vm1935_vm8, %v1924_v40, %v7524_v38  ;;  %v7533_v1 = vunpack.i.l.bf16 %v7532_v18  ;;  %v7534_v2 = vunpack.i.h.bf16 %v7532_v18 }
 0x30e   : > { %5694 = vmatprep.mubr.msk.f32.mxu1 %vm582_vm0, %v8520_v62  ;;  %v7528_v50 = vunpack.i.l.bf16 %v7527_v19  ;;  %v7529_v59 = vunpack.i.h.bf16 %v7527_v19 }
 0x310   : > { %v7547_v39 = vpop.permute.xlu0 %7546  ;;  %v1874_v60 = vsel %vm582_vm0, %v8488_v36, %v7528_v50  ;;  %v1875_v9 = vsel %vm582_vm0, %v8484_v35, %v7529_v59 }
 0x311   : > { %v7537_v28 = vpop.permute.xlu1 %7536  ;;  %v7548_v62 = vunpack.i.l.bf16 %v7547_v39  ;;  %v7549_v46 = vunpack.i.h.bf16 %v7547_v39  ;;  %v1891_v4 = vsel %vm1884_vm5, %v1874_v60, %v7533_v1  ;;  %v1892_v36 = vsel %vm1884_vm5, %v1875_v9, %v7534_v2 }
 0x312   : > { %v7539_v0 = vunpack.i.h.bf16 %v7537_v28  ;;  %v7538_v41 = vunpack.i.l.bf16 %v7537_v28 }
 0x314   : > { %v1957_v20 = vsel %vm1952_vm9, %v1940_v44, %v7538_v41  ;;  %v7552_v47 = vpop.permute.xlu0 %7551  ;;  %v1958_v52 = vsel %vm1952_vm9, %v1941_v49, %v7539_v0 }
 0x315   : > { %v7542_v27 = vpop.permute.xlu1 %7541  ;;  %v1974_v48 = vsel %vm1969_vm10, %v1957_v20, %v7548_v62  ;;  %v1975_v58 = vsel %vm1969_vm10, %v1958_v52, %v7549_v46  ;;  %v7553_v5 = vunpack.i.l.bf16 %v7552_v47  ;;  %v7554_v15 = vunpack.i.h.bf16 %v7552_v47 }
 0x316   : > { %2128 = vmatmul.mubr.f32.gmra.mrb[50].mxu1 %v1974_v48  ;;  %v7543_v61 = vunpack.i.l.bf16 %v7542_v27  ;;  %v7544_v10 = vunpack.i.h.bf16 %v7542_v27 }
 0x317   : > { %5695 = vmatprep.mubr.msk.f32.mxu1 %vm582_vm0, %v8522_v63 }
 0x318   : > { %v7562_v56 = vpop.permute.xlu0 %7561  ;;  %v1908_v11 = vsel %vm1901_vm6, %v1891_v4, %v7543_v61  ;;  %v1909_v21 = vsel %vm1901_vm6, %v1892_v36, %v7544_v10 }
 0x319   : > { %v7557_v54 = vpop.permute.xlu1 %7556  ;;  %v1925_v19 = vsel %vm1918_vm7, %v1908_v11, %v7553_v5  ;;  %v1926_v33 = vsel %vm1918_vm7, %v1909_v21, %v7554_v15  ;;  %v7563_v38 = vunpack.i.l.bf16 %v7562_v56  ;;  %v7564_v41 = vunpack.i.h.bf16 %v7562_v56 }
 0x31a   : > { %2133 = vmatmul.mubr.f32.gmra.mrb[52].mxu1 %v1975_v58  ;;  %v7558_v13 = vunpack.i.l.bf16 %v7557_v54  ;;  %v7559_v45 = vunpack.i.h.bf16 %v7557_v54 }
 0x31b   : > { %5696 = vmatprep.mubr.msk.f32.mxu1 %vm582_vm0, %v8541_v16  ;;  %v1876_v47 = vsel %vm582_vm0, %v8507_v51, %v7563_v38  ;;  %v1877_v1 = vsel %vm582_vm0, %v8510_v53, %v7564_v41 }
 0x31c   : > { %v7572_v63 = vpop.permute.xlu0 %7571  ;;  %v1942_v25 = vsel %vm1935_vm8, %v1925_v19, %v7558_v13  ;;  %v1943_v0 = vsel %vm1935_vm8, %v1926_v33, %v7559_v45 }
 0x31d   : > { %v7567_v8 = vpop.permute.xlu1 %7566  ;;  %v7573_v14 = vunpack.i.l.bf16 %v7572_v63  ;;  %v7574_v26 = vunpack.i.h.bf16 %v7572_v63 }
 0x31e   : > { %v7568_v40 = vunpack.i.l.bf16 %v7567_v8  ;;  %v7569_v20 = vunpack.i.h.bf16 %v7567_v8 }
 0x31f   : > { %v1959_v35 = vsel %vm1952_vm9, %v1942_v25, %v7573_v14  ;;  %v1960_v44 = vsel %vm1952_vm9, %v1943_v0, %v7574_v26 }
 0x320   : > { %v7577_v16 = vpop.permute.xlu0 %7576  ;;  %v1893_v52 = vsel %vm1884_vm5, %v1876_v47, %v7568_v40  ;;  %v1894_v58 = vsel %vm1884_vm5, %v1877_v1, %v7569_v20 }
 0x321   : > { %v7582_v18 = vpop.permute.xlu1 %7581  ;;  %v7578_v62 = vunpack.i.l.bf16 %v7577_v16  ;;  %v7579_v48 = vunpack.i.h.bf16 %v7577_v16 }
 0x322   : > { %v7583_v12 = vunpack.i.l.bf16 %v7582_v18  ;;  %v7584_v30 = vunpack.i.h.bf16 %v7582_v18 }
 0x323   : > { %v1910_v54 = vsel %vm1901_vm6, %v1893_v52, %v7578_v62  ;;  %v1911_v59 = vsel %vm1901_vm6, %v1894_v58, %v7579_v48 }
 0x324   : > { %v1976_v22 = vsel %vm1969_vm10, %v1959_v35, %v7583_v12  ;;  %v7592_v28 = vpop.permute.xlu0 %7591  ;;  %v1977_v27 = vsel %vm1969_vm10, %v1960_v44, %v7584_v30 }
 0x325   : > { %v7587_v39 = vpop.permute.xlu1 %7586  ;;  %2138 = vmatmul.mubr.f32.gmra.mrb[54].mxu1 %v1976_v22  ;;  %v7593_v56 = vunpack.i.l.bf16 %v7592_v28  ;;  %v7594_v60 = vunpack.i.h.bf16 %v7592_v28 }
 0x326   : > { %5697 = vmatprep.mubr.msk.f32.mxu1 %vm582_vm0, %v8543_v17  ;;  %v7588_v46 = vunpack.i.l.bf16 %v7587_v39  ;;  %v7589_v17 = vunpack.i.h.bf16 %v7587_v39 }
 0x328   : > { %v7602_v49 = vpop.permute.xlu0 %7601  ;;  %v1927_v51 = vsel %vm1918_vm7, %v1910_v54, %v7588_v46  ;;  %v1928_v4 = vsel %vm1918_vm7, %v1911_v59, %v7589_v17 }
 0x329   : > { %v7597_v50 = vpop.permute.xlu1 %7596  ;;  %2143 = vmatmul.mubr.f32.gmra.mrb[56].mxu1 %v1977_v27  ;;  %v1944_v63 = vsel %vm1935_vm8, %v1927_v51, %v7593_v56  ;;  %v1945_v14 = vsel %vm1935_vm8, %v1928_v4, %v7594_v60  ;;  %v7603_v19 = vunpack.i.l.bf16 %v7602_v49  ;;  %v7604_v26 = vunpack.i.h.bf16 %v7602_v49 }
 0x32a   : > { %5698 = vmatprep.mubr.msk.f32.mxu1 %vm582_vm0, %v8562_v29  ;;  %v7598_v36 = vunpack.i.l.bf16 %v7597_v50  ;;  %v7599_v45 = vunpack.i.h.bf16 %v7597_v50 }
 0x32c   : > { %v7617_v2 = vpop.permute.xlu0 %7616  ;;  %v1878_v12 = vsel %vm582_vm0, %v8529_v6, %v7598_v36  ;;  %v1879_v33 = vsel %vm582_vm0, %v8531_v7, %v7599_v45 }
 0x32d   : > { %v7607_v61 = vpop.permute.xlu1 %7606  ;;  %v7618_v29 = vunpack.i.l.bf16 %v7617_v2  ;;  %v7619_v9 = vunpack.i.h.bf16 %v7617_v2  ;;  %v1895_v35 = vsel %vm1884_vm5, %v1878_v12, %v7603_v19  ;;  %v1896_v6 = vsel %vm1884_vm5, %v1879_v33, %v7604_v26 }
 0x32e   : > { %v7609_v5 = vunpack.i.h.bf16 %v7607_v61  ;;  %v7608_v8 = vunpack.i.l.bf16 %v7607_v61 }
 0x330   : > { %v1961_v53 = vsel %vm1952_vm9, %v1944_v63, %v7608_v8  ;;  %v7622_v11 = vpop.permute.xlu0 %7621  ;;  %v1962_v15 = vsel %vm1952_vm9, %v1945_v14, %v7609_v5 }
 0x331   : > { %v7612_v10 = vpop.permute.xlu1 %7611  ;;  %v1978_v13 = vsel %vm1969_vm10, %v1961_v53, %v7618_v29  ;;  %v1979_v21 = vsel %vm1969_vm10, %v1962_v15, %v7619_v9  ;;  %v7623_v30 = vunpack.i.l.bf16 %v7622_v11  ;;  %v7624_v0 = vunpack.i.h.bf16 %v7622_v11 }
 0x332   : > { %2148 = vmatmul.mubr.f32.gmra.mrb[58].mxu1 %v1978_v13  ;;  %v7613_v25 = vunpack.i.l.bf16 %v7612_v10  ;;  %v7614_v38 = vunpack.i.h.bf16 %v7612_v10 }
 0x333   : > { %5699 = vmatprep.mubr.msk.f32.mxu1 %vm582_vm0, %v8564_v32 }
 0x334   : > { %v7632_v18 = vpop.permute.xlu0 %7631  ;;  %v1912_v28 = vsel %vm1901_vm6, %v1895_v35, %v7613_v25  ;;  %v1913_v44 = vsel %vm1901_vm6, %v1896_v6, %v7614_v38 }
 0x335   : > { %v7627_v16 = vpop.permute.xlu1 %7626  ;;  %v1929_v41 = vsel %vm1918_vm7, %v1912_v28, %v7623_v30  ;;  %v1930_v50 = vsel %vm1918_vm7, %v1913_v44, %v7624_v0  ;;  %v7633_v52 = vunpack.i.l.bf16 %v7632_v18  ;;  %v7634_v58 = vunpack.i.h.bf16 %v7632_v18 }
 0x336   : > { %2153 = vmatmul.mubr.f32.gmra.mrb[60].mxu1 %v1979_v21  ;;  %v7628_v39 = vunpack.i.l.bf16 %v7627_v16  ;;  %v7629_v20 = vunpack.i.h.bf16 %v7627_v16 }
 0x337   : > { %5700 = vmatprep.mubr.msk.f32.mxu1 %vm582_vm0, %v8580_v42  ;;  %v1880_v4 = vsel %vm582_vm0, %v8552_v23, %v7633_v52  ;;  %v1881_v53 = vsel %vm582_vm0, %v8554_v24, %v7634_v58  ;;  %v1475_v52 = vld [vmem:[#allocation2 + $0x9a] sm:$0xff] }
 0x338   : > { %v7642_v32 = vpop.permute.xlu0 %7641  ;;  %v1946_v27 = vsel %vm1935_vm8, %v1929_v41, %v7628_v39  ;;  %v1947_v56 = vsel %vm1935_vm8, %v1930_v50, %v7629_v20 }
 0x339   : > { %v7637_v22 = vpop.permute.xlu1 %7636  ;;  %v7643_v40 = vunpack.i.l.bf16 %v7642_v32  ;;  %v7644_v47 = vunpack.i.h.bf16 %v7642_v32 }
 0x33a   : > { %v7638_v54 = vunpack.i.l.bf16 %v7637_v22  ;;  %v7639_v60 = vunpack.i.h.bf16 %v7637_v22 }
 0x33b   : > { %v1963_v7 = vsel %vm1952_vm9, %v1946_v27, %v7643_v40  ;;  %v1964_v59 = vsel %vm1952_vm9, %v1947_v56, %v7644_v47  ;;  %v1474_v27 = vld [vmem:[#allocation2 + $0x92] sm:$0xff] }
 0x33c   : > { %v7647_v42 = vpop.permute.xlu0 %7646  ;;  %v1897_v63 = vsel %vm1884_vm5, %v1880_v4, %v7638_v54  ;;  %v1898_v11 = vsel %vm1884_vm5, %v1881_v53, %v7639_v60 }
 0x33d   : > { %v7652_v62 = vpop.permute.xlu1 %7651  ;;  %v7648_v51 = vunpack.i.l.bf16 %v7647_v42  ;;  %v7649_v5 = vunpack.i.h.bf16 %v7647_v42 }
 0x33e   : > { %v7653_v46 = vunpack.i.l.bf16 %v7652_v62  ;;  %v7654_v48 = vunpack.i.h.bf16 %v7652_v62 }
 0x33f   : > { %v1914_v9 = vsel %vm1901_vm6, %v1897_v63, %v7648_v51  ;;  %v1915_v14 = vsel %vm1901_vm6, %v1898_v11, %v7649_v5  ;;  %v8767_v5 = vld [vmem:[%s10829_s2 + $0x90] ss:$0 sm:$0xff] }
 0x340   : > { %v1980_v49 = vsel %vm1969_vm10, %v1963_v7, %v7653_v46  ;;  %v7662_v17 = vpop.permute.xlu0 %7661  ;;  %v1981_v2 = vsel %vm1969_vm10, %v1964_v59, %v7654_v48  ;;  %v7890_v59 = vmov 0.0  }
 0x341   : > { %v7657_v1 = vpop.permute.xlu1 %7656  ;;  %2158 = vmatmul.mubr.f32.gmra.mrb[62].mxu1 %v1980_v49  ;;  %v7663_v10 = vunpack.i.l.bf16 %v7662_v17  ;;  %v7664_v36 = vunpack.i.h.bf16 %v7662_v17  ;;  %6474 = vmatprep.mubr.msk.f32.mxu0 %vm7889_vm11, %v7890_v59 }
 0x342   : > { %5701 = vmatprep.mubr.msk.f32.mxu1 %vm582_vm0, %v8582_v43  ;;  %v7658_v61 = vunpack.i.l.bf16 %v7657_v1  ;;  %v7659_v43 = vunpack.i.h.bf16 %v7657_v1 }
 0x344   : > { %v7672_v8 = vpop.permute.xlu0 %7671  ;;  %v1931_v23 = vsel %vm1918_vm7, %v1914_v9, %v7658_v61  ;;  %v1932_v16 = vsel %vm1918_vm7, %v1915_v14, %v7659_v43 }
 0x345   : > { %v7667_v29 = vpop.permute.xlu1 %7666  ;;  %2163 = vmatmul.mubr.f32.gmra.mrb[64].mxu1 %v1981_v2  ;;  %v7673_v45 = vunpack.i.l.bf16 %v7672_v8  ;;  %v1948_v24 = vsel %vm1935_vm8, %v1931_v23, %v7663_v10  ;;  %v1949_v33 = vsel %vm1935_vm8, %v1932_v16, %v7664_v36  ;;  %v7674_v40 = vunpack.i.h.bf16 %v7672_v8 }
 0x346   : > { %5702 = vmatprep.mubr.msk.f32.mxu1 %vm582_vm0, %v8596_v55  ;;  %v7668_v13 = vunpack.i.l.bf16 %v7667_v29  ;;  %v7669_v26 = vunpack.i.h.bf16 %v7667_v29 }
 0x348   : > { %v7687_v19 = vpop.permute.xlu0 %7686  ;;  %v1882_v12 = vsel %vm582_vm0, %v8570_v34, %v7668_v13  ;;  %v1883_v0 = vsel %vm582_vm0, %v8572_v37, %v7669_v26 }
 0x349   : > { %v7677_v15 = vpop.permute.xlu1 %7676  ;;  %v7688_v21 = vunpack.i.l.bf16 %v7687_v19  ;;  %v7689_v35 = vunpack.i.h.bf16 %v7687_v19  ;;  %v1899_v34 = vsel %vm1884_vm5, %v1882_v12, %v7673_v45  ;;  %v1900_v47 = vsel %vm1884_vm5, %v1883_v0, %v7674_v40 }
 0x34a   : > { %v7679_v18 = vunpack.i.h.bf16 %v7677_v15  ;;  %v7678_v55 = vunpack.i.l.bf16 %v7677_v15 }
 0x34c   : > { %v1965_v25 = vsel %vm1952_vm9, %v1948_v24, %v7678_v55  ;;  %v7692_v22 = vpop.permute.xlu0 %7691  ;;  %v1966_v39 = vsel %vm1952_vm9, %v1949_v33, %v7679_v18 }
 0x34d   : > { %v7682_v30 = vpop.permute.xlu1 %7681  ;;  %v1982_v32 = vsel %vm1969_vm10, %v1965_v25, %v7688_v21  ;;  %v7693_v28 = vunpack.i.l.bf16 %v7692_v22  ;;  %v1983_v20 = vsel %vm1969_vm10, %v1966_v39, %v7689_v35 }
 0x34e   : > { %v7683_v38 = vunpack.i.l.bf16 %v7682_v30  ;;  %2168 = vmatmul.mubr.f32.gmra.mrb[66].mxu1 %v1982_v32  ;;  %v7684_v41 = vunpack.i.h.bf16 %v7682_v30 }
 0x34f   : > { %5703 = vmatprep.mubr.msk.f32.mxu1 %vm582_vm0, %v8601_v57  ;;  %v7694_v57 = vunpack.i.h.bf16 %v7692_v22 }
 0x350   : > { %v1916_v6 = vsel %vm1901_vm6, %v1899_v34, %v7683_v38  ;;  %v1799_v44 = vpop.permute.xlu0 %1798  ;;  %v1917_v37 = vsel %vm1901_vm6, %v1900_v47, %v7684_v41 }
 0x351   : > { %v1749_v42 = vpop.permute.xlu1 %1748  ;;  %v1933_v62 = vsel %vm1918_vm7, %v1916_v6, %v7693_v28  ;;  %v1934_v17 = vsel %vm1918_vm7, %v1917_v37, %v7694_v57 }
 0x352   : > { %v1950_v46 = vsel %vm1935_vm8, %v1933_v62, %v1749_v42  ;;  %2173 = vmatmul.mubr.f32.gmra.mrb[68].mxu1 %v1983_v20 }
 0x353   : > { %5704 = vmatprep.mubr.msk.f32.mxu1 %vm582_vm0, %v1474_v27  ;;  %v1967_v7 = vsel %vm1952_vm9, %v1950_v46, %v1799_v44 }
 0x354   : > { %v1751_v48 = vpop.permute.xlu0 %1750 }
 0x355   : > { %v1849_v49 = vpop.permute.xlu1 %1848  ;;  %v1951_v1 = vsel %vm1935_vm8, %v1934_v17, %v1751_v48 }
 0x356   : > { %v1984_v50 = vsel %vm1969_vm10, %v1967_v7, %v1849_v49 }
 0x357   : > { %2178 = vmatmul.mubr.f32.gmra.mrb[70].mxu1 %v1984_v50 }
 0x358   : > { %5705 = vmatprep.mubr.msk.f32.mxu1 %vm582_vm0, %v1475_v52  ;;  %v1851_v56 = vpop.permute.xlu0 %1850 }
 0x359   : > { %v1801_v54 = vpop.permute.xlu1 %1800 }
 0x35a   : > { %v1968_v58 = vsel %vm1952_vm9, %v1951_v1, %v1801_v54 }
 0x35b   : > { %v1985_v51 = vsel %vm1969_vm10, %v1968_v58, %v1851_v56 }
 0x35c   : > { %2183 = vmatmul.mubr.f32.gmra.mrb[72].mxu1 %v1985_v51 }
 0x3cd   : > { %v2109_v60 = vpop.f32.mrb[42].mxu1 }
 0x3ce   : > { %v2111_v61 = vpop.f32.mrb[43].mxu1  ;;  %v2110_v8 = vadd.f32 %v8767_v5, %v2109_v60 }
 0x3d0   : > { %v2188_v53 = vmax.f32 %v2110_v8, 0.0 }
 0x3d1   : > { %v2114_v2 = vpop.f32.mrb[44].mxu1 }
 0x3d2   : > { %v2116_v4 = vpop.f32.mrb[45].mxu1  ;;  %v2115_v9 = vadd.f32 %v8767_v5, %v2114_v2 }
 0x3d4   : > { %v2189_v36 = vmax.f32 %v2115_v9, 0.0 }
 0x3dc   : > { %v2119_v29 = vpop.f32.mrb[46].mxu1 }
 0x3dd   : > { %v2120_v63 = vadd.f32 %v8767_v5, %v2119_v29  ;;  %v2121_v43 = vpop.f32.mrb[47].mxu1 }
 0x3df   : > { %v2190_v10 = vmax.f32 %v2120_v63, 0.0 }
 0x3e0   : > { %v2124_v11 = vpop.f32.mrb[48].mxu1 }
 0x3e1   : > { %v2204_v23 = vmax.f32 %v2188_v53, %v2190_v10  ;;  %v2125_v13 = vadd.f32 %v8767_v5, %v2124_v11  ;;  %v2126_v14 = vpop.f32.mrb[49].mxu1 }
 0x3e3   : > { %v2191_v15 = vmax.f32 %v2125_v13, 0.0  ;;  %v2232_v16 = vrot.slane %v2204_v23, 1 }
 0x3e5   : > { %v2205_v19 = vmax.f32 %v2189_v36, %v2191_v15 }
 0x3e7   : > { %v2233_v18 = vrot.slane %v2205_v19, 1 }
 0x3e9   : > { %v2234_v55 = vsel %vm996_vm2, %v2232_v16, %v2233_v18  ;;  %v2129_v21 = vpop.f32.mrb[50].mxu1 }
 0x3ea   : > { %v2130_v45 = vadd.f32 %v8767_v5, %v2129_v21  ;;  %v2131_v24 = vpop.f32.mrb[51].mxu1  ;;  %v2273_v12 = vmax.f32 %v2204_v23, %v2234_v55 }
 0x3ec   : > { %v2192_v25 = vmax.f32 %v2130_v45, 0.0 }
 0x3ed   : > { %v2134_v26 = vpop.f32.mrb[52].mxu1 }
 0x3ee   : > { %v2206_v35 = vmax.f32 %v2190_v10, %v2192_v25  ;;  %v2135_v30 = vadd.f32 %v8767_v5, %v2134_v26  ;;  %v2136_v22 = vpop.f32.mrb[53].mxu1 }
 0x3f0   : > { %v2235_v32 = vrot.slane %v2206_v35, 1  ;;  %v2193_v33 = vmax.f32 %v2135_v30, 0.0 }
 0x3f2   : > { %v2236_v38 = vsel %vm996_vm2, %v2233_v18, %v2235_v32  ;;  %v2207_v28 = vmax.f32 %v2191_v15, %v2193_v33 }
 0x3f3   : > { %v2274_v39 = vmax.f32 %v2205_v19, %v2236_v38 }
 0x3f4   : > { %v2237_v34 = vrot.slane %v2207_v28, 1 }
 0x3f5   : > { %v6816_v40 = vpack.c.bf16 %v2274_v39, %v2273_v12 }
 0x3f6   : > { %v2238_v6 = vsel %vm996_vm2, %v2235_v32, %v2237_v34 }
 0x3f7   : > { %6817 = vmatpush3.bf16.msra.mxu0 %v6816_v40  ;;  %v2275_v0 = vmax.f32 %v2206_v35, %v2238_v6 }
 0x3f8   : > { %v2139_v41 = vpop.f32.mrb[54].mxu1  ;;  %6818 = vmatprep.subr.bf16.mxu0 %v7880_v3 }
 0x3f9   : > { %v2140_v42 = vadd.f32 %v8767_v5, %v2139_v41  ;;  %v2141_v62 = vpop.f32.mrb[55].mxu1 }
 0x3fb   : > { %v2194_v44 = vmax.f32 %v2140_v42, 0.0 }
 0x3fc   : > { %v2144_v20 = vpop.f32.mrb[56].mxu1 }
 0x3fd   : > { %v2208_v46 = vmax.f32 %v2192_v25, %v2194_v44  ;;  %v2145_v27 = vadd.f32 %v8767_v5, %v2144_v20  ;;  %v2146_v57 = vpop.f32.mrb[57].mxu1 }
 0x3ff   : > { %v2239_v47 = vrot.slane %v2208_v46, 1  ;;  %v2195_v7 = vmax.f32 %v2145_v27, 0.0 }
 0x401   : > { %v2240_v37 = vsel %vm996_vm2, %v2237_v34, %v2239_v47  ;;  %v2209_v48 = vmax.f32 %v2193_v33, %v2195_v7 }
 0x402   : > { %v2276_v49 = vmax.f32 %v2207_v28, %v2240_v37 }
 0x403   : > { %v2241_v50 = vrot.slane %v2209_v48, 1 }
 0x404   : > { %v6819_v52 = vpack.c.bf16 %v2276_v49, %v2275_v0 }
 0x405   : > { %v2242_v17 = vsel %vm996_vm2, %v2239_v47, %v2241_v50  ;;  %v2149_v1 = vpop.f32.mrb[58].mxu1 }
 0x406   : > { %v2150_v54 = vadd.f32 %v8767_v5, %v2149_v1  ;;  %v2151_v56 = vpop.f32.mrb[59].mxu1  ;;  %6820 = vmatpush3.bf16.msra.mxu0 %v6819_v52  ;;  %v2277_v58 = vmax.f32 %v2208_v46, %v2242_v17 }
 0x407   : > { %6821 = vmatprep.subr.bf16.mxu0 %v7880_v3 }
 0x408   : > { %v2196_v51 = vmax.f32 %v2150_v54, 0.0 }
 0x409   : > { %v2154_v60 = vpop.f32.mrb[60].mxu1 }
 0x40a   : > { %v2210_v61 = vmax.f32 %v2194_v44, %v2196_v51  ;;  %v2155_v2 = vadd.f32 %v8767_v5, %v2154_v60  ;;  %v2156_v4 = vpop.f32.mrb[61].mxu1 }
 0x40c   : > { %v2243_v8 = vrot.slane %v2210_v61, 1  ;;  %v2197_v29 = vmax.f32 %v2155_v2, 0.0 }
 0x40e   : > { %v2244_v63 = vsel %vm996_vm2, %v2241_v50, %v2243_v8  ;;  %v2211_v43 = vmax.f32 %v2195_v7, %v2197_v29 }
 0x40f   : > { %v2278_v53 = vmax.f32 %v2209_v48, %v2244_v63  ;;  %v2288_v63 = vld [vmem:[%s10838_s11 + $0x8] sm:$0xff] }
 0x410   : > { %v2245_v9 = vrot.slane %v2211_v43, 1 }
 0x411   : > { %v6822_v10 = vpack.c.bf16 %v2278_v53, %v2277_v58  ;;  %v2291_v53 = vld [vmem:[%s10838_s11 + $0x20] sm:$0xff] }
 0x412   : > { %v2246_v11 = vsel %vm996_vm2, %v2243_v8, %v2245_v9 }
 0x413   : > { %6823 = vmatpush3.bf16.msra.mxu0 %v6822_v10  ;;  %v2279_v23 = vmax.f32 %v2210_v61, %v2246_v11  ;;  %v2293_v10 = vld [vmem:[%s10838_s11 + $0x30] sm:$0xff]  ;;  %v2587_v11 = vld [vmem:[%s10830_s3 + $0x100] sm:$0xff] }
 0x414   : > { %v2159_v13 = vpop.f32.mrb[62].mxu1  ;;  %6824 = vmatprep.subr.bf16.mxu0 %v7880_v3 }
 0x415   : > { %v2160_v14 = vadd.f32 %v8767_v5, %v2159_v13  ;;  %v2161_v36 = vpop.f32.mrb[63].mxu1 }
 0x416   : > { %v2590_v36 = vld [vmem:[%s10830_s3 + $0x118] sm:$0xff] }
 0x417   : > { %v2198_v15 = vmax.f32 %v2160_v14, 0.0  ;;  %v2589_v14 = vld [vmem:[%s10830_s3 + $0x110] sm:$0xff] }
 0x418   : > { %v2164_v19 = vpop.f32.mrb[64].mxu1 }
 0x419   : > { %v2212_v16 = vmax.f32 %v2196_v51, %v2198_v15  ;;  %v2165_v18 = vadd.f32 %v8767_v5, %v2164_v19  ;;  %v2166_v55 = vpop.f32.mrb[65].mxu1  ;;  %v2571_v19 = vld [vmem:[%s10830_s3 + $0x80] sm:$0xff] }
 0x41b   : > { %v2247_v21 = vrot.slane %v2212_v16, 1  ;;  %v2199_v45 = vmax.f32 %v2165_v18, 0.0  ;;  %v2555_v18 = vld [vmem:[%s10830_s3] sm:$0xff] }
 0x41d   : > { %v2248_v24 = vsel %vm996_vm2, %v2245_v9, %v2247_v21  ;;  %v2213_v12 = vmax.f32 %v2197_v29, %v2199_v45  ;;  %v2292_v9 = vld [vmem:[%s10838_s11 + $0x28] sm:$0xff] }
 0x41e   : > { %v2280_v25 = vmax.f32 %v2211_v43, %v2248_v24  ;;  %v2290_v43 = vld [vmem:[%s10838_s11 + $0x18] sm:$0xff] }
 0x41f   : > { %v2249_v26 = vrot.slane %v2213_v12, 1  ;;  %v2574_v24 = vld [vmem:[%s10830_s3 + $0x98] sm:$0xff] }
 0x420   : > { %v6825_v35 = vpack.c.bf16 %v2280_v25, %v2279_v23  ;;  %v2588_v23 = vld [vmem:[%s10830_s3 + $0x108] sm:$0xff] }
 0x421   : > { %v2250_v30 = vsel %vm996_vm2, %v2247_v21, %v2249_v26  ;;  %v2169_v22 = vpop.f32.mrb[66].mxu1  ;;  %v6869_v13 = vpack.c.bf16 %v2588_v23, %v2587_v11  ;;  %v2556_v21 = vld [vmem:[%s10830_s3 + $0x8] sm:$0xff] }
 0x422   : > { %v2170_v32 = vadd.f32 %v8767_v5, %v2169_v22  ;;  %v2171_v33 = vpop.f32.mrb[67].mxu1  ;;  %6826 = vmatpush3.bf16.msra.mxu0 %v6825_v35  ;;  %v2281_v38 = vmax.f32 %v2212_v16, %v2250_v30  ;;  %v2572_v16 = vld [vmem:[%s10830_s3 + $0x88] sm:$0xff]  ;;  %v2558_v35 = vld [vmem:[%s10830_s3 + $0x18] sm:$0xff]  ;;  %v2575_v30 = vld [vmem:[%s10830_s3 + $0xa0] sm:$0xff] }
 0x423   : > { %6827 = vmatprep.subr.bf16.mxu0 %v7880_v3  ;;  %6870 = vmatprep.subr.bf16.mxu1 %v6869_v13  ;;  %v6837_v55 = vpack.c.bf16 %v2572_v16, %v2571_v19  ;;  %v2576_v22 = vld [vmem:[%s10830_s3 + $0xa8] sm:$0xff] }
 0x424   : > { %v2200_v28 = vmax.f32 %v2170_v32, 0.0  ;;  %6872 = vmatpush3.bf16.msra.mxu1 %v6869_v13  ;;  %v6845_v33 = vpack.c.bf16 %v2576_v22, %v2575_v30 }
 0x425   : > { %v2174_v39 = vpop.f32.mrb[68].mxu1 }
 0x426   : > { %v2214_v34 = vmax.f32 %v2198_v15, %v2200_v28  ;;  %v2175_v40 = vadd.f32 %v8767_v5, %v2174_v39  ;;  %v2176_v6 = vpop.f32.mrb[69].mxu1  ;;  %v6873_v15 = vpack.c.bf16 %v2590_v36, %v2589_v14  ;;  %v2577_v39 = vld [vmem:[%s10830_s3 + $0xb0] sm:$0xff] }
 0x428   : > { %v2251_v0 = vrot.slane %v2214_v34, 1  ;;  %v2201_v41 = vmax.f32 %v2175_v40, 0.0  ;;  %6874 = vmatprep.subr.bf16.mxu1 %v6873_v15 }
 0x429   : > { %6876 = vmatpush3.bf16.msra.mxu1 %v6873_v15 }
 0x42a   : > { %v2252_v42 = vsel %vm996_vm2, %v2249_v26, %v2251_v0  ;;  %v2215_v62 = vmax.f32 %v2199_v45, %v2201_v41  ;;  %v2179_v44 = vpop.f32.mrb[70].mxu1  ;;  %v2573_v45 = vld [vmem:[%s10830_s3 + $0x90] sm:$0xff] }
 0x42b   : > { %v2180_v20 = vadd.f32 %v8767_v5, %v2179_v44  ;;  %v2181_v46 = vpop.f32.mrb[71].mxu1  ;;  %v2282_v27 = vmax.f32 %v2213_v12, %v2252_v42  ;;  %v6839_v12 = vpack.c.bf16 %v2556_v21, %v2555_v18  ;;  %v6841_v25 = vpack.c.bf16 %v2574_v24, %v2573_v45  ;;  %v2557_v26 = vld [vmem:[%s10830_s3 + $0x10] sm:$0xff]  ;;  %v2579_v42 = vld [vmem:[%s10830_s3 + $0xc0] sm:$0xff] }
 0x42c   : > { %v2253_v57 = vrot.slane %v2215_v62, 1  ;;  %v6843_v32 = vpack.c.bf16 %v2558_v35, %v2557_v26  ;;  %v2563_v46 = vld [vmem:[%s10830_s3 + $0x40] sm:$0xff] }
 0x42d   : > { %v2202_v47 = vmax.f32 %v2180_v20, 0.0  ;;  %v6828_v7 = vpack.c.bf16 %v2282_v27, %v2281_v38  ;;  %v2559_v38 = vld [vmem:[%s10830_s3 + $0x20] sm:$0xff]  ;;  %v2564_v27 = vld [vmem:[%s10830_s3 + $0x48] sm:$0xff] }
 0x42e   : > { %v2254_v37 = vsel %vm996_vm2, %v2251_v0, %v2253_v57  ;;  %v2561_v0 = vld [vmem:[%s10830_s3 + $0x30] sm:$0xff] }
 0x42f   : > { %v2216_v48 = vmax.f32 %v2200_v28, %v2202_v47  ;;  %v2184_v49 = vpop.f32.mrb[72].mxu1  ;;  %6829 = vmatpush3.bf16.msra.mxu0 %v6828_v7  ;;  %v2283_v50 = vmax.f32 %v2214_v34, %v2254_v37  ;;  %v2560_v28 = vld [vmem:[%s10830_s3 + $0x28] sm:$0xff]  ;;  %v2578_v34 = vld [vmem:[%s10830_s3 + $0xb8] sm:$0xff]  ;;  %v6855_v7 = vpack.c.bf16 %v2564_v27, %v2563_v46 }
 0x430   : > { %v2185_v52 = vadd.f32 %v8767_v5, %v2184_v49  ;;  %v2186_v17 = vpop.f32.mrb[73].mxu1  ;;  %6830 = vmatprep.subr.bf16.mxu0 %v7880_v3  ;;  %v2287_v5 = vld [vmem:[%s10838_s11] sm:$0xff]  ;;  %v6847_v40 = vpack.c.bf16 %v2560_v28, %v2559_v38  ;;  %v6849_v6 = vpack.c.bf16 %v2578_v34, %v2577_v39  ;;  %v2582_v47 = vld [vmem:[%s10830_s3 + $0xd8] sm:$0xff] }
 0x431   : > { %v2255_v1 = vrot.slane %v2216_v48, 1  ;;  %v2566_v49 = vld [vmem:[%s10830_s3 + $0x58] sm:$0xff] }
 0x432   : > { %v2203_v54 = vmax.f32 %v2185_v52, 0.0 }
 0x433   : > { %v2256_v56 = vsel %vm996_vm2, %v2253_v57, %v2255_v1  ;;  %v2581_v57 = vld [vmem:[%s10830_s3 + $0xd0] sm:$0xff] }
 0x434   : > { %v2217_v58 = vmax.f32 %v2201_v41, %v2203_v54  ;;  %v2284_v51 = vmax.f32 %v2215_v62, %v2256_v56  ;;  %v2562_v41 = vld [vmem:[%s10830_s3 + $0x38] sm:$0xff]  ;;  %v2580_v62 = vld [vmem:[%s10830_s3 + $0xc8] sm:$0xff]  ;;  %v6857_v37 = vpack.c.bf16 %v2582_v47, %v2581_v57  ;;  %v2583_v54 = vld [vmem:[%s10830_s3 + $0xe0] sm:$0xff] }
 0x435   : > { %v6851_v44 = vpack.c.bf16 %v2562_v41, %v2561_v0  ;;  %v6853_v20 = vpack.c.bf16 %v2580_v62, %v2579_v42  ;;  %v2584_v56 = vld [vmem:[%s10830_s3 + $0xe8] sm:$0xff] }
 0x436   : > { %v2257_v60 = vrot.slane %v2217_v58, 1  ;;  %v6831_v61 = vpack.c.bf16 %v2284_v51, %v2283_v50  ;;  %v6861_v51 = vpack.c.bf16 %v2584_v56, %v2583_v54 }
 0x438   : > { %v2258_v2 = vsel %vm996_vm2, %v2255_v1, %v2257_v60  ;;  %v2286_v4 = vmax.f32 %v2217_v58, %v2257_v60  ;;  %6832 = vmatpush3.bf16.msra.mxu0 %v6831_v61  ;;  %v2567_v60 = vld [vmem:[%s10830_s3 + $0x60] sm:$0xff]  ;;  %v2568_v61 = vld [vmem:[%s10830_s3 + $0x68] sm:$0xff] }
 0x439   : > { %v2285_v8 = vmax.f32 %v2216_v48, %v2258_v2  ;;  %6833 = vmatprep.subr.bf16.mxu0 %v7880_v3  ;;  %v2565_v48 = vld [vmem:[%s10830_s3 + $0x50] sm:$0xff]  ;;  %v6863_v2 = vpack.c.bf16 %v2568_v61, %v2567_v60 }
 0x43a   : > { %v6859_v50 = vpack.c.bf16 %v2566_v49, %v2565_v48 }
 0x43b   : > { %v6834_v29 = vpack.c.bf16 %v2286_v4, %v2285_v8  ;;  %v2585_v8 = vld [vmem:[%s10830_s3 + $0xf0] sm:$0xff] }
 0x43d   : > { %6836 = vmatpush3.bf16.msk.msra.mxu0 %vm8234_vm4, %v6834_v29  ;;  %v2586_v29 = vld [vmem:[%s10830_s3 + $0xf8] sm:$0xff] }
 0x43e   : > { %6838 = vmatprep.subr.bf16.mxu0 %v6837_v55 }
 0x440   : > { %6475 = vmatmul.mubr.msk.f32.vlgmr.msra.gmra.mrb[64].mxu0 %vm1158_vm1, %v2287_v5 }
 0x441   : > { %6477 = vmatprep.mubr.msk.f32.mxu0 %vm7889_vm11, %v7890_v59  ;;  %6840 = vmatpush3.bf16.msra.mxu0 %v6839_v12 }
 0x442   : > { %6842 = vmatprep.subr.bf16.mxu0 %v6841_v25 }
 0x444   : > { %6478 = vmatmul.mubr.msk.f32.gmra.mrb[66].mxu0 %vm1158_vm1, %v2288_v63  ;;  %v6865_v63 = vpack.c.bf16 %v2586_v29, %v2585_v8 }
 0x445   : > { %6480 = vmatprep.mubr.msk.f32.mxu0 %vm7889_vm11, %v7890_v59  ;;  %6844 = vmatpush3.bf16.msra.mxu0 %v6843_v32 }
 0x446   : > { %6846 = vmatprep.subr.bf16.mxu0 %v6845_v33 }
 0x448   : > { %6481 = vmatmul.mubr.msk.f32.gmra.mrb[68].mxu0 %vm1158_vm1, %v2289_v31  ;;  %v2569_v31 = vld [vmem:[%s10830_s3 + $0x70] sm:$0xff] }
 0x449   : > { %6483 = vmatprep.mubr.msk.f32.mxu0 %vm7889_vm11, %v7890_v59  ;;  %6848 = vmatpush3.bf16.msra.mxu0 %v6847_v40 }
 0x44a   : > { %6850 = vmatprep.subr.bf16.mxu0 %v6849_v6 }
 0x44c   : > { %6484 = vmatmul.mubr.msk.f32.gmra.mrb[70].mxu0 %vm1158_vm1, %v2290_v43  ;;  %v2570_v43 = vld [vmem:[%s10830_s3 + $0x78] sm:$0xff] }
 0x44d   : > { %6486 = vmatprep.mubr.msk.f32.mxu0 %vm7889_vm11, %v7890_v59  ;;  %6852 = vmatpush3.bf16.msra.mxu0 %v6851_v44 }
 0x44e   : > { %6854 = vmatprep.subr.bf16.mxu0 %v6853_v20 }
 0x450   : > { %6487 = vmatmul.mubr.msk.f32.gmra.mrb[72].mxu0 %vm1158_vm1, %v2291_v53  ;;  %v6867_v53 = vpack.c.bf16 %v2570_v43, %v2569_v31 }
 0x451   : > { %6489 = vmatprep.mubr.msk.f32.mxu0 %vm7889_vm11, %v7890_v59  ;;  %6856 = vmatpush3.bf16.msra.mxu0 %v6855_v7 }
 0x452   : > { %6858 = vmatprep.subr.bf16.mxu0 %v6857_v37 }
 0x454   : > { %6490 = vmatmul.mubr.msk.f32.gmra.mrb[74].mxu0 %vm1158_vm1, %v2292_v9 }
 0x455   : > { %6492 = vmatprep.mubr.msk.f32.mxu0 %vm7889_vm11, %v7890_v59  ;;  %6860 = vmatpush3.bf16.msra.mxu0 %v6859_v50 }
 0x456   : > { %6862 = vmatprep.subr.bf16.mxu0 %v6861_v51 }
 0x458   : > { %6493 = vmatmul.mubr.msk.f32.gmra.mrb[76].mxu0 %vm1158_vm1, %v2293_v10 }
 0x459   : > { %6864 = vmatpush3.bf16.msra.mxu0 %v6863_v2 }
 0x45a   : > { %6866 = vmatprep.subr.bf16.mxu0 %v6865_v63 }
 0x45d   : > { %6868 = vmatpush3.bf16.msra.mxu0 %v6867_v53 }
 0x45e   : > { %6877 = vmatprep.subr.bf16.mxu0 %v7880_v3 }
 0x513   : > { %v2384_v52 = vpop.f32.mrb[64].mxu0 }
 0x514   : > { %2418 = vst.msk [vmem:[#allocation3] sm:$0xff] %vm1884_vm5, %v2384_v52  ;;  %v6476_v17 = vpop.f32.mrb[65].mxu0 }
 0x517   : > { %v2389_v1 = vpop.f32.mrb[66].mxu0 }
 0x518   : > { %2419 = vst.msk [vmem:[#allocation3 + $0x8] sm:$0xff] %vm1884_vm5, %v2389_v1  ;;  %v6479_v58 = vpop.f32.mrb[67].mxu0 }
 0x51b   : > { %v2394_v4 = vpop.f32.mrb[68].mxu0  ;;  %v2425_v48 = vld [vmem:[#allocation3] sm:$0xff] }
 0x51c   : > { %2420 = vst.msk [vmem:[#allocation3 + $0x10] sm:$0xff] %vm1884_vm5, %v2394_v4  ;;  %v6482_v5 = vpop.f32.mrb[69].mxu0 }
 0x51f   : > { %v2399_v9 = vpop.f32.mrb[70].mxu0  ;;  %v2429_v11 = vld [vmem:[#allocation3 + $0x1] sm:$0xff] }
 0x520   : > { %2421 = vst.msk [vmem:[#allocation3 + $0x18] sm:$0xff] %vm1884_vm5, %v2399_v9  ;;  %v6485_v10 = vpop.f32.mrb[71].mxu0  ;;  %v2433_v36 = vld [vmem:[#allocation3 + $0x2] sm:$0xff] }
 0x521   : > { %v8965_v18 = vld [vmem:[#allocation3 + $0x8] sm:$0xff] }
 0x523   : > { %v2404_v23 = vpop.f32.mrb[72].mxu0  ;;  %v2434_v13 = vld [vmem:[#allocation3 + $0xa] sm:$0xff] }
 0x524   : > { %v8959_v14 = vld [vmem:[#allocation3 + $0x10] sm:$0xff]  ;;  %2422 = vst.msk [vmem:[#allocation3 + $0x20] sm:$0xff] %vm1884_vm5, %v2404_v23  ;;  %v7695_v15 = vpack.i.bf16 %v2429_v11, %v2434_v13  ;;  %v6488_v16 = vpop.f32.mrb[73].mxu0 }
 0x525   : > { %v7700_v19 = vpack.i.bf16 %v2433_v36, %v8959_v14  ;;  %v2430_v55 = vld [vmem:[#allocation3 + $0x9] sm:$0xff] }
 0x526   : > { %7696 = vrot.lane.b32.xlu1 %v7695_v15, %s10845_s28 }
 0x527   : > { %7701 = vrot.lane.b32.xlu0 %v7700_v19, %s10847_s16  ;;  %v2435_v21 = vld [vmem:[#allocation3 + $0x12] sm:$0xff]  ;;  %v2409_v24 = vpop.f32.mrb[74].mxu0 }
 0x528   : > { %v8967_v45 = vld [vmem:[#allocation3 + $0x11] sm:$0xff]  ;;  %v7710_v12 = vpack.i.bf16 %v2430_v55, %v2435_v21  ;;  %2423 = vst.msk [vmem:[#allocation3 + $0x28] sm:$0xff] %vm1884_vm5, %v2409_v24  ;;  %v6491_v26 = vpop.f32.mrb[75].mxu0  ;;  %6503 = vmatprep.mubr.msk.f32.mxu1 %vm1884_vm5, %v2435_v21 }
 0x529   : > { %v7705_v25 = vpack.i.bf16 %v8965_v18, %v8967_v45  ;;  %v8973_v35 = vld [vmem:[#allocation3 + $0x18] sm:$0xff] }
 0x52a   : > { %v7715_v33 = vpack.i.bf16 %v2434_v13, %v8973_v35 }
 0x52b   : > { %7711 = vrot.lane.b32.xlu0 %v7710_v12, %s10845_s28  ;;  %7706 = vrot.lane.b32.xlu1 %v7705_v25, %s10853_s17  ;;  %v8977_v30 = vld [vmem:[#allocation3 + $0x19] sm:$0xff]  ;;  %v2414_v22 = vpop.f32.mrb[76].mxu0 }
 0x52c   : > { %v2436_v32 = vld [vmem:[#allocation3 + $0x1a] sm:$0xff]  ;;  %v7720_v38 = vpack.i.bf16 %v8959_v14, %v8977_v30  ;;  %2424 = vst.msk [vmem:[#allocation3 + $0x30] sm:$0xff] %vm1884_vm5, %v2414_v22  ;;  %v6494_v28 = vpop.f32.mrb[77].mxu0 }
 0x52d   : > { %6504 = vmatmul.mubr.msk.f32.vlgmr.msra.gmra.mrb[74].mxu1 %vm1884_vm5, %v2436_v32  ;;  %v2437_v39 = vld [vmem:[#allocation3 + $0x20] sm:$0xff]  ;;  %v7725_v40 = vpack.i.bf16 %v8967_v45, %v2436_v32 }
 0x52e   : > { %v7730_v6 = vpack.i.bf16 %v2435_v21, %v2437_v39 }
 0x52f   : > { %7716 = vrot.lane.b32.xlu1 %v7715_v33, %s10847_s16  ;;  %7721 = vrot.lane.b32.xlu0 %v7720_v38, %s10853_s17  ;;  %v2439_v34 = vld [vmem:[#allocation3 + $0x22] sm:$0xff] }
 0x530   : > { %6506 = vmatprep.mubr.msk.f32.mxu1 %vm1884_vm5, %v2439_v34  ;;  %v8988_v0 = vld [vmem:[#allocation3 + $0x21] sm:$0xff]  ;;  %v7740_v42 = vpack.i.bf16 %v8977_v30, %v2439_v34 }
 0x531   : > { %v7735_v62 = vpack.i.bf16 %v8973_v35, %v8988_v0  ;;  %v2440_v44 = vld [vmem:[#allocation3 + $0x28] sm:$0xff] }
 0x532   : > { %v7745_v46 = vpack.i.bf16 %v2436_v32, %v2440_v44 }
 0x533   : > { %7726 = vrot.lane.b32.xlu1 %v7725_v40, %s10845_s28  ;;  %7731 = vrot.lane.b32.xlu0 %v7730_v6, %s10847_s16  ;;  %v2442_v41 = vld [vmem:[#allocation3 + $0x2a] sm:$0xff] }
 0x534   : > { %6507 = vmatmul.mubr.msk.f32.gmra.mrb[76].mxu1 %vm1884_vm5, %v2442_v41  ;;  %v2441_v20 = vld [vmem:[#allocation3 + $0x29] sm:$0xff] }
 0x535   : > { %v7750_v27 = vpack.i.bf16 %v2437_v39, %v2441_v20 }
 0x537   : > { %7741 = vrot.lane.b32.xlu0 %v7740_v42, %s10845_s28  ;;  %7736 = vrot.lane.b32.xlu1 %v7735_v62, %s10853_s17 }
 0x53b   : > { %7746 = vrot.lane.b32.xlu1 %v7745_v46, %s10847_s16  ;;  %7751 = vrot.lane.b32.xlu0 %v7750_v27, %s10853_s17  ;;  %s10855_s16 = smov 32  }
 0x598   : > { %v7697_v57 = vpop.permute.xlu1 %7696 }
 0x599   : > { %v7702_v47 = vpop.permute.xlu0 %7701  ;;  %v7699_v7 = vunpack.i.h.bf16 %v7697_v57  ;;  %v7698_v37 = vunpack.i.l.bf16 %v7697_v57 }
 0x59a   : > { %v7704_v49 = vunpack.i.h.bf16 %v7702_v47  ;;  %v7703_v50 = vunpack.i.l.bf16 %v7702_v47 }
 0x59b   : > { %v2531_v52 = vsel %vm1884_vm5, %v2425_v48, %v7699_v7  ;;  %v2543_v17 = vsel %vm1884_vm5, %v2430_v55, %v7698_v37 }
 0x59c   : > { %v2535_v51 = vsel %vm1918_vm7, %v2531_v52, %v7704_v49  ;;  %v2547_v2 = vsel %vm1918_vm7, %v2543_v17, %v7703_v50 }
 0x59d   : > { %v7712_v1 = vpop.permute.xlu0 %7711  ;;  %v7707_v54 = vpop.permute.xlu1 %7706 }
 0x59e   : > { %v7709_v56 = vunpack.i.h.bf16 %v7707_v54  ;;  %v7708_v58 = vunpack.i.l.bf16 %v7707_v54  ;;  %v7714_v60 = vunpack.i.h.bf16 %v7712_v1  ;;  %v7713_v61 = vunpack.i.l.bf16 %v7712_v1 }
 0x5a0   : > { %v2551_v4 = vsel %vm1952_vm9, %v2547_v2, %v7708_v58  ;;  %v2539_v8 = vsel %vm1952_vm9, %v2535_v51, %v7709_v56  ;;  %v2544_v9 = vsel %vm1884_vm5, %v8967_v45, %v7713_v61  ;;  %v2532_v10 = vsel %vm1884_vm5, %v8965_v18, %v7714_v60 }
 0x5a1   : > { %2669 = vmatprep.mubr.f32.mxu0 %v2551_v4  ;;  %v7717_v29 = vpop.permute.xlu1 %7716  ;;  %v7722_v5 = vpop.permute.xlu0 %7721 }
 0x5a2   : > { %v7719_v63 = vunpack.i.h.bf16 %v7717_v29  ;;  %v7718_v31 = vunpack.i.l.bf16 %v7717_v29  ;;  %v7724_v43 = vunpack.i.h.bf16 %v7722_v5  ;;  %v7723_v53 = vunpack.i.l.bf16 %v7722_v5  ;;  %2670 = vmatmul.mubr.f32.vlgmr.msra.gmra.mrb[78].mxu0 %v2539_v8 }
 0x5a4   : > { %v2548_v11 = vsel %vm1918_vm7, %v2544_v9, %v7718_v31  ;;  %v2536_v23 = vsel %vm1918_vm7, %v2532_v10, %v7719_v63 }
 0x5a5   : > { %v7727_v13 = vpop.permute.xlu1 %7726  ;;  %v7732_v36 = vpop.permute.xlu0 %7731  ;;  %v2552_v15 = vsel %vm1952_vm9, %v2548_v11, %v7723_v53  ;;  %v2540_v19 = vsel %vm1952_vm9, %v2536_v23, %v7724_v43 }
 0x5a6   : > { %v7729_v16 = vunpack.i.h.bf16 %v7727_v13  ;;  %v7728_v55 = vunpack.i.l.bf16 %v7727_v13  ;;  %2674 = vmatprep.mubr.f32.mxu0 %v2552_v15  ;;  %v7734_v21 = vunpack.i.h.bf16 %v7732_v36  ;;  %v7733_v24 = vunpack.i.l.bf16 %v7732_v36 }
 0x5a7   : > { %2675 = vmatmul.mubr.f32.gmra.mrb[80].mxu0 %v2540_v19 }
 0x5a8   : > { %v2545_v45 = vsel %vm1884_vm5, %v8977_v30, %v7728_v55  ;;  %v2533_v18 = vsel %vm1884_vm5, %v8959_v14, %v7729_v16 }
 0x5a9   : > { %v7742_v12 = vpop.permute.xlu0 %7741  ;;  %v7737_v25 = vpop.permute.xlu1 %7736  ;;  %v2549_v38 = vsel %vm1918_vm7, %v2545_v45, %v7733_v24  ;;  %v2537_v28 = vsel %vm1918_vm7, %v2533_v18, %v7734_v21 }
 0x5aa   : > { %v7739_v26 = vunpack.i.h.bf16 %v7737_v25  ;;  %v7738_v22 = vunpack.i.l.bf16 %v7737_v25  ;;  %v7744_v32 = vunpack.i.h.bf16 %v7742_v12  ;;  %v7743_v33 = vunpack.i.l.bf16 %v7742_v12  ;;  %v2796_v25 = vld [vmem:[%s10839_s12] sm:$0xff] }
 0x5ac   : > { %v2553_v39 = vsel %vm1952_vm9, %v2549_v38, %v7738_v22  ;;  %v2541_v34 = vsel %vm1952_vm9, %v2537_v28, %v7739_v26  ;;  %v2546_v62 = vsel %vm1884_vm5, %v8988_v0, %v7743_v33  ;;  %v2534_v44 = vsel %vm1884_vm5, %v8973_v35, %v7744_v32  ;;  %v5714_v35 = vld [vmem:[%s10830_s3 + $0x120] ss:$0 sm:$0xff]  ;;  %v2797_v26 = vld [vmem:[%s10839_s12 + $0x8] sm:$0xff]  ;;  %v2798_v22 = vld [vmem:[%s10839_s12 + $0x10] sm:$0xff] }
 0x5ad   : > { %v7747_v40 = vpop.permute.xlu1 %7746  ;;  %2679 = vmatprep.mubr.f32.mxu0 %v2553_v39  ;;  %v7752_v30 = vpop.permute.xlu0 %7751  ;;  %v2799_v32 = vld [vmem:[%s10839_s12 + $0x18] sm:$0xff]  ;;  %v2800_v33 = vld [vmem:[%s10839_s12 + $0x20] sm:$0xff]  ;;  %v2984_v28 = vld [vmem:[%s10831_s4 + $0x88] sm:$0xff] }
 0x5ae   : > { %v7749_v6 = vunpack.i.h.bf16 %v7747_v40  ;;  %v7748_v41 = vunpack.i.l.bf16 %v7747_v40  ;;  %2680 = vmatmul.mubr.f32.gmra.mrb[82].mxu0 %v2541_v34  ;;  %v7754_v14 = vunpack.i.h.bf16 %v7752_v30  ;;  %v7753_v42 = vunpack.i.l.bf16 %v7752_v30  ;;  %v2983_v38 = vld [vmem:[%s10831_s4 + $0x80] sm:$0xff]  ;;  %v2968_v40 = vld [vmem:[%s10831_s4 + $0x8] sm:$0xff]  ;;  %v2985_v30 = vld [vmem:[%s10831_s4 + $0x90] sm:$0xff] }
 0x5af   : > { %v2967_v39 = vld [vmem:[%s10831_s4] sm:$0xff]  ;;  %v6880_v34 = vpack.c.bf16 %v2984_v28, %v2983_v38  ;;  %v3008_v28 = vld [vmem:[%s10831_s4 + $0x148] sm:$0xff] }
 0x5b0   : > { %v2550_v20 = vsel %vm1918_vm7, %v2546_v62, %v7748_v41  ;;  %v2538_v46 = vsel %vm1918_vm7, %v2534_v44, %v7749_v6  ;;  %v2986_v6 = vld [vmem:[%s10831_s4 + $0x98] sm:$0xff]  ;;  %v6882_v41 = vpack.c.bf16 %v2968_v40, %v2967_v39  ;;  %v2987_v44 = vld [vmem:[%s10831_s4 + $0xa0] sm:$0xff] }
 0x5b1   : > { %v2554_v27 = vsel %vm1952_vm9, %v2550_v20, %v7753_v42  ;;  %v2542_v57 = vsel %vm1952_vm9, %v2538_v46, %v7754_v14  ;;  %v6884_v14 = vpack.c.bf16 %v2986_v6, %v2985_v30  ;;  %v2969_v42 = vld [vmem:[%s10831_s4 + $0x10] sm:$0xff]  ;;  %v2970_v62 = vld [vmem:[%s10831_s4 + $0x18] sm:$0xff]  ;;  %6881 = vmatprep.subr.bf16.mxu1 %v6880_v34  ;;  %v2988_v20 = vld [vmem:[%s10831_s4 + $0xa8] sm:$0xff] }
 0x5b2   : > { %2684 = vmatprep.mubr.f32.mxu0 %v2554_v27  ;;  %6883 = vmatpush3.bf16.msra.mxu1 %v6882_v41  ;;  %v6886_v46 = vpack.c.bf16 %v2970_v62, %v2969_v42  ;;  %v3015_v27 = vld [vmem:[%s10831_s4 + $0x180] sm:$0xff]  ;;  %v2996_v34 = vld [vmem:[%s10831_s4 + $0xe8] sm:$0xff]  ;;  %v2997_v42 = vld [vmem:[%s10831_s4 + $0xf0] sm:$0xff] }
 0x5b3   : > { %2685 = vmatmul.mubr.f32.gmra.mrb[84].mxu0 %v2542_v57  ;;  %v3016_v57 = vld [vmem:[%s10831_s4 + $0x188] sm:$0xff]  ;;  %6885 = vmatprep.subr.bf16.mxu1 %v6884_v14  ;;  %v3007_v38 = vld [vmem:[%s10831_s4 + $0x140] sm:$0xff]  ;;  %v2998_v62 = vld [vmem:[%s10831_s4 + $0xf8] sm:$0xff] }
 0x5b4   : > { %6515 = vmatprep.mubr.msk.f32.mxu0 %vm7889_vm11, %v7890_v59  ;;  %v2995_v39 = vld [vmem:[%s10831_s4 + $0xe0] sm:$0xff]  ;;  %v6930_v30 = vpack.c.bf16 %v3008_v28, %v3007_v38  ;;  %v2980_v14 = vld [vmem:[%s10831_s4 + $0x68] sm:$0xff]  ;;  %v3284_v28 = vld [vmem:[%s10840_s13 + $0x18] sm:$0xff] }
 0x5b5   : > { %v6904_v6 = vpack.c.bf16 %v2996_v34, %v2995_v39  ;;  %v2979_v41 = vld [vmem:[%s10831_s4 + $0x60] sm:$0xff]  ;;  %v3282_v38 = vld [vmem:[%s10840_s13 + $0x8] sm:$0xff] }
 0x5b6   : > { %6887 = vmatpush3.bf16.msra.mxu1 %v6886_v46  ;;  %v3285_v39 = vld [vmem:[%s10840_s13 + $0x20] sm:$0xff] }
 0x600   : > { %v6505_v47 = vpop.f32.mrb[74].mxu1 }
 0x601   : > { %v2756_v7 = vpop.f32.mrb[75].mxu1 }
 0x607   : > { %v6508_v37 = vpop.f32.mrb[76].mxu1 }
 0x608   : > { %v2766_v0 = vpop.f32.mrb[77].mxu1 }
 0x675   : > { %v5816_v48 = vpop.f32.mrb[78].mxu0 }
 0x676   : > { %v5817_v49 = vpop.f32.mrb[79].mxu0 }
 0x677   : > { %v5818_v50 = vadd.f32 %v5817_v49, %v5816_v48  ;;  %v6912_v48 = vpack.c.bf16 %v3016_v57, %v3015_v27  ;;  %v2981_v27 = vld [vmem:[%s10831_s4 + $0x70] sm:$0xff]  ;;  %v2982_v57 = vld [vmem:[%s10831_s4 + $0x78] sm:$0xff] }
 0x679   : > { %v2672_v52 = vadd.f32 %v5818_v50, %v5714_v35  ;;  %v2989_v50 = vld [vmem:[%s10831_s4 + $0xb0] sm:$0xff] }
 0x67a   : > { %v5819_v17 = vpop.f32.mrb[80].mxu0 }
 0x67b   : > { %v2757_v1 = vadd.f32 %v2756_v7, %v2672_v52  ;;  %v5820_v54 = vpop.f32.mrb[81].mxu0  ;;  %v6888_v7 = vpack.c.bf16 %v2988_v20, %v2987_v44  ;;  %v2990_v52 = vld [vmem:[%s10831_s4 + $0xb8] sm:$0xff]  ;;  %v6906_v44 = vpack.c.bf16 %v2980_v14, %v2979_v41  ;;  %v6908_v20 = vpack.c.bf16 %v2998_v62, %v2997_v42 }
 0x67c   : > { %v5821_v56 = vadd.f32 %v5820_v54, %v5819_v17  ;;  %v3017_v17 = vld [vmem:[%s10831_s4 + $0x190] sm:$0xff] }
 0x67d   : > { %v2775_v61 = vmax.f32 %v2757_v1, 0.0  ;;  %v3018_v1 = vld [vmem:[%s10831_s4 + $0x198] sm:$0xff]  ;;  %v3001_v54 = vld [vmem:[%s10831_s4 + $0x110] sm:$0xff]  ;;  %6889 = vmatprep.subr.bf16.mxu1 %v6888_v7 }
 0x67e   : > { %v2677_v58 = vadd.f32 %v5821_v56, %v5714_v35  ;;  %v3002_v56 = vld [vmem:[%s10831_s4 + $0x118] sm:$0xff] }
 0x680   : > { %v2762_v51 = vadd.f32 %v6505_v47, %v2677_v58  ;;  %v2999_v47 = vld [vmem:[%s10831_s4 + $0x100] sm:$0xff] }
 0x681   : > { %v5822_v60 = vpop.f32.mrb[82].mxu0 }
 0x682   : > { %v2776_v2 = vmax.f32 %v2762_v51, 0.0  ;;  %v5823_v4 = vpop.f32.mrb[83].mxu0  ;;  %v2973_v51 = vld [vmem:[%s10831_s4 + $0x30] sm:$0xff] }
 0x683   : > { %v5824_v8 = vadd.f32 %v5823_v4, %v5822_v60  ;;  %v2974_v60 = vld [vmem:[%s10831_s4 + $0x38] sm:$0xff]  ;;  %v6892_v4 = vpack.c.bf16 %v2990_v52, %v2989_v50  ;;  %v3031_v52 = vld [vmem:[%s10831_s4 + $0x200] sm:$0xff] }
 0x684   : > { %v2779_v29 = vmax.f32 %v2775_v61, %v2776_v2  ;;  %v6916_v61 = vpack.c.bf16 %v3018_v1, %v3017_v17  ;;  %v3032_v17 = vld [vmem:[%s10831_s4 + $0x208] sm:$0xff] }
 0x685   : > { %v2682_v5 = vadd.f32 %v5824_v8, %v5714_v35  ;;  %v2991_v8 = vld [vmem:[%s10831_s4 + $0xc0] sm:$0xff] }
 0x686   : > { %v5825_v63 = vpop.f32.mrb[84].mxu0  ;;  %v2785_v13 = vrot.slane %v2779_v29, 1 }
 0x687   : > { %v2767_v31 = vadd.f32 %v2766_v0, %v2682_v5  ;;  %v5826_v43 = vpop.f32.mrb[85].mxu0  ;;  %v2972_v0 = vld [vmem:[%s10831_s4 + $0x28] sm:$0xff] }
 0x688   : > { %v5827_v53 = vadd.f32 %v5826_v43, %v5825_v63  ;;  %v3020_v5 = vld [vmem:[%s10831_s4 + $0x1a8] sm:$0xff]  ;;  %v3003_v43 = vld [vmem:[%s10831_s4 + $0x120] sm:$0xff] }
 0x689   : > { %v2777_v9 = vmax.f32 %v2767_v31, 0.0  ;;  %v2992_v63 = vld [vmem:[%s10831_s4 + $0xc8] sm:$0xff] }
 0x68a   : > { %v2687_v10 = vadd.f32 %v5827_v53, %v5714_v35  ;;  %v3000_v35 = vld [vmem:[%s10831_s4 + $0x108] sm:$0xff] }
 0x68b   : > { %v2780_v11 = vmax.f32 %v2776_v2, %v2777_v9  ;;  %v6914_v49 = vpack.c.bf16 %v3000_v35, %v2999_v47  ;;  %v6918_v2 = vpack.c.bf16 %v3002_v56, %v3001_v54  ;;  %v3004_v53 = vld [vmem:[%s10831_s4 + $0x128] sm:$0xff]  ;;  %v3025_v47 = vld [vmem:[%s10831_s4 + $0x1d0] sm:$0xff]  ;;  %v3010_v35 = vld [vmem:[%s10831_s4 + $0x158] sm:$0xff]  ;;  %v9237_v54 = vpack.c.bf16 %v3032_v17, %v3031_v52 }
 0x68c   : > { %v2772_v23 = vadd.f32 %v6508_v37, %v2687_v10  ;;  %v2971_v37 = vld [vmem:[%s10831_s4 + $0x20] sm:$0xff] }
 0x68d   : > { %v2786_v36 = vrot.slane %v2780_v11, 1  ;;  %v6890_v58 = vpack.c.bf16 %v2972_v0, %v2971_v37  ;;  %v2975_v10 = vld [vmem:[%s10831_s4 + $0x40] sm:$0xff]  ;;  %v6910_v37 = vpack.c.bf16 %v2982_v57, %v2981_v27  ;;  %v3026_v0 = vld [vmem:[%s10831_s4 + $0x1d8] sm:$0xff]  ;;  %v3036_v57 = vld [vmem:[%s10831_s4 + $0x228] sm:$0xff] }
 0x68e   : > { %v2778_v15 = vmax.f32 %v2772_v23, 0.0  ;;  %v3021_v23 = vld [vmem:[%s10831_s4 + $0x1b0] sm:$0xff]  ;;  %v3027_v56 = vld [vmem:[%s10831_s4 + $0x1e0] sm:$0xff] }
 0x68f   : > { %v2787_v19 = vsel %vm996_vm2, %v2785_v13, %v2786_v36  ;;  %6891 = vmatpush3.bf16.msra.mxu1 %v6890_v58  ;;  %v3022_v13 = vld [vmem:[%s10831_s4 + $0x1b8] sm:$0xff]  ;;  %v3028_v58 = vld [vmem:[%s10831_s4 + $0x1e8] sm:$0xff]  ;;  %v3035_v27 = vld [vmem:[%s10831_s4 + $0x220] sm:$0xff] }
 0x690   : > { %v2781_v16 = vmax.f32 %v2777_v9, %v2778_v15  ;;  %v2793_v55 = vmax.f32 %v2779_v29, %v2787_v19  ;;  %v3019_v29 = vld [vmem:[%s10831_s4 + $0x1a0] sm:$0xff]  ;;  %v6894_v9 = vpack.c.bf16 %v2974_v60, %v2973_v51  ;;  %6893 = vmatprep.subr.bf16.mxu1 %v6892_v4  ;;  %v2976_v15 = vld [vmem:[%s10831_s4 + $0x48] sm:$0xff]  ;;  %v6924_v19 = vpack.c.bf16 %v3022_v13, %v3021_v23 }
 0x691   : > { %v6920_v31 = vpack.c.bf16 %v3020_v5, %v3019_v29  ;;  %v6936_v60 = vpack.c.bf16 %v3028_v58, %v3027_v56  ;;  %v3029_v29 = vld [vmem:[%s10831_s4 + $0x1f0] sm:$0xff]  ;;  %v3030_v5 = vld [vmem:[%s10831_s4 + $0x1f8] sm:$0xff] }
 0x692   : > { %v2788_v21 = vrot.slane %v2781_v16, 1 }
 0x693   : > { %6895 = vmatpush3.bf16.msra.mxu1 %v6894_v9 }
 0x694   : > { %v2789_v24 = vsel %vm996_vm2, %v2786_v36, %v2788_v21  ;;  %v2795_v12 = vmax.f32 %v2781_v16, %v2788_v21  ;;  %v6896_v36 = vpack.c.bf16 %v2992_v63, %v2991_v8  ;;  %v3005_v16 = vld [vmem:[%s10831_s4 + $0x130] sm:$0xff] }
 0x695   : > { %v2794_v45 = vmax.f32 %v2780_v11, %v2789_v24  ;;  %v6922_v11 = vpack.c.bf16 %v3004_v53, %v3003_v43  ;;  %v2993_v21 = vld [vmem:[%s10831_s4 + $0xd0] sm:$0xff]  ;;  %v2994_v24 = vld [vmem:[%s10831_s4 + $0xd8] sm:$0xff] }
 0x696   : > { %6897 = vmatprep.subr.bf16.mxu1 %v6896_v36  ;;  %v3013_v43 = vld [vmem:[%s10831_s4 + $0x170] sm:$0xff]  ;;  %v3014_v53 = vld [vmem:[%s10831_s4 + $0x178] sm:$0xff] }
 0x697   : > { %v6878_v18 = vpack.c.bf16 %v2794_v45, %v2793_v55  ;;  %v3006_v55 = vld [vmem:[%s10831_s4 + $0x138] sm:$0xff]  ;;  %v3023_v45 = vld [vmem:[%s10831_s4 + $0x1c0] sm:$0xff]  ;;  %v6942_v9 = vpack.c.bf16 %v3014_v53, %v3013_v43 }
 0x698   : > { %v3369_v53 = vld [vmem:[%s10832_s5 + $0x100] sm:$0xff] }
 0x699   : > { %6879 = vmatpush3.bf16.msra.mxu0 %v6878_v18  ;;  %v3024_v18 = vld [vmem:[%s10831_s4 + $0x1c8] sm:$0xff] }
 0x69a   : > { %6513 = vmatprep.subr.mxu0 %v7890_v59 }
 0x69d   : > { %6514 = vmatpush3.msk.msra.mxu0 %vm996_vm2, %v2795_v12  ;;  %v6898_v12 = vpack.c.bf16 %v2976_v15, %v2975_v10 }
 0x69e   : > { %6516 = vmatmul.mubr.msk.f32.vlgmr.msra.gmra.mrb[86].mxu0 %vm2801_vm12, %v2796_v25  ;;  %6913 = vmatprep.subr.bf16.mxu0 %v6912_v48  ;;  %v2977_v25 = vld [vmem:[%s10831_s4 + $0x50] sm:$0xff] }
 0x69f   : > { %6518 = vmatprep.mubr.msk.f32.mxu0 %vm7889_vm11, %v7890_v59  ;;  %6915 = vmatpush3.bf16.msra.mxu0 %v6914_v49  ;;  %v3009_v48 = vld [vmem:[%s10831_s4 + $0x150] sm:$0xff]  ;;  %v6932_v49 = vpack.c.bf16 %v3026_v0, %v3025_v47 }
 0x6a0   : > { %6917 = vmatprep.subr.bf16.mxu0 %v6916_v61  ;;  %6899 = vmatpush3.bf16.msra.mxu1 %v6898_v12  ;;  %v6934_v50 = vpack.c.bf16 %v3010_v35, %v3009_v48  ;;  %v3011_v61 = vld [vmem:[%s10831_s4 + $0x160] sm:$0xff]  ;;  %v6952_v48 = vpack.c.bf16 %v3036_v57, %v3035_v27  ;;  %v3375_v57 = vld [vmem:[%s10832_s5 + $0x130] sm:$0xff] }
 0x6a1   : > { %v3281_v12 = vld [vmem:[%s10840_s13] sm:$0xff] }
 0x6a2   : > { %6519 = vmatmul.mubr.msk.f32.gmra.mrb[88].mxu0 %vm2801_vm12, %v2797_v26  ;;  %v6926_v26 = vpack.c.bf16 %v3006_v55, %v3005_v16 }
 0x6a3   : > { %6521 = vmatprep.mubr.msk.f32.mxu0 %vm7889_vm11, %v7890_v59  ;;  %6919 = vmatpush3.bf16.msra.mxu0 %v6918_v2  ;;  %v3012_v2 = vld [vmem:[%s10831_s4 + $0x168] sm:$0xff] }
 0x6a4   : > { %6921 = vmatprep.subr.bf16.mxu0 %v6920_v31  ;;  %v6938_v4 = vpack.c.bf16 %v3012_v2, %v3011_v61  ;;  %v6940_v31 = vpack.c.bf16 %v3030_v5, %v3029_v29  ;;  %v3385_v29 = vld [vmem:[%s10832_s5 + $0x180] sm:$0xff]  ;;  %v3386_v5 = vld [vmem:[%s10832_s5 + $0x188] sm:$0xff] }
 0x6a5   : > { %v6992_v43 = vpack.c.bf16 %v3386_v5, %v3385_v29  ;;  %v3363_v29 = vld [vmem:[%s10832_s5 + $0xd0] sm:$0xff]  ;;  %v3364_v5 = vld [vmem:[%s10832_s5 + $0xd8] sm:$0xff] }
 0x6a6   : > { %6522 = vmatmul.mubr.msk.f32.gmra.mrb[90].mxu0 %vm2801_vm12, %v2798_v22  ;;  %v6900_v22 = vpack.c.bf16 %v2994_v24, %v2993_v21 }
 0x6a7   : > { %6524 = vmatprep.mubr.msk.f32.mxu0 %vm7889_vm11, %v7890_v59  ;;  %6923 = vmatpush3.bf16.msra.mxu0 %v6922_v11 }
 0x6a8   : > { %6925 = vmatprep.subr.bf16.mxu0 %v6924_v19  ;;  %6901 = vmatprep.subr.bf16.mxu1 %v6900_v22 }
 0x6aa   : > { %6525 = vmatmul.mubr.msk.f32.gmra.mrb[92].mxu0 %vm2801_vm12, %v2799_v32  ;;  %v2978_v32 = vld [vmem:[%s10831_s4 + $0x58] sm:$0xff] }
 0x6ab   : > { %6527 = vmatprep.mubr.msk.f32.mxu0 %vm7889_vm11, %v7890_v59  ;;  %v6902_v40 = vpack.c.bf16 %v2978_v32, %v2977_v25  ;;  %6927 = vmatpush3.bf16.msra.mxu0 %v6926_v26  ;;  %v7891_v25 = vmov 0  }
 0x6ac   : > { %7775 = vset.pattern.permute.xlu1 %v7891_v25  ;;  %7776 = vset.pattern.permute.xlu0 %v7891_v25  ;;  %v3372_v25 = vld [vmem:[%s10832_s5 + $0x118] sm:$0xff] }
 0x6ad   : > { %6903 = vmatpush3.bf16.msra.mxu1 %v6902_v40  ;;  %v3033_v40 = vld [vmem:[%s10831_s4 + $0x210] sm:$0xff] }
 0x6ae   : > { %6528 = vmatmul.mubr.msk.f32.gmra.mrb[94].mxu0 %vm2801_vm12, %v2800_v33  ;;  %v6928_v33 = vpack.c.bf16 %v3024_v18, %v3023_v45  ;;  %6905 = vmatprep.subr.bf16.mxu1 %v6904_v6 }
 0x6b0   : > { %6929 = vmatprep.subr.bf16.mxu0 %v6928_v33  ;;  %v3283_v33 = vld [vmem:[%s10840_s13 + $0x10] sm:$0xff] }
 0x6b1   : > { %6931 = vmatpush3.bf16.msra.mxu0 %v6930_v30  ;;  %6907 = vmatpush3.bf16.msra.mxu1 %v6906_v44  ;;  %v3034_v30 = vld [vmem:[%s10831_s4 + $0x218] sm:$0xff] }
 0x6b2   : > { %6909 = vmatprep.subr.bf16.mxu1 %v6908_v20  ;;  %6933 = vmatprep.subr.bf16.mxu0 %v6932_v49  ;;  %v6948_v20 = vpack.c.bf16 %v3034_v30, %v3033_v40  ;;  %v3037_v49 = vld [vmem:[%s10831_s4 + $0x230] sm:$0xff]  ;;  %v3341_v30 = vld [vmem:[%s10832_s5 + $0x20] sm:$0xff] }
 0x6b5   : > { %6911 = vmatpush3.bf16.msra.mxu1 %v6910_v37  ;;  %6935 = vmatpush3.bf16.msra.mxu0 %v6934_v50  ;;  %v3038_v50 = vld [vmem:[%s10831_s4 + $0x238] sm:$0xff] }
 0x6b6   : > { %6945 = vmatprep.subr.bf16.mxu1 %v9237_v54  ;;  %6937 = vmatprep.subr.bf16.mxu0 %v6936_v60  ;;  %v6956_v56 = vpack.c.bf16 %v3038_v50, %v3037_v49  ;;  %v3393_v49 = vld [vmem:[%s10832_s5 + $0x1c0] sm:$0xff]  ;;  %v3394_v50 = vld [vmem:[%s10832_s5 + $0x1c8] sm:$0xff] }
 0x6b9   : > { %6939 = vmatpush3.bf16.msra.mxu0 %v6938_v4 }
 0x6ba   : > { %6941 = vmatprep.subr.bf16.mxu0 %v6940_v31  ;;  %v3354_v31 = vld [vmem:[%s10832_s5 + $0x88] sm:$0xff] }
 0x6bd   : > { %6943 = vmatpush3.bf16.msra.mxu0 %v6942_v9 }
 0x771   : > { %v2886_v46 = vpop.f32.mrb[86].mxu0 }
 0x772   : > { %2910 = vst.msk [vmem:[#allocation4] sm:$0xff] %vm1918_vm7, %v2886_v46  ;;  %v6517_v7 = vpop.f32.mrb[87].mxu0 }
 0x775   : > { %v2891_v1 = vpop.f32.mrb[88].mxu0 }
 0x776   : > { %2911 = vst.msk [vmem:[#allocation4 + $0x8] sm:$0xff] %vm1918_vm7, %v2891_v1  ;;  %v6520_v51 = vpop.f32.mrb[89].mxu0 }
 0x779   : > { %v2896_v8 = vpop.f32.mrb[90].mxu0  ;;  %v2915_v42 = vld [vmem:[#allocation4] sm:$0xff] }
 0x77a   : > { %2912 = vst.msk [vmem:[#allocation4 + $0x10] sm:$0xff] %vm1918_vm7, %v2896_v8  ;;  %v6523_v63 = vpop.f32.mrb[91].mxu0 }
 0x77b   : > { %v3353_v63 = vld [vmem:[%s10832_s5 + $0x80] sm:$0xff] }
 0x77c   : > { %v6960_v9 = vpack.c.bf16 %v3354_v31, %v3353_v63  ;;  %v3379_v31 = vld [vmem:[%s10832_s5 + $0x150] sm:$0xff] }
 0x77d   : > { %v2901_v10 = vpop.f32.mrb[92].mxu0  ;;  %v2916_v11 = vld [vmem:[#allocation4 + $0x8] sm:$0xff] }
 0x77e   : > { %v2917_v23 = vld [vmem:[#allocation4 + $0x1] sm:$0xff]  ;;  %2913 = vst.msk [vmem:[#allocation4 + $0x18] sm:$0xff] %vm1918_vm7, %v2901_v10  ;;  %v6526_v36 = vpop.f32.mrb[93].mxu0  ;;  %6961 = vmatprep.subr.bf16.mxu0 %v6960_v9  ;;  %v3348_v9 = vld [vmem:[%s10832_s5 + $0x58] sm:$0xff] }
 0x77f   : > { %v7755_v13 = vpack.i.bf16 %v2917_v23, %v2916_v11  ;;  %v2919_v14 = vld [vmem:[#allocation4 + $0x2] sm:$0xff] }
 0x780   : > { %v3337_v10 = vld [vmem:[%s10832_s5] sm:$0xff]  ;;  %v3370_v23 = vld [vmem:[%s10832_s5 + $0x108] sm:$0xff] }
 0x781   : > { %7756 = vrot.lane.b32.xlu1 %v7755_v13, %s10854_s23  ;;  %v2906_v15 = vpop.f32.mrb[94].mxu0  ;;  %v2918_v19 = vld [vmem:[#allocation4 + $0x9] sm:$0xff]  ;;  %v6994_v36 = vpack.c.bf16 %v3370_v23, %v3369_v53 }
 0x782   : > { %v2921_v16 = vld [vmem:[#allocation4 + $0x10] sm:$0xff]  ;;  %2914 = vst.msk [vmem:[#allocation4 + $0x20] sm:$0xff] %vm1918_vm7, %v2906_v15  ;;  %v6529_v21 = vpop.f32.mrb[95].mxu0 }
 0x783   : > { %v7760_v55 = vpack.i.bf16 %v2918_v19, %v2921_v16  ;;  %v2920_v24 = vld [vmem:[#allocation4 + $0xa] sm:$0xff] }
 0x784   : > { %v3387_v15 = vld [vmem:[%s10832_s5 + $0x190] sm:$0xff] }
 0x785   : > { %7761 = vrot.lane.b32.xlu1 %v7760_v55, %s10854_s23  ;;  %v9270_v45 = vld [vmem:[#allocation4 + $0x11] sm:$0xff] }
 0x786   : > { %v7765_v18 = vpack.i.bf16 %v2920_v24, %v9270_v45  ;;  %v2923_v26 = vld [vmem:[#allocation4 + $0x12] sm:$0xff] }
 0x787   : > { %v2924_v61 = vld [vmem:[#allocation4 + $0x18] sm:$0xff]  ;;  %v3347_v53 = vld [vmem:[%s10832_s5 + $0x50] sm:$0xff] }
 0x788   : > { %7766 = vrot.lane.b32.xlu0 %v7765_v18, %s10854_s23  ;;  %v3356_v55 = vld [vmem:[%s10832_s5 + $0x98] sm:$0xff]  ;;  %v3339_v18 = vld [vmem:[%s10832_s5 + $0x10] sm:$0xff] }
 0x789   : > { %v2925_v22 = vld [vmem:[#allocation4 + $0x19] sm:$0xff]  ;;  %3288 = vperm.xlu1 %7775, %v3281_v12  }
 0x78a   : > { %v7770_v32 = vpack.i.bf16 %v2923_v26, %v2925_v22  ;;  %v2926_v8 = vld [vmem:[#allocation4 + $0x1a] sm:$0xff] }
 0x78b   : > { %v3340_v12 = vld [vmem:[%s10832_s5 + $0x18] sm:$0xff] }
 0x78c   : > { %7771 = vrot.lane.b32.xlu0 %v7770_v32, %s10854_s23  ;;  %v3389_v32 = vld [vmem:[%s10832_s5 + $0x1a0] sm:$0xff] }
 0x78d   : > { %3298 = vperm.xlu1 %7775, %v3283_v33   ;;  %v3390_v33 = vld [vmem:[%s10832_s5 + $0x1a8] sm:$0xff] }
 0x790   : > { %3293 = vperm.xlu0 %7776, %v3282_v38   ;;  %v3357_v38 = vld [vmem:[%s10832_s5 + $0xa0] sm:$0xff] }
 0x791   : > { %3303 = vperm.xlu1 %7775, %v3284_v28   ;;  %v3358_v28 = vld [vmem:[%s10832_s5 + $0xa8] sm:$0xff] }
 0x792   : > { %v6968_v40 = vpack.c.bf16 %v3358_v28, %v3357_v38  ;;  %v3400_v38 = vld [vmem:[%s10832_s5 + $0x1f8] sm:$0xff]  ;;  %v3351_v28 = vld [vmem:[%s10832_s5 + $0x70] sm:$0xff] }
 0x794   : > { %3308 = vperm.xlu0 %7776, %v3285_v39   ;;  %v7000_v39 = vpack.c.bf16 %v3390_v33, %v3389_v32  ;;  %v3399_v32 = vld [vmem:[%s10832_s5 + $0x1f0] sm:$0xff] }
 0x7f3   : > { %v7757_v34 = vpop.permute.xlu1 %7756 }
 0x7f4   : > { %v7759_v6 = vunpack.i.h.bf16 %v7757_v34  ;;  %v7758_v41 = vunpack.i.l.bf16 %v7757_v34  ;;  %v3373_v34 = vld [vmem:[%s10832_s5 + $0x120] sm:$0xff] }
 0x7f6   : > { %v2961_v62 = vsel %vm1918_vm7, %v2919_v14, %v7758_v41  ;;  %v2959_v44 = vsel %vm1918_vm7, %v2915_v42, %v7759_v6  ;;  %v3342_v6 = vld [vmem:[%s10832_s5 + $0x28] sm:$0xff] }
 0x7f7   : > { %3113 = vmatprep.mubr.f32.mxu1 %v2961_v62  ;;  %v7762_v46 = vpop.permute.xlu1 %7761  ;;  %v3374_v41 = vld [vmem:[%s10832_s5 + $0x128] sm:$0xff]  ;;  %v6970_v14 = vpack.c.bf16 %v3342_v6, %v3341_v30  ;;  %v3391_v62 = vld [vmem:[%s10832_s5 + $0x1b0] sm:$0xff]  ;;  %v3384_v6 = vld [vmem:[%s10832_s5 + $0x178] sm:$0xff] }
 0x7f8   : > { %v7764_v47 = vunpack.i.h.bf16 %v7762_v46  ;;  %v7763_v7 = vunpack.i.l.bf16 %v7762_v46  ;;  %3114 = vmatmul.mubr.f32.vlgmr.msra.gmra.mrb[78].mxu1 %v2959_v44  ;;  %v7002_v42 = vpack.c.bf16 %v3374_v41, %v3373_v34  ;;  %v3392_v44 = vld [vmem:[%s10832_s5 + $0x1b8] sm:$0xff]  ;;  %v7020_v34 = vpack.c.bf16 %v3400_v38, %v3399_v32  ;;  %v3383_v30 = vld [vmem:[%s10832_s5 + $0x170] sm:$0xff] }
 0x7f9   : > { %6947 = vmatpush3.bf16.msra.mxu1 %v9237_v54  ;;  %v3360_v46 = vld [vmem:[%s10832_s5 + $0xb8] sm:$0xff]  ;;  %v7004_v27 = vpack.c.bf16 %v3392_v44, %v3391_v62  ;;  %v7022_v41 = vpack.c.bf16 %v3384_v6, %v3383_v30  ;;  %v3417_v62 = vld [vmem:[%s10832_s5 + $0x280] sm:$0xff]  ;;  %v3418_v44 = vld [vmem:[%s10832_s5 + $0x288] sm:$0xff] }
 0x7fa   : > { %v2962_v37 = vsel %vm1918_vm7, %v2920_v24, %v7763_v7  ;;  %6949 = vmatprep.subr.bf16.mxu1 %v6948_v20  ;;  %v2960_v0 = vsel %vm1918_vm7, %v2916_v11, %v7764_v47  ;;  %v7767_v35 = vpop.permute.xlu0 %7766  ;;  %v3338_v11 = vld [vmem:[%s10832_s5 + $0x8] sm:$0xff]  ;;  %v3371_v24 = vld [vmem:[%s10832_s5 + $0x110] sm:$0xff]  ;;  %v3452_v38 = vld [vmem:[%s10832_s5 + $0x398] sm:$0xff] }
 0x7fb   : > { %3118 = vmatprep.mubr.f32.mxu1 %v2962_v37  ;;  %v7769_v52 = vunpack.i.h.bf16 %v7767_v35  ;;  %v7768_v17 = vunpack.i.l.bf16 %v7767_v35  ;;  %v6962_v13 = vpack.c.bf16 %v3338_v11, %v3337_v10  ;;  %v6998_v22 = vpack.c.bf16 %v3372_v25, %v3371_v24  ;;  %v3343_v7 = vld [vmem:[%s10832_s5 + $0x30] sm:$0xff]  ;;  %v3344_v37 = vld [vmem:[%s10832_s5 + $0x38] sm:$0xff]  ;;  %v3349_v24 = vld [vmem:[%s10832_s5 + $0x60] sm:$0xff] }
 0x7fc   : > { %3119 = vmatmul.mubr.f32.gmra.mrb[80].mxu1 %v2960_v0  ;;  %v3376_v0 = vld [vmem:[%s10832_s5 + $0x138] sm:$0xff]  ;;  %v6982_v11 = vpack.c.bf16 %v3348_v9, %v3347_v53 }
 0x7fd   : > { %6951 = vmatpush3.bf16.msra.mxu1 %v6948_v20  ;;  %6546 = vmatprep.mubr.msk.f32.mxu1 %vm1918_vm7, %v2923_v26  ;;  %v2965_v1 = vsel %vm1918_vm7, %v2921_v16, %v7768_v17  ;;  %v2963_v54 = vsel %vm1918_vm7, %v2918_v19, %v7769_v52  ;;  %v3388_v19 = vld [vmem:[%s10832_s5 + $0x198] sm:$0xff]  ;;  %v3355_v16 = vld [vmem:[%s10832_s5 + $0x90] sm:$0xff]  ;;  %v6966_v26 = vpack.c.bf16 %v3340_v12, %v3339_v18  ;;  %v3361_v52 = vld [vmem:[%s10832_s5 + $0xc0] sm:$0xff] }
 0x7fe   : > { %6953 = vmatprep.subr.bf16.mxu1 %v6952_v48  ;;  %3188 = vmatprep.mubr.f32.mxu0 %v2965_v1  ;;  %v7772_v58 = vpop.permute.xlu0 %7771  ;;  %v6996_v21 = vpack.c.bf16 %v3388_v19, %v3387_v15  ;;  %v3359_v20 = vld [vmem:[%s10832_s5 + $0xb0] sm:$0xff]  ;;  %v7006_v35 = vpack.c.bf16 %v3376_v0, %v3375_v57  ;;  %v3362_v17 = vld [vmem:[%s10832_s5 + $0xc8] sm:$0xff]  ;;  %v7008_v1 = vpack.c.bf16 %v3394_v50, %v3393_v49  ;;  %v3380_v10 = vld [vmem:[%s10832_s5 + $0x158] sm:$0xff] }
 0x7ff   : > { %v7774_v51 = vunpack.i.h.bf16 %v7772_v58  ;;  %v7773_v60 = vunpack.i.l.bf16 %v7772_v58  ;;  %3189 = vmatmul.mubr.f32.vlgmr.msra.gmra.mrb[96].mxu0 %v2963_v54  ;;  %v6972_v47 = vpack.c.bf16 %v3360_v46, %v3359_v20  ;;  %v3377_v54 = vld [vmem:[%s10832_s5 + $0x140] sm:$0xff]  ;;  %v7014_v23 = vpack.c.bf16 %v3380_v10, %v3379_v31  ;;  %v3366_v19 = vld [vmem:[%s10832_s5 + $0xe8] sm:$0xff] }
 0x800   : > { %6963 = vmatpush3.bf16.msra.mxu0 %v6962_v13  ;;  %v3345_v58 = vld [vmem:[%s10832_s5 + $0x40] sm:$0xff]  ;;  %v3382_v18 = vld [vmem:[%s10832_s5 + $0x168] sm:$0xff]  ;;  %v7024_v46 = vpack.c.bf16 %v3418_v44, %v3417_v62 }
 0x801   : > { %6955 = vmatpush3.bf16.msra.mxu1 %v6952_v48  ;;  %v2966_v2 = vsel %vm1918_vm7, %v2924_v61, %v7773_v60  ;;  %v2964_v4 = vsel %vm1918_vm7, %v9270_v45, %v7774_v51  ;;  %v6964_v45 = vpack.c.bf16 %v3356_v55, %v3355_v16  ;;  %v6974_v48 = vpack.c.bf16 %v3344_v37, %v3343_v7  ;;  %v3346_v51 = vld [vmem:[%s10832_s5 + $0x48] sm:$0xff]  ;;  %v3397_v13 = vld [vmem:[%s10832_s5 + $0x1e0] sm:$0xff] }
 0x802   : > { %6957 = vmatprep.subr.bf16.mxu1 %v6956_v56  ;;  %3193 = vmatprep.mubr.f32.mxu0 %v2966_v2  ;;  %v3378_v60 = vld [vmem:[%s10832_s5 + $0x148] sm:$0xff]  ;;  %v6978_v61 = vpack.c.bf16 %v3346_v51, %v3345_v58  ;;  %v3365_v15 = vld [vmem:[%s10832_s5 + $0xe0] sm:$0xff] }
 0x803   : > { %3194 = vmatmul.mubr.f32.gmra.mrb[98].mxu0 %v2964_v4  ;;  %6965 = vmatprep.subr.bf16.mxu0 %v6964_v45  ;;  %v7010_v2 = vpack.c.bf16 %v3378_v60, %v3377_v54  ;;  %v3395_v4 = vld [vmem:[%s10832_s5 + $0x1d0] sm:$0xff]  ;;  %v3381_v55 = vld [vmem:[%s10832_s5 + $0x160] sm:$0xff]  ;;  %v3350_v45 = vld [vmem:[%s10832_s5 + $0x68] sm:$0xff] }
 0x804   : > { %6967 = vmatpush3.bf16.msra.mxu0 %v6966_v26  ;;  %v6986_v12 = vpack.c.bf16 %v3350_v45, %v3349_v24  ;;  %v7018_v25 = vpack.c.bf16 %v3382_v18, %v3381_v55  ;;  %v3367_v26 = vld [vmem:[%s10832_s5 + $0xf0] sm:$0xff]  ;;  %v3433_v45 = vld [vmem:[%s10832_s5 + $0x300] sm:$0xff]  ;;  %v3434_v18 = vld [vmem:[%s10832_s5 + $0x308] sm:$0xff] }
 0x805   : > { %6959 = vmatpush3.bf16.msra.mxu1 %v6956_v56  ;;  %6969 = vmatprep.subr.bf16.mxu0 %v6968_v40  ;;  %v6976_v56 = vpack.c.bf16 %v3362_v17, %v3361_v52  ;;  %v7058_v32 = vpack.c.bf16 %v3434_v18, %v3433_v45  ;;  %v3421_v62 = vld [vmem:[%s10832_s5 + $0x2a0] sm:$0xff]  ;;  %v3422_v44 = vld [vmem:[%s10832_s5 + $0x2a8] sm:$0xff]  ;;  %v3428_v45 = vld [vmem:[%s10832_s5 + $0x2d8] sm:$0xff] }
 0x806   : > { %6993 = vmatprep.subr.bf16.mxu1 %v6992_v43  ;;  %v6980_v43 = vpack.c.bf16 %v3364_v5, %v3363_v29 }
 0x808   : > { %6547 = vmatmul.mubr.msk.f32.vlgmr.msra.gmra.mrb[82].mxu1 %vm1918_vm7, %v2926_v8  ;;  %6971 = vmatpush3.bf16.msra.mxu0 %v6970_v14  ;;  %v3396_v8 = vld [vmem:[%s10832_s5 + $0x1d8] sm:$0xff]  ;;  %v3449_v14 = vld [vmem:[%s10832_s5 + $0x380] sm:$0xff]  ;;  %v3289_v51 = vpop.permute.xlu1 %3288 }
 0x809   : > { %6995 = vmatpush3.bf16.msra.mxu1 %v6994_v36  ;;  %6973 = vmatprep.subr.bf16.mxu0 %v6972_v47  ;;  %v7012_v63 = vpack.c.bf16 %v3396_v8, %v3395_v4  ;;  %v3398_v36 = vld [vmem:[%s10832_s5 + $0x1e8] sm:$0xff] }
 0x80a   : > { %6997 = vmatprep.subr.bf16.mxu1 %v6996_v21  ;;  %v7016_v16 = vpack.c.bf16 %v3398_v36, %v3397_v13  ;;  %v6984_v21 = vpack.c.bf16 %v3366_v19, %v3365_v15 }
 0x80c   : > { %6975 = vmatpush3.bf16.msra.mxu0 %v6974_v48  ;;  %v5725_v48 = vld [vmem:[%s10831_s4 + $0x240] ss:$0 sm:$0xff] }
 0x80d   : > { %6999 = vmatpush3.bf16.msra.mxu1 %v6998_v22  ;;  %6977 = vmatprep.subr.bf16.mxu0 %v6976_v56  ;;  %v3368_v22 = vld [vmem:[%s10832_s5 + $0xf8] sm:$0xff] }
 0x80e   : > { %7001 = vmatprep.subr.bf16.mxu1 %v7000_v39  ;;  %v6988_v33 = vpack.c.bf16 %v3368_v22, %v3367_v26  ;;  %v3352_v39 = vld [vmem:[%s10832_s5 + $0x78] sm:$0xff]  ;;  %v3419_v26 = vld [vmem:[%s10832_s5 + $0x290] sm:$0xff] }
 0x80f   : > { %v6990_v40 = vpack.c.bf16 %v3352_v39, %v3351_v28  ;;  %v3294_v9 = vpop.permute.xlu0 %3293  ;;  %v3420_v22 = vld [vmem:[%s10832_s5 + $0x298] sm:$0xff]  ;;  %v3403_v39 = vld [vmem:[%s10832_s5 + $0x210] sm:$0xff] }
 0x810   : > { %6979 = vmatpush3.bf16.msra.mxu0 %v6978_v61 }
 0x811   : > { %7003 = vmatpush3.bf16.msra.mxu1 %v7002_v42  ;;  %6981 = vmatprep.subr.bf16.mxu0 %v6980_v43  ;;  %v3450_v42 = vld [vmem:[%s10832_s5 + $0x388] sm:$0xff]  ;;  %v3299_v43 = vpop.permute.xlu1 %3298 }
 0x812   : > { %7005 = vmatprep.subr.bf16.mxu1 %v7004_v27  ;;  %v7056_v20 = vpack.c.bf16 %v3450_v42, %v3449_v14  ;;  %v3404_v14 = vld [vmem:[%s10832_s5 + $0x218] sm:$0xff] }
 0x813   : > { %v3309_v15 = vpop.permute.xlu0 %3308 }
 0x814   : > { %6983 = vmatpush3.bf16.msra.mxu0 %v6982_v11 }
 0x815   : > { %7007 = vmatpush3.bf16.msra.mxu1 %v7006_v35  ;;  %6985 = vmatprep.subr.bf16.mxu0 %v6984_v21  ;;  %v3304_v13 = vpop.permute.xlu1 %3303 }
 0x816   : > { %7009 = vmatprep.subr.bf16.mxu1 %v7008_v1 }
 0x818   : > { %6987 = vmatpush3.bf16.msra.mxu0 %v6986_v12  ;;  %v3401_v12 = vld [vmem:[%s10832_s5 + $0x200] sm:$0xff] }
 0x819   : > { %7011 = vmatpush3.bf16.msra.mxu1 %v7010_v2  ;;  %6989 = vmatprep.subr.bf16.mxu0 %v6988_v33  ;;  %v3311_v2 = vlaneseq  ;;  %v3451_v33 = vld [vmem:[%s10832_s5 + $0x390] sm:$0xff] }
 0x81a   : > { %7013 = vmatprep.subr.bf16.mxu1 %v7012_v63  ;;  %v7060_v42 = vpack.c.bf16 %v3452_v38, %v3451_v33  ;;  %v3412_v38 = vld [vmem:[%s10832_s5 + $0x258] sm:$0xff] }
 0x81b   : > { %v3312_v31 = vshrl.u32 %v3311_v2, 7  ;;  %v3439_v2 = vld [vmem:[%s10832_s5 + $0x330] sm:$0xff] }
 0x81c   : > { %6991 = vmatpush3.bf16.msra.mxu0 %v6990_v40  ;;  %v3436_v40 = vld [vmem:[%s10832_s5 + $0x318] sm:$0xff] }
 0x81d   : > { %7015 = vmatpush3.bf16.msra.mxu1 %v7014_v23  ;;  %7025 = vmatprep.subr.bf16.mxu0 %v7024_v46  ;;  %v3313_v11 = vsub.s32 0, %v3312_v31  ;;  %v3425_v31 = vld [vmem:[%s10832_s5 + $0x2c0] sm:$0xff] }
 0x81e   : > { %7017 = vmatprep.subr.bf16.mxu1 %v7016_v16 }
 0x821   : > { %7019 = vmatpush3.bf16.msra.mxu1 %v7018_v25  ;;  %v3402_v25 = vld [vmem:[%s10832_s5 + $0x208] sm:$0xff] }
 0x822   : > { %7021 = vmatprep.subr.bf16.mxu1 %v7020_v34  ;;  %v7026_v28 = vpack.c.bf16 %v3402_v25, %v3401_v12  ;;  %v3435_v34 = vld [vmem:[%s10832_s5 + $0x310] sm:$0xff] }
 0x825   : > { %7023 = vmatpush3.bf16.msra.mxu1 %v7022_v41  ;;  %v7028_v41 = vpack.c.bf16 %v3420_v22, %v3419_v26  ;;  %v3411_v26 = vld [vmem:[%s10832_s5 + $0x250] sm:$0xff] }
 0x826   : > { %7057 = vmatprep.subr.bf16.mxu1 %v7056_v20  ;;  %v3453_v20 = vld [vmem:[%s10832_s5 + $0x3a0] sm:$0xff]  ;;  %v3443_v22 = vld [vmem:[%s10832_s5 + $0x350] sm:$0xff] }
 0x8cb   : > { %v5876_v27 = vpop.f32.mrb[78].mxu1 }
 0x8cc   : > { %v5877_v57 = vpop.f32.mrb[79].mxu1 }
 0x8cd   : > { %v5878_v47 = vadd.f32 %v5877_v57, %v5876_v27  ;;  %v7062_v27 = vpack.c.bf16 %v3436_v40, %v3435_v34  ;;  %v3454_v57 = vld [vmem:[%s10832_s5 + $0x3a8] sm:$0xff]  ;;  %v3429_v34 = vld [vmem:[%s10832_s5 + $0x2e0] sm:$0xff] }
 0x8ce   : > { %v3430_v40 = vld [vmem:[%s10832_s5 + $0x2e8] sm:$0xff] }
 0x8cf   : > { %v5879_v7 = vpop.f32.mrb[80].mxu1  ;;  %v3116_v50 = vadd.f32 %v5878_v47, %v5725_v48  ;;  %v3437_v47 = vld [vmem:[%s10832_s5 + $0x320] sm:$0xff] }
 0x8d0   : > { %v5880_v37 = vpop.f32.mrb[81].mxu1 }
 0x8d1   : > { %v5881_v0 = vadd.f32 %v5880_v37, %v5879_v7  ;;  %v7030_v7 = vpack.c.bf16 %v3404_v14, %v3403_v39  ;;  %v3405_v37 = vld [vmem:[%s10832_s5 + $0x220] sm:$0xff]  ;;  %v3462_v39 = vld [vmem:[%s10832_s5 + $0x3e8] sm:$0xff] }
 0x8d2   : > { %v5914_v35 = vpop.f32.mrb[96].mxu0  ;;  %v3413_v14 = vld [vmem:[%s10832_s5 + $0x260] sm:$0xff] }
 0x8d3   : > { %v5915_v49 = vpop.f32.mrb[97].mxu0  ;;  %v3121_v56 = vadd.f32 %v5881_v0, %v5725_v48  ;;  %v3406_v0 = vld [vmem:[%s10832_s5 + $0x228] sm:$0xff] }
 0x8d4   : > { %v5916_v52 = vadd.f32 %v5915_v49, %v5914_v35  ;;  %v3438_v48 = vld [vmem:[%s10832_s5 + $0x328] sm:$0xff]  ;;  %v7032_v49 = vpack.c.bf16 %v3422_v44, %v3421_v62  ;;  %v7048_v44 = vpack.c.bf16 %v3430_v40, %v3429_v34 }
 0x8d5   : > { %v3446_v62 = vld [vmem:[%s10832_s5 + $0x368] sm:$0xff] }
 0x8d6   : > { %v5917_v17 = vpop.f32.mrb[98].mxu0  ;;  %v3191_v1 = vadd.f32 %v5916_v52, %v3116_v50  ;;  %v3455_v50 = vld [vmem:[%s10832_s5 + $0x3b0] sm:$0xff]  ;;  %v3456_v52 = vld [vmem:[%s10832_s5 + $0x3b8] sm:$0xff] }
 0x8d7   : > { %v5918_v54 = vpop.f32.mrb[99].mxu0 }
 0x8d8   : > { %v5919_v58 = vadd.f32 %v5918_v54, %v5917_v17  ;;  %v7064_v17 = vpack.c.bf16 %v3454_v57, %v3453_v20  ;;  %v3424_v54 = vld [vmem:[%s10832_s5 + $0x2b8] sm:$0xff]  ;;  %v3414_v20 = vld [vmem:[%s10832_s5 + $0x268] sm:$0xff] }
 0x8d9   : > { %v3464_v57 = vld [vmem:[%s10832_s5 + $0x3f8] sm:$0xff] }
 0x8da   : > { %v3196_v60 = vadd.f32 %v5919_v58, %v3121_v56  ;;  %v7066_v56 = vpack.c.bf16 %v3438_v48, %v3437_v47  ;;  %v3407_v58 = vld [vmem:[%s10832_s5 + $0x230] sm:$0xff] }
 0x8db   : > { %v6548_v61 = vpop.f32.mrb[82].mxu1  ;;  %v3431_v47 = vld [vmem:[%s10832_s5 + $0x2f0] sm:$0xff] }
 0x8dc   : > { %v3265_v4 = vpop.f32.mrb[83].mxu1  ;;  %v3271_v8 = vadd.f32 %v6548_v61, %v3196_v60  ;;  %v7034_v60 = vpack.c.bf16 %v3406_v0, %v3405_v37  ;;  %v7068_v61 = vpack.c.bf16 %v3456_v52, %v3455_v50  ;;  %v7050_v0 = vpack.c.bf16 %v3414_v20, %v3413_v14  ;;  %v3415_v52 = vld [vmem:[%s10832_s5 + $0x270] sm:$0xff] }
 0x8dd   : > { %v3266_v29 = vadd.f32 %v3265_v4, %v3191_v1  ;;  %v3423_v1 = vld [vmem:[%s10832_s5 + $0x2b0] sm:$0xff]  ;;  %v3440_v4 = vld [vmem:[%s10832_s5 + $0x338] sm:$0xff] }
 0x8de   : > { %v3275_v5 = vmax.f32 %v3271_v8, 0.0  ;;  %v7036_v8 = vpack.c.bf16 %v3424_v54, %v3423_v1  ;;  %v3465_v1 = vld [vmem:[%s10832_s5 + $0x400] sm:$0xff]  ;;  %v3466_v54 = vld [vmem:[%s10832_s5 + $0x408] sm:$0xff] }
 0x8df   : > { %v3274_v63 = vmax.f32 %v3266_v29, 0.0  ;;  %v3408_v29 = vld [vmem:[%s10832_s5 + $0x238] sm:$0xff] }
 0x8e1   : > { %v3276_v53 = vmax.f32 %v3274_v63, %v3275_v5  ;;  %v3457_v5 = vld [vmem:[%s10832_s5 + $0x3c0] sm:$0xff]  ;;  %v3458_v63 = vld [vmem:[%s10832_s5 + $0x3c8] sm:$0xff] }
 0x8e3   : > { %v3278_v10 = vrot.slane %v3276_v53, 1 }
 0x8e5   : > { %v3280_v23 = vmax.f32 %v3276_v53, %v3278_v10  ;;  %v7070_v53 = vpack.c.bf16 %v3440_v4, %v3439_v2  ;;  %v7072_v10 = vpack.c.bf16 %v3458_v63, %v3457_v5  ;;  %v3468_v2 = vld [vmem:[%s10832_s5 + $0x418] sm:$0xff]  ;;  %v3470_v5 = vld [vmem:[%s10832_s5 + $0x428] sm:$0xff] }
 0x8e7   : > { %v3314_v36 = vrot.slane %v3280_v23, %v3313_v11  ;;  %v3409_v11 = vld [vmem:[%s10832_s5 + $0x240] sm:$0xff] }
 0x8e8   : > { %v3441_v23 = vld [vmem:[%s10832_s5 + $0x340] sm:$0xff] }
 0x8e9   : > { %v3315_v19 = vmul.f32 %v3314_v36, %v3289_v51  ;;  %v9527_v16 = vmul.f32 %v3314_v36, %v3299_v43  ;;  %v3316_v55 = vmul.f32 %v3314_v36, %v3294_v9  ;;  %v9529_v21 = vmul.f32 %v3314_v36, %v3304_v13  ;;  %v3426_v43 = vld [vmem:[%s10832_s5 + $0x2c8] sm:$0xff] }
 0x8ea   : > { %v3319_v24 = vmul.f32 %v3314_v36, %v3309_v15  ;;  %v7038_v9 = vpack.c.bf16 %v3408_v29, %v3407_v58  ;;  %v3442_v13 = vld [vmem:[%s10832_s5 + $0x348] sm:$0xff]  ;;  %v7040_v36 = vpack.c.bf16 %v3426_v43, %v3425_v31  ;;  %v3469_v29 = vld [vmem:[%s10832_s5 + $0x420] sm:$0xff]  ;;  %v3472_v43 = vld [vmem:[%s10832_s5 + $0x438] sm:$0xff] }
 0x8eb   : > { %3320 = vst [vmem:[#allocation5] sm:$0xff] %v3315_v19  ;;  %3322 = vst [vmem:[#allocation5 + $0x10] sm:$0xff] %v9527_v16  ;;  %3625 = vmatprep.mubr.f32.mxu1 %v3316_v55  ;;  %v3410_v15 = vld [vmem:[%s10832_s5 + $0x248] sm:$0xff]  ;;  %v7074_v18 = vpack.c.bf16 %v3442_v13, %v3441_v23  ;;  %v7096_v31 = vpack.c.bf16 %v3470_v5, %v3469_v29  ;;  %v3477_v23 = vld [vmem:[%s10832_s5 + $0x460] sm:$0xff] }
 0x8ec   : > { %3321 = vst [vmem:[#allocation5 + $0x8] sm:$0xff] %v3316_v55  ;;  %3323 = vst [vmem:[#allocation5 + $0x18] sm:$0xff] %v9529_v21  ;;  %v7042_v12 = vpack.c.bf16 %v3410_v15, %v3409_v11  ;;  %v3478_v13 = vld [vmem:[%s10832_s5 + $0x468] sm:$0xff]  ;;  %v3479_v15 = vld [vmem:[%s10832_s5 + $0x470] sm:$0xff] }
 0x8ed   : > { %3324 = vst [vmem:[#allocation5 + $0x20] sm:$0xff] %v3319_v24  ;;  %v3427_v24 = vld [vmem:[%s10832_s5 + $0x2d0] sm:$0xff]  ;;  %v3866_v5 = vld [vmem:[%s10841_s14 + $0x18] sm:$0xff] }
 0x8ee   : > { %v7044_v33 = vpack.c.bf16 %v3428_v45, %v3427_v24  ;;  %v3865_v29 = vld [vmem:[%s10841_s14 + $0x10] sm:$0xff] }
 0x8f3   : > { %v3327_v30 = vld [vmem:[#allocation5 + $0x1] sm:$0xff]  ;;  %v9578_v46 = vld [vmem:[#allocation5 + $0x9] sm:$0xff]  ;;  %v9612_v51 = vld [vmem:[#allocation5 + $0x11] sm:$0xff] }
 0x8f4   : > { %v3329_v6 = vld [vmem:[#allocation5 + $0x2] sm:$0xff]  ;;  %3550 = vmatprep.mubr.f32.mxu0 %v3327_v30  ;;  %v3330_v35 = vld [vmem:[#allocation5 + $0xa] sm:$0xff]  ;;  %v3333_v63 = vld [vmem:[#allocation5 + $0x12] sm:$0xff] }
 0x8f5   : > { %3626 = vmatmul.mubr.f32.vlgmr.msra.gmra.mrb[84].mxu1 %v3329_v6  ;;  %3551 = vmatmul.mubr.f32.vlgmr.msra.gmra.mrb[100].mxu0 %v3315_v19  ;;  %v3459_v19 = vld [vmem:[%s10832_s5 + $0x3d0] sm:$0xff]  ;;  %v7046_v6 = vpack.c.bf16 %v3412_v38, %v3411_v26  ;;  %v3336_v24 = vld [vmem:[#allocation5 + $0x1a] sm:$0xff] }
 0x8f6   : > { %7059 = vmatpush3.bf16.msra.mxu1 %v7058_v32  ;;  %7027 = vmatpush3.bf16.msra.mxu0 %v7026_v28  ;;  %v3444_v32 = vld [vmem:[%s10832_s5 + $0x358] sm:$0xff]  ;;  %v3461_v28 = vld [vmem:[%s10832_s5 + $0x3e0] sm:$0xff] }
 0x8f7   : > { %3555 = vmatprep.mubr.f32.mxu0 %v9578_v46  ;;  %3630 = vmatprep.mubr.f32.mxu1 %v9527_v16  ;;  %v7078_v30 = vpack.c.bf16 %v3444_v32, %v3443_v22 }
 0x8f8   : > { %7029 = vmatprep.subr.bf16.mxu0 %v7028_v41  ;;  %7061 = vmatprep.subr.bf16.mxu1 %v7060_v42  ;;  %v7080_v41 = vpack.c.bf16 %v3462_v39, %v3461_v28  ;;  %v3445_v42 = vld [vmem:[%s10832_s5 + $0x360] sm:$0xff] }
 0x8f9   : > { %3631 = vmatmul.mubr.f32.gmra.mrb[86].mxu1 %v3330_v35  ;;  %3556 = vmatmul.mubr.f32.gmra.mrb[102].mxu0 %v3316_v55  ;;  %v3460_v55 = vld [vmem:[%s10832_s5 + $0x3d8] sm:$0xff]  ;;  %v7082_v37 = vpack.c.bf16 %v3446_v62, %v3445_v42 }
 0x8fa   : > { %7063 = vmatpush3.bf16.msra.mxu1 %v7062_v27  ;;  %7031 = vmatpush3.bf16.msra.mxu0 %v7030_v7  ;;  %v7076_v25 = vpack.c.bf16 %v3460_v55, %v3459_v19  ;;  %v3463_v27 = vld [vmem:[%s10832_s5 + $0x3f0] sm:$0xff]  ;;  %v3432_v7 = vld [vmem:[%s10832_s5 + $0x2f8] sm:$0xff] }
 0x8fb   : > { %3700 = vmatprep.mubr.f32.mxu0 %v3330_v35  ;;  %3775 = vmatprep.mubr.f32.mxu1 %v9612_v51  ;;  %v7084_v48 = vpack.c.bf16 %v3464_v57, %v3463_v27  ;;  %v3447_v35 = vld [vmem:[%s10832_s5 + $0x370] sm:$0xff]  ;;  %v7052_v50 = vpack.c.bf16 %v3432_v7, %v3431_v47  ;;  %v3480_v19 = vld [vmem:[%s10832_s5 + $0x478] sm:$0xff] }
 0x8fc   : > { %7033 = vmatprep.subr.bf16.mxu0 %v7032_v49  ;;  %7065 = vmatprep.subr.bf16.mxu1 %v7064_v17  ;;  %v3448_v49 = vld [vmem:[%s10832_s5 + $0x378] sm:$0xff]  ;;  %v7116_v55 = vpack.c.bf16 %v3480_v19, %v3479_v15  ;;  %v4134_v15 = vld [vmem:[%s10834_s7 + $0x180] sm:$0xff]  ;;  %v4135_v19 = vld [vmem:[%s10834_s7 + $0x188] sm:$0xff] }
 0x8fd   : > { %v3416_v17 = vld [vmem:[%s10832_s5 + $0x278] sm:$0xff] }
 0x8fe   : > { %7067 = vmatpush3.bf16.msra.mxu1 %v7066_v56  ;;  %7035 = vmatpush3.bf16.msra.mxu0 %v7034_v60  ;;  %v7086_v56 = vpack.c.bf16 %v3448_v49, %v3447_v35  ;;  %v7054_v58 = vpack.c.bf16 %v3416_v17, %v3415_v52  ;;  %v7088_v60 = vpack.c.bf16 %v3466_v54, %v3465_v1 }
 0x8ff   : > { %7069 = vmatprep.subr.bf16.mxu1 %v7068_v61  ;;  %7037 = vmatprep.subr.bf16.mxu0 %v7036_v8  ;;  %v3467_v61 = vld [vmem:[%s10832_s5 + $0x410] sm:$0xff]  ;;  %v3335_v8 = vld [vmem:[#allocation5 + $0x19] sm:$0xff] }
 0x900   : > { %v7092_v4 = vpack.c.bf16 %v3468_v2, %v3467_v61 }
 0x902   : > { %7071 = vmatpush3.bf16.msra.mxu1 %v7070_v53  ;;  %7039 = vmatpush3.bf16.msra.mxu0 %v7038_v9  ;;  %v3474_v53 = vld [vmem:[%s10832_s5 + $0x448] sm:$0xff] }
 0x903   : > { %7073 = vmatprep.subr.bf16.mxu1 %v7072_v10  ;;  %7041 = vmatprep.subr.bf16.mxu0 %v7040_v36  ;;  %v3476_v10 = vld [vmem:[%s10832_s5 + $0x458] sm:$0xff]  ;;  %v7112_v36 = vpack.c.bf16 %v3478_v13, %v3477_v23  ;;  %v4088_v13 = vld [vmem:[%s10834_s7 + $0x10] sm:$0xff] }
 0x906   : > { %7075 = vmatpush3.bf16.msra.mxu1 %v7074_v18  ;;  %7043 = vmatpush3.bf16.msra.mxu0 %v7042_v12 }
 0x907   : > { %7077 = vmatprep.subr.bf16.mxu1 %v7076_v25  ;;  %7045 = vmatprep.subr.bf16.mxu0 %v7044_v33  ;;  %v5728_v25 = vld [vmem:[%s10832_s5 + $0x480] ss:$0 sm:$0xff] }
 0x90a   : > { %7079 = vmatpush3.bf16.msra.mxu1 %v7078_v30  ;;  %7047 = vmatpush3.bf16.msra.mxu0 %v7046_v6 }
 0x90b   : > { %7081 = vmatprep.subr.bf16.mxu1 %v7080_v41  ;;  %7049 = vmatprep.subr.bf16.mxu0 %v7048_v44 }
 0x90e   : > { %7083 = vmatpush3.bf16.msra.mxu1 %v7082_v37  ;;  %7051 = vmatpush3.bf16.msra.mxu0 %v7050_v0 }
 0x90f   : > { %7085 = vmatprep.subr.bf16.mxu1 %v7084_v48  ;;  %7053 = vmatprep.subr.bf16.mxu0 %v7052_v50 }
 0x912   : > { %7087 = vmatpush3.bf16.msra.mxu1 %v7086_v56  ;;  %7055 = vmatpush3.bf16.msra.mxu0 %v7054_v58 }
 0x913   : > { %7120 = vmatprep.subr.bf16.mxu1 %v7880_v3  ;;  %7089 = vmatprep.subr.bf16.mxu0 %v7088_v60 }
 0x915   : > { %3776 = vmatmul.mubr.f32.vlgmr.msra.gmra.mrb[88].mxu1 %v9527_v16  ;;  %3701 = vmatmul.mubr.f32.vlgmr.msra.gmra.mrb[104].mxu0 %v9578_v46  ;;  %v3471_v16 = vld [vmem:[%s10832_s5 + $0x430] sm:$0xff] }
 0x916   : > { %3780 = vmatprep.mubr.f32.mxu1 %v3335_v8  ;;  %3705 = vmatprep.mubr.f32.mxu0 %v3333_v63  ;;  %v7100_v46 = vpack.c.bf16 %v3472_v43, %v3471_v16  ;;  %v3864_v8 = vld [vmem:[%s10841_s14 + $0x8] sm:$0xff]  ;;  %v3869_v16 = vld [vmem:[%s10841_s14 + $0x30] sm:$0xff]  ;;  %v4102_v43 = vld [vmem:[%s10834_s7 + $0x80] sm:$0xff] }
 0x917   : > { %7091 = vmatpush3.bf16.msra.mxu0 %v7088_v60 }
 0x918   : > { %7093 = vmatprep.subr.bf16.mxu0 %v7092_v4 }
 0x919   : > { %3781 = vmatmul.mubr.f32.gmra.mrb[90].mxu1 %v9529_v21  ;;  %3706 = vmatmul.mubr.f32.gmra.mrb[106].mxu0 %v9612_v51  ;;  %v3473_v21 = vld [vmem:[%s10832_s5 + $0x440] sm:$0xff]  ;;  %v3475_v51 = vld [vmem:[%s10832_s5 + $0x450] sm:$0xff] }
 0x91a   : > { %6588 = vmatprep.mubr.msk.f32.mxu1 %vm7889_vm11, %v7890_v59  ;;  %6581 = vmatprep.mubr.f32.mxu0 %v3333_v63  ;;  %v7104_v9 = vpack.c.bf16 %v3474_v53, %v3473_v21  ;;  %v7108_v11 = vpack.c.bf16 %v3476_v10, %v3475_v51  ;;  %v3867_v63 = vld [vmem:[%s10841_s14 + $0x20] sm:$0xff]  ;;  %v4104_v51 = vld [vmem:[%s10834_s7 + $0x90] sm:$0xff]  ;;  %v4105_v10 = vld [vmem:[%s10834_s7 + $0x98] sm:$0xff] }
 0x91b   : > { %7095 = vmatpush3.bf16.msra.mxu0 %v7092_v4  ;;  %v3863_v4 = vld [vmem:[%s10841_s14] sm:$0xff]  ;;  %v7127_v23 = vpack.c.bf16 %v4105_v10, %v4104_v51  ;;  %v4115_v51 = vld [vmem:[%s10834_s7 + $0xe8] sm:$0xff] }
 0x91c   : > { %7097 = vmatprep.subr.bf16.mxu0 %v7096_v31  ;;  %v4086_v21 = vld [vmem:[%s10834_s7] sm:$0xff] }
 0x91f   : > { %7099 = vmatpush3.bf16.msra.mxu0 %v7096_v31  ;;  %v3868_v31 = vld [vmem:[%s10841_s14 + $0x28] sm:$0xff] }
 0x920   : > { %7101 = vmatprep.subr.bf16.mxu0 %v7100_v46 }
 0x923   : > { %7103 = vmatpush3.bf16.msra.mxu0 %v7100_v46  ;;  %v4103_v46 = vld [vmem:[%s10834_s7 + $0x88] sm:$0xff] }
 0x924   : > { %7105 = vmatprep.subr.bf16.mxu0 %v7104_v9  ;;  %v7123_v53 = vpack.c.bf16 %v4103_v46, %v4102_v43  ;;  %v4097_v46 = vld [vmem:[%s10834_s7 + $0x58] sm:$0xff] }
 0x927   : > { %7107 = vmatpush3.bf16.msra.mxu0 %v7104_v9  ;;  %v4087_v9 = vld [vmem:[%s10834_s7 + $0x8] sm:$0xff] }
 0x928   : > { %7109 = vmatprep.subr.bf16.mxu0 %v7108_v11 }
 0x92b   : > { %7111 = vmatpush3.bf16.msra.mxu0 %v7108_v11  ;;  %v7125_v11 = vpack.c.bf16 %v4087_v9, %v4086_v21  ;;  %v4144_v21 = vld [vmem:[%s10834_s7 + $0x1d0] sm:$0xff]  ;;  %v4114_v9 = vld [vmem:[%s10834_s7 + $0xe0] sm:$0xff] }
 0x92c   : > { %7113 = vmatprep.subr.bf16.mxu0 %v7112_v36 }
 0x92f   : > { %7115 = vmatpush3.bf16.msra.mxu0 %v7112_v36  ;;  %v4089_v36 = vld [vmem:[%s10834_s7 + $0x18] sm:$0xff] }
 0x930   : > { %7117 = vmatprep.subr.bf16.mxu0 %v7116_v55 }
 0x933   : > { %7119 = vmatpush3.bf16.msra.mxu0 %v7116_v55  ;;  %v4106_v55 = vld [vmem:[%s10834_s7 + $0xa0] sm:$0xff] }
 0x936   : > { %6582 = vmatmul.mubr.f32.vlgmr.msra.gmra.mrb[108].mxu0 %v3336_v24  ;;  %v4107_v24 = vld [vmem:[%s10834_s7 + $0xa8] sm:$0xff] }
 0x9c8   : > { %v6000_v45 = vpop.f32.mrb[84].mxu1  ;;  %v5962_v18 = vpop.f32.mrb[100].mxu0 }
 0x9c9   : > { %v6001_v12 = vpop.f32.mrb[85].mxu1  ;;  %v5963_v26 = vpop.f32.mrb[101].mxu0 }
 0x9ca   : > { %v6002_v22 = vadd.f32 %v6001_v12, %v6000_v45  ;;  %v5964_v32 = vadd.f32 %v5963_v26, %v5962_v18  ;;  %v7129_v45 = vpack.c.bf16 %v4089_v36, %v4088_v13  ;;  %v7155_v18 = vpack.c.bf16 %v4135_v19, %v4134_v15  ;;  %v4118_v12 = vld [vmem:[%s10834_s7 + $0x100] sm:$0xff]  ;;  %v4099_v15 = vld [vmem:[%s10834_s7 + $0x68] sm:$0xff] }
 0x9cb   : > { %v4090_v26 = vld [vmem:[%s10834_s7 + $0x20] sm:$0xff]  ;;  %v7147_v13 = vpack.c.bf16 %v4115_v51, %v4114_v9 }
 0x9cc   : > { %v6003_v33 = vpop.f32.mrb[86].mxu1  ;;  %v3553_v38 = vadd.f32 %v5964_v32, %v5728_v25  ;;  %v5965_v28 = vpop.f32.mrb[102].mxu0  ;;  %7156 = vmatprep.subr.bf16.mxu0 %v7155_v18  ;;  %v4098_v36 = vld [vmem:[%s10834_s7 + $0x60] sm:$0xff]  ;;  %v4128_v18 = vld [vmem:[%s10834_s7 + $0x150] sm:$0xff] }
 0x9cd   : > { %v6004_v39 = vpop.f32.mrb[87].mxu1  ;;  %v5966_v34 = vpop.f32.mrb[103].mxu0  ;;  %v7149_v19 = vpack.c.bf16 %v4099_v15, %v4098_v36 }
 0x9ce   : > { %v6005_v40 = vadd.f32 %v6004_v39, %v6003_v33  ;;  %v3628_v30 = vadd.f32 %v6002_v22, %v3553_v38  ;;  %v5967_v6 = vadd.f32 %v5966_v34, %v5965_v28  ;;  %v7131_v22 = vpack.c.bf16 %v4107_v24, %v4106_v55  ;;  %v4091_v33 = vld [vmem:[%s10834_s7 + $0x28] sm:$0xff]  ;;  %v4136_v38 = vld [vmem:[%s10834_s7 + $0x190] sm:$0xff]  ;;  %v4137_v28 = vld [vmem:[%s10834_s7 + $0x198] sm:$0xff] }
 0x9cf   : > { %v7159_v39 = vpack.c.bf16 %v4137_v28, %v4136_v38  ;;  %v4108_v34 = vld [vmem:[%s10834_s7 + $0xb0] sm:$0xff]  ;;  %v4146_v28 = vld [vmem:[%s10834_s7 + $0x1e0] sm:$0xff] }
 0x9d0   : > { %v3558_v41 = vadd.f32 %v5967_v6, %v5728_v25  ;;  %v4119_v25 = vld [vmem:[%s10834_s7 + $0x108] sm:$0xff]  ;;  %v4121_v6 = vld [vmem:[%s10834_s7 + $0x118] sm:$0xff]  ;;  %v4116_v24 = vld [vmem:[%s10834_s7 + $0xf0] sm:$0xff] }
 0x9d1   : > { %v7157_v32 = vpack.c.bf16 %v4119_v25, %v4118_v12 }
 0x9d2   : > { %v3633_v14 = vadd.f32 %v6005_v40, %v3558_v41  ;;  %v4109_v40 = vld [vmem:[%s10834_s7 + $0xb8] sm:$0xff]  ;;  %v7133_v41 = vpack.c.bf16 %v4091_v33, %v4090_v26 }
 0x9d3   : > { %7158 = vmatpush3.bf16.msra.mxu0 %v7157_v32  ;;  %v4129_v26 = vld [vmem:[%s10834_s7 + $0x158] sm:$0xff] }
 0x9d4   : > { %7160 = vmatprep.subr.bf16.mxu0 %v7159_v39  ;;  %v4101_v32 = vld [vmem:[%s10834_s7 + $0x78] sm:$0xff]  ;;  %v7177_v33 = vpack.c.bf16 %v4129_v26, %v4128_v18  ;;  %v4147_v39 = vld [vmem:[%s10834_s7 + $0x1e8] sm:$0xff] }
 0x9e8   : > { %v6076_v42 = vpop.f32.mrb[88].mxu1  ;;  %v6038_v62 = vpop.f32.mrb[104].mxu0 }
 0x9e9   : > { %v6077_v44 = vpop.f32.mrb[89].mxu1  ;;  %v6039_v20 = vpop.f32.mrb[105].mxu0 }
 0x9ea   : > { %v6078_v27 = vadd.f32 %v6077_v44, %v6076_v42  ;;  %v6040_v57 = vadd.f32 %v6039_v20, %v6038_v62  ;;  %v4092_v42 = vld [vmem:[%s10834_s7 + $0x30] sm:$0xff]  ;;  %v4138_v62 = vld [vmem:[%s10834_s7 + $0x1a0] sm:$0xff]  ;;  %v4139_v44 = vld [vmem:[%s10834_s7 + $0x1a8] sm:$0xff]  ;;  %v7135_v20 = vpack.c.bf16 %v4109_v40, %v4108_v34  ;;  %v7179_v40 = vpack.c.bf16 %v4147_v39, %v4146_v28 }
 0x9eb   : > { %v4155_v28 = vld [vmem:[%s10834_s7 + $0x228] sm:$0xff]  ;;  %v4443_v39 = vld [vmem:[%s10833_s6] sm:$0xff] }
 0x9ec   : > { %v6079_v47 = vpop.f32.mrb[90].mxu1  ;;  %v3703_v7 = vadd.f32 %v6040_v57, %v3628_v30  ;;  %v6041_v37 = vpop.f32.mrb[106].mxu0  ;;  %v4120_v30 = vld [vmem:[%s10834_s7 + $0x110] sm:$0xff]  ;;  %v7163_v57 = vpack.c.bf16 %v4139_v44, %v4138_v62  ;;  %v4149_v62 = vld [vmem:[%s10834_s7 + $0x1f8] sm:$0xff] }
 0x9ed   : > { %v6080_v0 = vpop.f32.mrb[91].mxu1  ;;  %v6042_v48 = vpop.f32.mrb[107].mxu0 }
 0x9ee   : > { %v6081_v35 = vadd.f32 %v6080_v0, %v6079_v47  ;;  %v6043_v49 = vadd.f32 %v6042_v48, %v6041_v37  ;;  %v3778_v50 = vadd.f32 %v6078_v27, %v3703_v7  ;;  %v4093_v27 = vld [vmem:[%s10834_s7 + $0x38] sm:$0xff]  ;;  %v4122_v47 = vld [vmem:[%s10834_s7 + $0x120] sm:$0xff]  ;;  %v4123_v7 = vld [vmem:[%s10834_s7 + $0x128] sm:$0xff] }
 0x9ef   : > { %v4110_v37 = vld [vmem:[%s10834_s7 + $0xc0] sm:$0xff]  ;;  %v4111_v0 = vld [vmem:[%s10834_s7 + $0xc8] sm:$0xff]  ;;  %v4140_v48 = vld [vmem:[%s10834_s7 + $0x1b0] sm:$0xff] }
 0x9f0   : > { %v3708_v52 = vadd.f32 %v6043_v49, %v3633_v14  ;;  %v7161_v14 = vpack.c.bf16 %v4121_v6, %v4120_v30  ;;  %v4141_v49 = vld [vmem:[%s10834_s7 + $0x1b8] sm:$0xff]  ;;  %v4130_v30 = vld [vmem:[%s10834_s7 + $0x160] sm:$0xff]  ;;  %v4131_v6 = vld [vmem:[%s10834_s7 + $0x168] sm:$0xff] }
 0x9f2   : > { %v3783_v17 = vadd.f32 %v6081_v35, %v3708_v52  ;;  %7162 = vmatpush3.bf16.msra.mxu0 %v7161_v14  ;;  %v7165_v35 = vpack.c.bf16 %v4123_v7, %v4122_v47  ;;  %v4094_v52 = vld [vmem:[%s10834_s7 + $0x40] sm:$0xff]  ;;  %v7181_v14 = vpack.c.bf16 %v4131_v6, %v4130_v30  ;;  %v4461_v6 = vld [vmem:[%s10833_s6 + $0x90] sm:$0xff] }
 0x9f3   : > { %7164 = vmatprep.subr.bf16.mxu0 %v7163_v57  ;;  %v4133_v57 = vld [vmem:[%s10834_s7 + $0x178] sm:$0xff] }
 0x9f6   : > { %7166 = vmatpush3.bf16.msra.mxu0 %v7165_v35 }
 0xa09   : > { %v6583_v1 = vpop.f32.mrb[108].mxu0 }
 0xa0a   : > { %v3858_v54 = vadd.f32 %v6583_v1, %v3783_v17  ;;  %v3852_v56 = vpop.f32.mrb[109].mxu0  ;;  %v7167_v17 = vpack.c.bf16 %v4141_v49, %v4140_v48  ;;  %v4124_v1 = vld [vmem:[%s10834_s7 + $0x130] sm:$0xff]  ;;  %v4459_v48 = vld [vmem:[%s10833_s6 + $0x80] sm:$0xff]  ;;  %v4460_v49 = vld [vmem:[%s10833_s6 + $0x88] sm:$0xff] }
 0xa0b   : > { %v3853_v58 = vadd.f32 %v3852_v56, %v3778_v50  ;;  %v7137_v50 = vpack.c.bf16 %v4093_v27, %v4092_v42  ;;  %v7139_v56 = vpack.c.bf16 %v4111_v0, %v4110_v37  ;;  %v4148_v42 = vld [vmem:[%s10834_s7 + $0x1f0] sm:$0xff]  ;;  %v4150_v37 = vld [vmem:[%s10834_s7 + $0x200] sm:$0xff]  ;;  %v4151_v0 = vld [vmem:[%s10834_s7 + $0x208] sm:$0xff] }
 0xa0c   : > { %v3862_v60 = vmax.f32 %v3858_v54, 0.0  ;;  %v4125_v54 = vld [vmem:[%s10834_s7 + $0x138] sm:$0xff]  ;;  %7168 = vmatprep.subr.bf16.mxu0 %v7167_v17  ;;  %v7183_v44 = vpack.c.bf16 %v4149_v62, %v4148_v42  ;;  %v4132_v27 = vld [vmem:[%s10834_s7 + $0x170] sm:$0xff]  ;;  %v7187_v35 = vpack.c.bf16 %v4151_v0, %v4150_v37 }
 0xa0d   : > { %v3861_v61 = vmax.f32 %v3853_v58, 0.0  ;;  %v4095_v58 = vld [vmem:[%s10834_s7 + $0x48] sm:$0xff]  ;;  %v7185_v7 = vpack.c.bf16 %v4133_v57, %v4132_v27  ;;  %v4156_v62 = vld [vmem:[%s10834_s7 + $0x230] sm:$0xff]  ;;  %v4446_v37 = vld [vmem:[%s10833_s6 + $0x18] sm:$0xff] }
 0xa0f   : > { %v7121_v2 = vpack.c.bf16 %v3862_v60, %v3861_v61  ;;  %v4142_v60 = vld [vmem:[%s10834_s7 + $0x1c0] sm:$0xff]  ;;  %v4143_v61 = vld [vmem:[%s10834_s7 + $0x1c8] sm:$0xff] }
 0xa11   : > { %7122 = vmatpush3.bf16.msra.mxu1 %v7121_v2  ;;  %v4112_v2 = vld [vmem:[%s10834_s7 + $0xd0] sm:$0xff] }
 0xa12   : > { %7124 = vmatprep.subr.bf16.mxu1 %v7123_v53  ;;  %v4145_v53 = vld [vmem:[%s10834_s7 + $0x1d8] sm:$0xff] }
 0xa14   : > { %6589 = vmatmul.mubr.msk.f32.vlgmr.msra.gmra.mrb[92].mxu1 %vm582_vm0, %v3863_v4  ;;  %v4113_v4 = vld [vmem:[%s10834_s7 + $0xd8] sm:$0xff] }
 0xa15   : > { %6591 = vmatprep.mubr.msk.f32.mxu1 %vm7889_vm11, %v7890_v59  ;;  %7126 = vmatpush3.bf16.msra.mxu1 %v7125_v11  ;;  %v7143_v43 = vpack.c.bf16 %v4113_v4, %v4112_v2 }
 0xa16   : > { %7128 = vmatprep.subr.bf16.mxu1 %v7127_v23  ;;  %v7175_v23 = vpack.c.bf16 %v4145_v53, %v4144_v21 }
 0xa18   : > { %6592 = vmatmul.mubr.msk.f32.gmra.mrb[94].mxu1 %vm582_vm0, %v3864_v8  ;;  %v7169_v8 = vpack.c.bf16 %v4125_v54, %v4124_v1  ;;  %v7203_v1 = vpack.c.bf16 %v4460_v49, %v4459_v48  ;;  %v4464_v49 = vld [vmem:[%s10833_s6 + $0xa8] sm:$0xff] }
 0xa19   : > { %6594 = vmatprep.mubr.msk.f32.mxu1 %vm7889_vm11, %v7890_v59  ;;  %7130 = vmatpush3.bf16.msra.mxu1 %v7129_v45  ;;  %v4117_v45 = vld [vmem:[%s10834_s7 + $0xf8] sm:$0xff] }
 0xa1a   : > { %7132 = vmatprep.subr.bf16.mxu1 %v7131_v22  ;;  %7170 = vmatpush3.bf16.msra.mxu0 %v7169_v8  ;;  %v7151_v25 = vpack.c.bf16 %v4117_v45, %v4116_v24  ;;  %v4100_v22 = vld [vmem:[%s10834_s7 + $0x70] sm:$0xff]  ;;  %v4153_v45 = vld [vmem:[%s10834_s7 + $0x218] sm:$0xff] }
 0xa1b   : > { %v7153_v38 = vpack.c.bf16 %v4101_v32, %v4100_v22  ;;  %v4152_v24 = vld [vmem:[%s10834_s7 + $0x210] sm:$0xff] }
 0xa1c   : > { %6595 = vmatmul.mubr.msk.f32.gmra.mrb[96].mxu1 %vm582_vm0, %v3865_v29  ;;  %v7141_v29 = vpack.c.bf16 %v4095_v58, %v4094_v52 }
 0xa1d   : > { %6597 = vmatprep.mubr.msk.f32.mxu1 %vm7889_vm11, %v7890_v59  ;;  %7134 = vmatpush3.bf16.msra.mxu1 %v7133_v41 }
 0xa1e   : > { %7136 = vmatprep.subr.bf16.mxu1 %v7135_v20 }
 0xa20   : > { %6598 = vmatmul.mubr.msk.f32.gmra.mrb[98].mxu1 %vm582_vm0, %v3866_v5  ;;  %v4096_v5 = vld [vmem:[%s10834_s7 + $0x50] sm:$0xff] }
 0xa21   : > { %6600 = vmatprep.mubr.msk.f32.mxu1 %vm7889_vm11, %v7890_v59  ;;  %7138 = vmatpush3.bf16.msra.mxu1 %v7137_v50  ;;  %v7145_v11 = vpack.c.bf16 %v4097_v46, %v4096_v5 }
 0xa22   : > { %7140 = vmatprep.subr.bf16.mxu1 %v7139_v56 }
 0xa24   : > { %6601 = vmatmul.mubr.msk.f32.gmra.mrb[100].mxu1 %vm582_vm0, %v3867_v63  ;;  %v7171_v63 = vpack.c.bf16 %v4143_v61, %v4142_v60 }
 0xa25   : > { %6603 = vmatprep.mubr.msk.f32.mxu1 %vm7889_vm11, %v7890_v59  ;;  %7142 = vmatpush3.bf16.msra.mxu1 %v7141_v29 }
 0xa26   : > { %7172 = vmatprep.subr.bf16.mxu0 %v7171_v63  ;;  %7144 = vmatprep.subr.bf16.mxu1 %v7143_v43 }
 0xa28   : > { %6604 = vmatmul.mubr.msk.f32.gmra.mrb[102].mxu1 %vm582_vm0, %v3868_v31  ;;  %v4126_v31 = vld [vmem:[%s10834_s7 + $0x140] sm:$0xff] }
 0xa29   : > { %6606 = vmatprep.mubr.msk.f32.mxu1 %vm7889_vm11, %v7890_v59  ;;  %7146 = vmatpush3.bf16.msra.mxu1 %v7145_v11 }
 0xa2a   : > { %7148 = vmatprep.subr.bf16.mxu1 %v7147_v13 }
 0xa2c   : > { %6607 = vmatmul.mubr.msk.f32.gmra.mrb[104].mxu1 %vm582_vm0, %v3869_v16  ;;  %v4127_v16 = vld [vmem:[%s10834_s7 + $0x148] sm:$0xff] }
 0xa2d   : > { %v7173_v10 = vpack.c.bf16 %v4127_v16, %v4126_v31  ;;  %7150 = vmatpush3.bf16.msra.mxu1 %v7149_v19 }
 0xa2e   : > { %7152 = vmatprep.subr.bf16.mxu1 %v7151_v25 }
 0xa2f   : > { %7174 = vmatpush3.bf16.msra.mxu0 %v7173_v10 }
 0xa30   : > { %7176 = vmatprep.subr.bf16.mxu0 %v7175_v23 }
 0xa31   : > { %7154 = vmatpush3.bf16.msra.mxu1 %v7153_v38  ;;  %v4154_v38 = vld [vmem:[%s10834_s7 + $0x220] sm:$0xff] }
 0xa32   : > { %7188 = vmatprep.subr.bf16.mxu1 %v7187_v35 }
 0xa33   : > { %7178 = vmatpush3.bf16.msra.mxu0 %v7177_v33  ;;  %v7191_v33 = vpack.c.bf16 %v4153_v45, %v4152_v24 }
 0xa34   : > { %7180 = vmatprep.subr.bf16.mxu0 %v7179_v40  ;;  %v7195_v40 = vpack.c.bf16 %v4155_v28, %v4154_v38 }
 0xa37   : > { %7182 = vmatpush3.bf16.msra.mxu0 %v7181_v14 }
 0xa38   : > { %7184 = vmatprep.subr.bf16.mxu0 %v7183_v44  ;;  %v4157_v44 = vld [vmem:[%s10834_s7 + $0x238] sm:$0xff] }
 0xa3b   : > { %7186 = vmatpush3.bf16.msra.mxu0 %v7185_v7  ;;  %v4445_v7 = vld [vmem:[%s10833_s6 + $0x10] sm:$0xff] }
 0xa3c   : > { %7204 = vmatprep.subr.bf16.mxu0 %v7203_v1 }
 0xae7   : > { %v3957_v55 = vpop.f32.mrb[92].mxu1 }
 0xae8   : > { %3991 = vst.msk [vmem:[#allocation6] sm:$0xff] %vm1918_vm7, %v3957_v55  ;;  %v6590_v12 = vpop.f32.mrb[93].mxu1 }
 0xaeb   : > { %v3962_v34 = vpop.f32.mrb[94].mxu1 }
 0xaec   : > { %3992 = vst.msk [vmem:[#allocation6 + $0x8] sm:$0xff] %vm1918_vm7, %v3962_v34  ;;  %v6593_v41 = vpop.f32.mrb[95].mxu1  ;;  %v4444_v34 = vld [vmem:[%s10833_s6 + $0x8] sm:$0xff] }
 0xaed   : > { %v4462_v41 = vld [vmem:[%s10833_s6 + $0x98] sm:$0xff] }
 0xaef   : > { %v3967_v20 = vpop.f32.mrb[96].mxu1  ;;  %v3998_v26 = vld [vmem:[#allocation6] sm:$0xff] }
 0xaf0   : > { %3993 = vst.msk [vmem:[#allocation6 + $0x10] sm:$0xff] %vm1918_vm7, %v3967_v20  ;;  %v6596_v47 = vpop.f32.mrb[97].mxu1  ;;  %v7205_v20 = vpack.c.bf16 %v4444_v34, %v4443_v39  ;;  %v4451_v39 = vld [vmem:[%s10833_s6 + $0x40] sm:$0xff] }
 0xaf1   : > { %v7207_v47 = vpack.c.bf16 %v4462_v41, %v4461_v6  ;;  %v4452_v41 = vld [vmem:[%s10833_s6 + $0x48] sm:$0xff] }
 0xaf3   : > { %v3972_v50 = vpop.f32.mrb[98].mxu1  ;;  %v10025_v52 = vld [vmem:[#allocation6 + $0x8] sm:$0xff] }
 0xaf4   : > { %v4002_v17 = vld [vmem:[#allocation6 + $0x1] sm:$0xff]  ;;  %3994 = vst.msk [vmem:[#allocation6 + $0x18] sm:$0xff] %vm1918_vm7, %v3972_v50  ;;  %v6599_v56 = vpop.f32.mrb[99].mxu1  ;;  %v7199_v50 = vpack.c.bf16 %v4157_v44, %v4156_v62 }
 0xaf5   : > { %v7782_v54 = vpack.i.bf16 %v4002_v17, %v10025_v52  ;;  %v4006_v25 = vld [vmem:[#allocation6 + $0x2] sm:$0xff] }
 0xaf6   : > { %v4470_v62 = vld [vmem:[%s10833_s6 + $0xd8] sm:$0xff]  ;;  %v4493_v44 = vld [vmem:[%s10833_s6 + $0x190] sm:$0xff] }
 0xaf7   : > { %7783 = vrot.lane.b32.xlu0 %v7782_v54, %s10854_s23  ;;  %v3977_v58 = vpop.f32.mrb[100].mxu1  ;;  %v10033_v4 = vld [vmem:[#allocation6 + $0xa] sm:$0xff] }
 0xaf8   : > { %3995 = vst.msk [vmem:[#allocation6 + $0x20] sm:$0xff] %vm1918_vm7, %v3977_v58  ;;  %v6602_v60 = vpop.f32.mrb[101].mxu1  ;;  %v4000_v5 = vld [vmem:[#allocation6 + $0x10] sm:$0xff]  ;;  %v7209_v58 = vpack.c.bf16 %v4446_v37, %v4445_v7 }
 0xaf9   : > { %v4003_v63 = vld [vmem:[#allocation6 + $0x9] sm:$0xff] }
 0xafa   : > { %v7787_v46 = vpack.i.bf16 %v4003_v63, %v4000_v5  ;;  %v4447_v60 = vld [vmem:[%s10833_s6 + $0x20] sm:$0xff] }
 0xafb   : > { %v3982_v61 = vpop.f32.mrb[102].mxu1  ;;  %v10031_v2 = vld [vmem:[#allocation6 + $0x11] sm:$0xff] }
 0xafc   : > { %3996 = vst.msk [vmem:[#allocation6 + $0x28] sm:$0xff] %vm1918_vm7, %v3982_v61  ;;  %v7777_v8 = vpack.i.bf16 %v10033_v4, %v10031_v2  ;;  %v6605_v29 = vpop.f32.mrb[103].mxu1  ;;  %v10039_v16 = vld [vmem:[#allocation6 + $0x18] sm:$0xff] }
 0xafd   : > { %v10050_v51 = vld [vmem:[#allocation6 + $0x12] sm:$0xff] }
 0xafe   : > { %7778 = vrot.lane.b32.xlu1 %v7777_v8, %s10854_s23 }
 0xaff   : > { %v3987_v31 = vpop.f32.mrb[104].mxu1  ;;  %v10041_v43 = vld [vmem:[#allocation6 + $0x19] sm:$0xff] }
 0xb00   : > { %3997 = vst.msk [vmem:[#allocation6 + $0x30] sm:$0xff] %vm1918_vm7, %v3987_v31  ;;  %v7792_v21 = vpack.i.bf16 %v10041_v43, %v10039_v16  ;;  %v6608_v53 = vpop.f32.mrb[105].mxu1  ;;  %v10046_v9 = vld [vmem:[#allocation6 + $0x20] sm:$0xff] }
 0xb01   : > { %v10052_v10 = vld [vmem:[#allocation6 + $0x1a] sm:$0xff]  ;;  %v7797_v23 = vpack.i.bf16 %v10050_v51, %v10046_v9 }
 0xb02   : > { %7788 = vrot.lane.b32.xlu1 %v7787_v46, %s10854_s23  ;;  %7793 = vrot.lane.b32.xlu0 %v7792_v21, %s10854_s23  ;;  %v4465_v31 = vld [vmem:[%s10833_s6 + $0xb0] sm:$0xff]  ;;  %v4492_v21 = vld [vmem:[%s10833_s6 + $0x188] sm:$0xff] }
 0xb03   : > { %v10054_v11 = vld [vmem:[#allocation6 + $0x21] sm:$0xff] }
 0xb04   : > { %v7802_v13 = vpack.i.bf16 %v10052_v10, %v10054_v11  ;;  %v10060_v36 = vld [vmem:[#allocation6 + $0x22] sm:$0xff] }
 0xb05   : > { %v4013_v38 = vld [vmem:[#allocation6 + $0x28] sm:$0xff] }
 0xb06   : > { %7798 = vrot.lane.b32.xlu1 %v7797_v23, %s10854_s23  ;;  %7803 = vrot.lane.b32.xlu0 %v7802_v13, %s10854_s23 }
 0xb07   : > { %v4014_v15 = vld [vmem:[#allocation6 + $0x29] sm:$0xff] }
 0xb08   : > { %v7807_v19 = vpack.i.bf16 %v10060_v36, %v4014_v15 }
 0xb0a   : > { %7808 = vrot.lane.b32.xlu1 %v7807_v19, %s10854_s23 }
 0xb69   : > { %v7784_v55 = vpop.permute.xlu0 %7783 }
 0xb6a   : > { %v7786_v18 = vunpack.i.h.bf16 %v7784_v55  ;;  %v7785_v12 = vunpack.i.l.bf16 %v7784_v55 }
 0xb6c   : > { %v4076_v22 = vsel %vm1918_vm7, %v4006_v25, %v7785_v12  ;;  %v4072_v32 = vsel %vm1918_vm7, %v3998_v26, %v7786_v18  ;;  %v4449_v12 = vld [vmem:[%s10833_s6 + $0x30] sm:$0xff]  ;;  %v4450_v25 = vld [vmem:[%s10833_s6 + $0x38] sm:$0xff] }
 0xb6d   : > { %4236 = vmatprep.mubr.f32.mxu1 %v4076_v22  ;;  %v7217_v28 = vpack.c.bf16 %v4450_v25, %v4449_v12 }
 0xb6e   : > { %4237 = vmatmul.mubr.f32.vlgmr.msra.gmra.mrb[106].mxu1 %v4072_v32 }
 0xb6f   : > { %7190 = vmatpush3.bf16.msra.mxu1 %v7187_v35  ;;  %v4463_v35 = vld [vmem:[%s10833_s6 + $0xa0] sm:$0xff] }
 0xb70   : > { %7192 = vmatprep.subr.bf16.mxu1 %v7191_v33  ;;  %v7779_v30 = vpop.permute.xlu1 %7778 }
 0xb71   : > { %v7781_v14 = vunpack.i.h.bf16 %v7779_v30  ;;  %v7780_v42 = vunpack.i.l.bf16 %v7779_v30 }
 0xb73   : > { %7194 = vmatpush3.bf16.msra.mxu1 %v7191_v33  ;;  %v4074_v27 = vsel %vm1918_vm7, %v4000_v5, %v7780_v42  ;;  %v4080_v57 = vsel %vm1918_vm7, %v4003_v63, %v7781_v14  ;;  %v7211_v5 = vpack.c.bf16 %v4464_v49, %v4463_v35  ;;  %v4448_v63 = vld [vmem:[%s10833_s6 + $0x28] sm:$0xff]  ;;  %v4475_v14 = vld [vmem:[%s10833_s6 + $0x100] sm:$0xff] }
 0xb74   : > { %7196 = vmatprep.subr.bf16.mxu1 %v7195_v40  ;;  %v7789_v0 = vpop.permute.xlu1 %7788  ;;  %4321 = vmatprep.mubr.f32.mxu0 %v4074_v27  ;;  %v7794_v48 = vpop.permute.xlu0 %7793  ;;  %v7213_v19 = vpack.c.bf16 %v4448_v63, %v4447_v60  ;;  %v4476_v42 = vld [vmem:[%s10833_s6 + $0x108] sm:$0xff]  ;;  %v4455_v60 = vld [vmem:[%s10833_s6 + $0x60] sm:$0xff] }
 0xb75   : > { %v7791_v17 = vunpack.i.h.bf16 %v7789_v0  ;;  %v7790_v1 = vunpack.i.l.bf16 %v7789_v0  ;;  %v7796_v54 = vunpack.i.h.bf16 %v7794_v48  ;;  %v7795_v56 = vunpack.i.l.bf16 %v7794_v48  ;;  %4322 = vmatmul.mubr.f32.vlgmr.msra.gmra.mrb[110].mxu0 %v4080_v57  ;;  %v4454_v0 = vld [vmem:[%s10833_s6 + $0x58] sm:$0xff]  ;;  %v4477_v48 = vld [vmem:[%s10833_s6 + $0x110] sm:$0xff] }
 0xb76   : > { %7206 = vmatpush3.bf16.msra.mxu0 %v7205_v20  ;;  %v4494_v20 = vld [vmem:[%s10833_s6 + $0x198] sm:$0xff]  ;;  %v7237_v57 = vpack.c.bf16 %v4476_v42, %v4475_v14  ;;  %v4433_v35 = vld [vmem:[#allocation5 + $0x1] sm:$0xff] }
 0xb77   : > { %7198 = vmatpush3.bf16.msra.mxu1 %v7195_v40  ;;  %v4077_v61 = vsel %vm1918_vm7, %v10033_v4, %v7790_v1  ;;  %7208 = vmatprep.subr.bf16.mxu0 %v7207_v47  ;;  %v4075_v8 = vsel %vm1918_vm7, %v10039_v16, %v7796_v54  ;;  %v4073_v29 = vsel %vm1918_vm7, %v10025_v52, %v7791_v17  ;;  %v4466_v4 = vld [vmem:[%s10833_s6 + $0xb8] sm:$0xff]  ;;  %v4491_v52 = vld [vmem:[%s10833_s6 + $0x180] sm:$0xff]  ;;  %v4453_v47 = vld [vmem:[%s10833_s6 + $0x50] sm:$0xff] }
 0xb78   : > { %4241 = vmatprep.mubr.f32.mxu1 %v4077_v61  ;;  %v7799_v46 = vpop.permute.xlu1 %7798  ;;  %4326 = vmatprep.mubr.f32.mxu0 %v4075_v8  ;;  %v7804_v16 = vpop.permute.xlu0 %7803  ;;  %v4078_v15 = vsel %vm1918_vm7, %v10050_v51, %v7795_v56  ;;  %v7215_v55 = vpack.c.bf16 %v4466_v4, %v4465_v31  ;;  %v7235_v26 = vpack.c.bf16 %v4492_v21, %v4491_v52  ;;  %v4495_v17 = vld [vmem:[%s10833_s6 + $0x1a0] sm:$0xff]  ;;  %v4496_v1 = vld [vmem:[%s10833_s6 + $0x1a8] sm:$0xff]  ;;  %v4497_v31 = vld [vmem:[%s10833_s6 + $0x1b0] sm:$0xff] }
 0xb79   : > { %v7801_v53 = vunpack.i.h.bf16 %v7799_v46  ;;  %v7800_v23 = vunpack.i.l.bf16 %v7799_v46  ;;  %v7805_v13 = vunpack.i.l.bf16 %v7804_v16  ;;  %4242 = vmatmul.mubr.f32.gmra.mrb[108].mxu1 %v4073_v29  ;;  %7200 = vmatprep.subr.bf16.mxu1 %v7199_v50  ;;  %v7806_v24 = vunpack.i.h.bf16 %v7804_v16  ;;  %v4015_v54 = vld [vmem:[#allocation6 + $0x2a] sm:$0xff]  ;;  %v4480_v29 = vld [vmem:[%s10833_s6 + $0x128] sm:$0xff]  ;;  %v10240_v46 = vld [vmem:[#allocation5 + $0x8] sm:$0xff] }
 0xb7a   : > { %7210 = vmatpush3.bf16.msra.mxu0 %v7209_v58  ;;  %4246 = vmatprep.mubr.f32.mxu1 %v4078_v15  ;;  %v7239_v49 = vpack.c.bf16 %v4494_v20, %v4493_v44  ;;  %v7225_v56 = vpack.c.bf16 %v4454_v0, %v4453_v47  ;;  %v7243_v63 = vpack.c.bf16 %v4496_v1, %v4495_v17  ;;  %v4498_v4 = vld [vmem:[%s10833_s6 + $0x1b8] sm:$0xff]  ;;  %v4457_v21 = vld [vmem:[%s10833_s6 + $0x70] sm:$0xff]  ;;  %v4503_v20 = vld [vmem:[%s10833_s6 + $0x1e0] sm:$0xff] }
 0xb7b   : > { %v4081_v45 = vsel %vm1918_vm7, %v10031_v2, %v7801_v53  ;;  %7212 = vmatprep.subr.bf16.mxu0 %v7211_v5  ;;  %v4084_v18 = vsel %vm1918_vm7, %v10046_v9, %v7805_v13  ;;  %7202 = vmatpush3.bf16.msra.mxu1 %v7199_v50  ;;  %v4467_v2 = vld [vmem:[%s10833_s6 + $0xc0] sm:$0xff]  ;;  %v4468_v9 = vld [vmem:[%s10833_s6 + $0xc8] sm:$0xff]  ;;  %v4079_v33 = vsel %vm1918_vm7, %v10052_v10, %v7800_v23  ;;  %v4473_v5 = vld [vmem:[%s10833_s6 + $0xf0] sm:$0xff] }
 0xb7c   : > { %4327 = vmatmul.mubr.f32.gmra.mrb[112].mxu0 %v4081_v45  ;;  %v7809_v22 = vpop.permute.xlu1 %7808  ;;  %v4082_v40 = vsel %vm1918_vm7, %v10041_v43, %v7806_v24  ;;  %v7219_v6 = vpack.c.bf16 %v4468_v9, %v4467_v2  ;;  %7236 = vmatprep.subr.bf16.mxu1 %v7235_v26  ;;  %v4469_v43 = vld [vmem:[%s10833_s6 + $0xd0] sm:$0xff]  ;;  %v4472_v50 = vld [vmem:[%s10833_s6 + $0xe8] sm:$0xff]  ;;  %v4458_v53 = vld [vmem:[%s10833_s6 + $0x78] sm:$0xff]  ;;  %v7247_v13 = vpack.c.bf16 %v4498_v4, %v4497_v31 }
 0xb7d   : > { %v7810_v32 = vunpack.i.l.bf16 %v7809_v22  ;;  %4247 = vmatmul.mubr.f32.gmra.mrb[110].mxu1 %v4074_v27  ;;  %4331 = vmatprep.mubr.f32.mxu0 %v4084_v18  ;;  %v7811_v34 = vunpack.i.h.bf16 %v7809_v22  ;;  %v7221_v27 = vpack.c.bf16 %v4452_v41, %v4451_v39  ;;  %v7223_v37 = vpack.c.bf16 %v4470_v62, %v4469_v43  ;;  %v4481_v15 = vld [vmem:[%s10833_s6 + $0x130] sm:$0xff]  ;;  %v4500_v24 = vld [vmem:[%s10833_s6 + $0x1c8] sm:$0xff]  ;;  %v4523_v45 = vld [vmem:[%s10833_s6 + $0x280] sm:$0xff] }
 0xb7e   : > { %7214 = vmatpush3.bf16.msra.mxu0 %v7213_v19  ;;  %4251 = vmatprep.mubr.f32.mxu1 %v4079_v33  ;;  %v4482_v19 = vld [vmem:[%s10833_s6 + $0x138] sm:$0xff]  ;;  %v4524_v18 = vld [vmem:[%s10833_s6 + $0x288] sm:$0xff]  ;;  %v7233_v12 = vpack.c.bf16 %v4458_v53, %v4457_v21  ;;  %v4483_v2 = vld [vmem:[%s10833_s6 + $0x140] sm:$0xff] }
 0xb7f   : > { %7216 = vmatprep.subr.bf16.mxu0 %v7215_v55  ;;  %v4085_v30 = vsel %vm1918_vm7, %v4013_v38, %v7810_v32  ;;  %v4083_v7 = vsel %vm1918_vm7, %v10054_v11, %v7811_v34  ;;  %v4471_v11 = vld [vmem:[%s10833_s6 + $0xe0] sm:$0xff]  ;;  %v7249_v25 = vpack.c.bf16 %v4482_v19, %v4481_v15  ;;  %v7267_v22 = vpack.c.bf16 %v4524_v18, %v4523_v45  ;;  %v4484_v9 = vld [vmem:[%s10833_s6 + $0x148] sm:$0xff]  ;;  %v4501_v38 = vld [vmem:[%s10833_s6 + $0x1d0] sm:$0xff] }
 0xb80   : > { %4332 = vmatmul.mubr.f32.gmra.mrb[114].mxu0 %v4082_v40  ;;  %v7227_v61 = vpack.c.bf16 %v4472_v50, %v4471_v11  ;;  %v4499_v55 = vld [vmem:[%s10833_s6 + $0x1c0] sm:$0xff]  ;;  %v4508_v33 = vld [vmem:[%s10833_s6 + $0x208] sm:$0xff]  ;;  %v4525_v39 = vld [vmem:[%s10833_s6 + $0x290] sm:$0xff] }
 0xb81   : > { %4252 = vmatmul.mubr.f32.gmra.mrb[112].mxu1 %v4075_v8  ;;  %4336 = vmatprep.mubr.f32.mxu0 %v4085_v30  ;;  %v4479_v8 = vld [vmem:[%s10833_s6 + $0x120] sm:$0xff]  ;;  %v7251_v26 = vpack.c.bf16 %v4500_v24, %v4499_v55  ;;  %v4526_v34 = vld [vmem:[%s10833_s6 + $0x298] sm:$0xff]  ;;  %v4431_v40 = vld [vmem:[#allocation5] sm:$0xff]  ;;  %v7253_v30 = vpack.c.bf16 %v4484_v9, %v4483_v2 }
 0xb82   : > { %7218 = vmatpush3.bf16.msra.mxu0 %v7217_v28  ;;  %6625 = vmatprep.mubr.msk.f32.mxu1 %vm1918_vm7, %v10050_v51  ;;  %v4478_v51 = vld [vmem:[%s10833_s6 + $0x118] sm:$0xff]  ;;  %v7245_v52 = vpack.c.bf16 %v4480_v29, %v4479_v8  ;;  %v4507_v32 = vld [vmem:[%s10833_s6 + $0x200] sm:$0xff]  ;;  %v4485_v14 = vld [vmem:[%s10833_s6 + $0x150] sm:$0xff]  ;;  %v7271_v62 = vpack.c.bf16 %v4526_v34, %v4525_v39 }
 0xb83   : > { %7220 = vmatprep.subr.bf16.mxu0 %v7219_v6  ;;  %v7241_v58 = vpack.c.bf16 %v4478_v51, %v4477_v48  ;;  %v4502_v28 = vld [vmem:[%s10833_s6 + $0x1d8] sm:$0xff]  ;;  %v7269_v6 = vpack.c.bf16 %v4508_v33, %v4507_v32  ;;  %v4509_v43 = vld [vmem:[%s10833_s6 + $0x210] sm:$0xff]  ;;  %v4527_v47 = vld [vmem:[%s10833_s6 + $0x2a0] sm:$0xff] }
 0xb84   : > { %4337 = vmatmul.mubr.f32.gmra.mrb[116].mxu0 %v4083_v7  ;;  %v7255_v41 = vpack.c.bf16 %v4502_v28, %v4501_v38  ;;  %v4486_v42 = vld [vmem:[%s10833_s6 + $0x158] sm:$0xff]  ;;  %v4528_v7 = vld [vmem:[%s10833_s6 + $0x2a8] sm:$0xff]  ;;  %v4487_v51 = vld [vmem:[%s10833_s6 + $0x160] sm:$0xff] }
 0xb85   : > { %6626 = vmatmul.mubr.msk.f32.vlgmr.msra.gmra.mrb[114].mxu1 %vm1918_vm7, %v10052_v10  ;;  %4656 = vmatprep.mubr.f32.mxu0 %v4433_v35  ;;  %v4456_v10 = vld [vmem:[%s10833_s6 + $0x68] sm:$0xff]  ;;  %v4510_v44 = vld [vmem:[%s10833_s6 + $0x218] sm:$0xff]  ;;  %v7275_v11 = vpack.c.bf16 %v4528_v7, %v4527_v47  ;;  %v4505_v17 = vld [vmem:[%s10833_s6 + $0x1f0] sm:$0xff] }
 0xb86   : > { %7222 = vmatpush3.bf16.msra.mxu0 %v7221_v27  ;;  %7238 = vmatpush3.bf16.msra.mxu1 %v7237_v57  ;;  %v7229_v16 = vpack.c.bf16 %v4456_v10, %v4455_v60  ;;  %v4504_v27 = vld [vmem:[%s10833_s6 + $0x1e8] sm:$0xff]  ;;  %v10309_v57 = vld [vmem:[#allocation5 + $0x9] sm:$0xff]  ;;  %v7273_v0 = vpack.c.bf16 %v4510_v44, %v4509_v43  ;;  %v4555_v31 = vld [vmem:[%s10833_s6 + $0x380] sm:$0xff] }
 0xb87   : > { %6628 = vmatprep.mubr.msk.f32.mxu1 %vm1918_vm7, %v10060_v36  ;;  %7224 = vmatprep.subr.bf16.mxu0 %v7223_v37  ;;  %v4474_v36 = vld [vmem:[%s10833_s6 + $0xf8] sm:$0xff]  ;;  %v7257_v37 = vpack.c.bf16 %v4486_v42, %v4485_v14  ;;  %v7259_v48 = vpack.c.bf16 %v4504_v27, %v4503_v20  ;;  %v4488_v35 = vld [vmem:[%s10833_s6 + $0x168] sm:$0xff]  ;;  %v4489_v8 = vld [vmem:[%s10833_s6 + $0x170] sm:$0xff] }
 0xb88   : > { %7240 = vmatprep.subr.bf16.mxu1 %v7239_v49  ;;  %v7231_v23 = vpack.c.bf16 %v4474_v36, %v4473_v5  ;;  %v4511_v49 = vld [vmem:[%s10833_s6 + $0x220] sm:$0xff]  ;;  %v4512_v50 = vld [vmem:[%s10833_s6 + $0x228] sm:$0xff]  ;;  %v4506_v1 = vld [vmem:[%s10833_s6 + $0x1f8] sm:$0xff]  ;;  %v7261_v60 = vpack.c.bf16 %v4488_v35, %v4487_v51 }
 0xb89   : > { %6629 = vmatmul.mubr.msk.f32.gmra.mrb[116].mxu1 %vm1918_vm7, %v4015_v54  ;;  %v10337_v54 = vld [vmem:[#allocation5 + $0xa] sm:$0xff]  ;;  %v7277_v10 = vpack.c.bf16 %v4512_v50, %v4511_v49  ;;  %v4556_v4 = vld [vmem:[%s10833_s6 + $0x388] sm:$0xff]  ;;  %v4559_v39 = vld [vmem:[%s10833_s6 + $0x3a0] sm:$0xff] }
 0xb8a   : > { %7226 = vmatpush3.bf16.msra.mxu0 %v7225_v56  ;;  %7242 = vmatpush3.bf16.msra.mxu1 %v7241_v58  ;;  %v4529_v56 = vld [vmem:[%s10833_s6 + $0x2b0] sm:$0xff]  ;;  %v4530_v58 = vld [vmem:[%s10833_s6 + $0x2b8] sm:$0xff]  ;;  %v7299_v53 = vpack.c.bf16 %v4556_v4, %v4555_v31  ;;  %v4540_v15 = vld [vmem:[%s10833_s6 + $0x308] sm:$0xff] }
 0xb8b   : > { %4731 = vmatprep.mubr.f32.mxu1 %v10240_v46  ;;  %7228 = vmatprep.subr.bf16.mxu0 %v7227_v61  ;;  %v7263_v61 = vpack.c.bf16 %v4506_v1, %v4505_v17  ;;  %v4490_v29 = vld [vmem:[%s10833_s6 + $0x178] sm:$0xff]  ;;  %v4513_v5 = vld [vmem:[%s10833_s6 + $0x230] sm:$0xff]  ;;  %v4516_v55 = vld [vmem:[%s10833_s6 + $0x248] sm:$0xff] }
 0xb8c   : > { %7244 = vmatprep.subr.bf16.mxu1 %v7243_v63  ;;  %v7279_v63 = vpack.c.bf16 %v4530_v58, %v4529_v56  ;;  %v4514_v36 = vld [vmem:[%s10833_s6 + $0x238] sm:$0xff]  ;;  %v4557_v24 = vld [vmem:[%s10833_s6 + $0x390] sm:$0xff]  ;;  %v4560_v34 = vld [vmem:[%s10833_s6 + $0x3a8] sm:$0xff] }
 0xb8d   : > { %v7281_v21 = vpack.c.bf16 %v4514_v36, %v4513_v5  ;;  %v4558_v45 = vld [vmem:[%s10833_s6 + $0x398] sm:$0xff]  ;;  %v4533_v18 = vld [vmem:[%s10833_s6 + $0x2d0] sm:$0xff]  ;;  %v7307_v42 = vpack.c.bf16 %v4560_v34, %v4559_v39  ;;  %v4519_v43 = vld [vmem:[%s10833_s6 + $0x260] sm:$0xff] }
 0xb8e   : > { %7230 = vmatpush3.bf16.msra.mxu0 %v7229_v16  ;;  %7246 = vmatpush3.bf16.msra.mxu1 %v7245_v52  ;;  %v4532_v16 = vld [vmem:[%s10833_s6 + $0x2c8] sm:$0xff]  ;;  %v7265_v52 = vpack.c.bf16 %v4490_v29, %v4489_v8  ;;  %v7303_v2 = vpack.c.bf16 %v4558_v45, %v4557_v24  ;;  %v4517_v9 = vld [vmem:[%s10833_s6 + $0x250] sm:$0xff]  ;;  %v4542_v33 = vld [vmem:[%s10833_s6 + $0x318] sm:$0xff] }
 0xb8f   : > { %7232 = vmatprep.subr.bf16.mxu0 %v7231_v23  ;;  %7248 = vmatprep.subr.bf16.mxu1 %v7247_v13  ;;  %v4515_v23 = vld [vmem:[%s10833_s6 + $0x240] sm:$0xff]  ;;  %v4541_v32 = vld [vmem:[%s10833_s6 + $0x310] sm:$0xff]  ;;  %v4518_v28 = vld [vmem:[%s10833_s6 + $0x258] sm:$0xff] }
 0xb90   : > { %v4539_v13 = vld [vmem:[%s10833_s6 + $0x300] sm:$0xff]  ;;  %v7289_v14 = vpack.c.bf16 %v4518_v28, %v4517_v9  ;;  %v4544_v44 = vld [vmem:[%s10833_s6 + $0x328] sm:$0xff]  ;;  %v4561_v47 = vld [vmem:[%s10833_s6 + $0x3b0] sm:$0xff] }
 0xb91   : > { %v4520_v27 = vld [vmem:[%s10833_s6 + $0x268] sm:$0xff]  ;;  %v4562_v7 = vld [vmem:[%s10833_s6 + $0x3b8] sm:$0xff]  ;;  %v4545_v50 = vld [vmem:[%s10833_s6 + $0x330] sm:$0xff] }
 0xb92   : > { %7234 = vmatpush3.bf16.msra.mxu0 %v7233_v12  ;;  %7250 = vmatpush3.bf16.msra.mxu1 %v7249_v25  ;;  %v4534_v12 = vld [vmem:[%s10833_s6 + $0x2d8] sm:$0xff]  ;;  %v4435_v25 = vld [vmem:[#allocation5 + $0x2] sm:$0xff]  ;;  %v7293_v35 = vpack.c.bf16 %v4520_v27, %v4519_v43  ;;  %v7311_v49 = vpack.c.bf16 %v4562_v7, %v4561_v47  ;;  %v4563_v56 = vld [vmem:[%s10833_s6 + $0x3c0] sm:$0xff] }
 0xb93   : > { %7252 = vmatprep.subr.bf16.mxu1 %v7251_v26  ;;  %7268 = vmatprep.subr.bf16.mxu0 %v7267_v22  ;;  %v7301_v26 = vpack.c.bf16 %v4540_v15, %v4539_v13  ;;  %v7285_v22 = vpack.c.bf16 %v4516_v55, %v4515_v23  ;;  %v7287_v38 = vpack.c.bf16 %v4534_v12, %v4533_v18  ;;  %v4546_v17 = vld [vmem:[%s10833_s6 + $0x338] sm:$0xff]  ;;  %v4564_v58 = vld [vmem:[%s10833_s6 + $0x3c8] sm:$0xff]  ;;  %v4547_v5 = vld [vmem:[%s10833_s6 + $0x340] sm:$0xff] }
 0xb94   : > { %v7315_v29 = vpack.c.bf16 %v4564_v58, %v4563_v56  ;;  %v4565_v31 = vld [vmem:[%s10833_s6 + $0x3d0] sm:$0xff]  ;;  %v4566_v4 = vld [vmem:[%s10833_s6 + $0x3d8] sm:$0xff]  ;;  %v4567_v15 = vld [vmem:[%s10833_s6 + $0x3e0] sm:$0xff] }
 0xb95   : > { %4657 = vmatmul.mubr.f32.vlgmr.msra.gmra.mrb[118].mxu0 %v4431_v40  ;;  %v10412_v40 = vld [vmem:[#allocation5 + $0x10] sm:$0xff]  ;;  %v7319_v23 = vpack.c.bf16 %v4566_v4, %v4565_v31  ;;  %v4575_v55 = vld [vmem:[%s10833_s6 + $0x420] sm:$0xff]  ;;  %v4576_v24 = vld [vmem:[%s10833_s6 + $0x428] sm:$0xff] }
 0xb96   : > { %4661 = vmatprep.mubr.f32.mxu0 %v10309_v57  ;;  %7254 = vmatpush3.bf16.msra.mxu1 %v7253_v30  ;;  %v4535_v30 = vld [vmem:[%s10833_s6 + $0x2e0] sm:$0xff]  ;;  %v4577_v9 = vld [vmem:[%s10833_s6 + $0x430] sm:$0xff]  ;;  %v4554_v39 = vld [vmem:[%s10833_s6 + $0x378] sm:$0xff] }
 0xb97   : > { %7270 = vmatpush3.bf16.msra.mxu0 %v7269_v6  ;;  %7256 = vmatprep.subr.bf16.mxu1 %v7255_v41  ;;  %v4536_v6 = vld [vmem:[%s10833_s6 + $0x2e8] sm:$0xff]  ;;  %v7305_v41 = vpack.c.bf16 %v4542_v33, %v4541_v32  ;;  %v4439_v45 = vld [vmem:[#allocation5 + $0x12] sm:$0xff]  ;;  %v4553_v28 = vld [vmem:[%s10833_s6 + $0x370] sm:$0xff] }
 0xb98   : > { %7272 = vmatprep.subr.bf16.mxu0 %v7271_v62  ;;  %v4543_v62 = vld [vmem:[%s10833_s6 + $0x320] sm:$0xff]  ;;  %v7291_v20 = vpack.c.bf16 %v4536_v6, %v4535_v30  ;;  %v4578_v32 = vld [vmem:[%s10833_s6 + $0x438] sm:$0xff]  ;;  %v4580_v6 = vld [vmem:[%s10833_s6 + $0x448] sm:$0xff] }
 0xb99   : > { %4662 = vmatmul.mubr.f32.gmra.mrb[120].mxu0 %v10240_v46  ;;  %v4531_v46 = vld [vmem:[%s10833_s6 + $0x2c0] sm:$0xff]  ;;  %v7309_v51 = vpack.c.bf16 %v4544_v44, %v4543_v62  ;;  %v7343_v34 = vpack.c.bf16 %v4578_v32, %v4577_v9  ;;  %v4582_v43 = vld [vmem:[%s10833_s6 + $0x458] sm:$0xff]  ;;  %v4584_v27 = vld [vmem:[%s10833_s6 + $0x468] sm:$0xff] }
 0xb9a   : > { %7258 = vmatpush3.bf16.msra.mxu1 %v7257_v37  ;;  %4806 = vmatprep.mubr.f32.mxu0 %v10337_v54  ;;  %v7283_v19 = vpack.c.bf16 %v4532_v16, %v4531_v46  ;;  %v4438_v37 = vld [vmem:[#allocation5 + $0x11] sm:$0xff]  ;;  %v4573_v46 = vld [vmem:[%s10833_s6 + $0x410] sm:$0xff]  ;;  %v4441_v44 = vld [vmem:[#allocation5 + $0x19] sm:$0xff] }
 0xb9b   : > { %7274 = vmatpush3.bf16.msra.mxu0 %v7273_v0  ;;  %7260 = vmatprep.subr.bf16.mxu1 %v7259_v48  ;;  %v4537_v0 = vld [vmem:[%s10833_s6 + $0x2f0] sm:$0xff]  ;;  %v4538_v48 = vld [vmem:[%s10833_s6 + $0x2f8] sm:$0xff]  ;;  %v4551_v12 = vld [vmem:[%s10833_s6 + $0x360] sm:$0xff] }
 0xb9c   : > { %7276 = vmatprep.subr.bf16.mxu0 %v7275_v11  ;;  %v4521_v11 = vld [vmem:[%s10833_s6 + $0x270] sm:$0xff]  ;;  %v7295_v1 = vpack.c.bf16 %v4538_v48, %v4537_v0  ;;  %v4574_v16 = vld [vmem:[%s10833_s6 + $0x418] sm:$0xff]  ;;  %v4579_v30 = vld [vmem:[%s10833_s6 + $0x440] sm:$0xff] }
 0xb9d   : > { %v7335_v13 = vpack.c.bf16 %v4574_v16, %v4573_v46  ;;  %v4440_v47 = vld [vmem:[#allocation5 + $0x18] sm:$0xff] }
 0xb9e   : > { %7262 = vmatpush3.bf16.msra.mxu1 %v7261_v60  ;;  %v4571_v60 = vld [vmem:[%s10833_s6 + $0x400] sm:$0xff] }
 0xb9f   : > { %7278 = vmatpush3.bf16.msra.mxu0 %v7277_v10  ;;  %7264 = vmatprep.subr.bf16.mxu1 %v7263_v61  ;;  %v4572_v10 = vld [vmem:[%s10833_s6 + $0x408] sm:$0xff]  ;;  %v7313_v61 = vpack.c.bf16 %v4546_v17, %v4545_v50 }
 0xba0   : > { %7280 = vmatprep.subr.bf16.mxu0 %v7279_v63  ;;  %v4548_v63 = vld [vmem:[%s10833_s6 + $0x348] sm:$0xff]  ;;  %v7331_v36 = vpack.c.bf16 %v4572_v10, %v4571_v60 }
 0xba1   : > { %v4442_v0 = vld [vmem:[#allocation5 + $0x1a] sm:$0xff] }
 0xba2   : > { %7266 = vmatpush3.bf16.msra.mxu1 %v7265_v52  ;;  %v7317_v52 = vpack.c.bf16 %v4548_v63, %v4547_v5 }
 0xba3   : > { %7282 = vmatpush3.bf16.msra.mxu0 %v7281_v21  ;;  %7300 = vmatprep.subr.bf16.mxu1 %v7299_v53  ;;  %v4549_v21 = vld [vmem:[%s10833_s6 + $0x350] sm:$0xff]  ;;  %v4550_v53 = vld [vmem:[%s10833_s6 + $0x358] sm:$0xff] }
 0xba4   : > { %7284 = vmatprep.subr.bf16.mxu0 %v7283_v19  ;;  %v4568_v19 = vld [vmem:[%s10833_s6 + $0x3e8] sm:$0xff]  ;;  %v7321_v18 = vpack.c.bf16 %v4550_v53, %v4549_v21 }
 0xba5   : > { %4732 = vmatmul.mubr.f32.vlgmr.msra.gmra.mrb[118].mxu1 %v4435_v25  ;;  %v4552_v25 = vld [vmem:[%s10833_s6 + $0x368] sm:$0xff] }
 0xba6   : > { %4736 = vmatprep.mubr.f32.mxu1 %v10412_v40  ;;  %7302 = vmatpush3.bf16.msra.mxu1 %v7301_v26  ;;  %v7323_v26 = vpack.c.bf16 %v4568_v19, %v4567_v15  ;;  %v7325_v33 = vpack.c.bf16 %v4552_v25, %v4551_v12 }
 0xba7   : > { %7286 = vmatpush3.bf16.msra.mxu0 %v7285_v22  ;;  %7304 = vmatprep.subr.bf16.mxu1 %v7303_v2  ;;  %v7339_v22 = vpack.c.bf16 %v4576_v24, %v4575_v55  ;;  %v4570_v2 = vld [vmem:[%s10833_s6 + $0x3f8] sm:$0xff] }
 0xba8   : > { %7288 = vmatprep.subr.bf16.mxu0 %v7287_v38 }
 0xba9   : > { %4737 = vmatmul.mubr.f32.gmra.mrb[120].mxu1 %v10337_v54  ;;  %v4522_v54 = vld [vmem:[%s10833_s6 + $0x278] sm:$0xff] }
 0xbaa   : > { %7306 = vmatpush3.bf16.msra.mxu1 %v7305_v41  ;;  %4881 = vmatprep.mubr.f32.mxu1 %v4438_v37  ;;  %v7297_v8 = vpack.c.bf16 %v4522_v54, %v4521_v11  ;;  %v7329_v41 = vpack.c.bf16 %v4554_v39, %v4553_v28 }
 0xbab   : > { %7290 = vmatpush3.bf16.msra.mxu0 %v7289_v14  ;;  %7308 = vmatprep.subr.bf16.mxu1 %v7307_v42  ;;  %v7347_v14 = vpack.c.bf16 %v4580_v6, %v4579_v30  ;;  %v4581_v42 = vld [vmem:[%s10833_s6 + $0x450] sm:$0xff]  ;;  %v5741_v30 = vld [vmem:[%s10833_s6 + $0x480] ss:$0 sm:$0xff] }
 0xbac   : > { %7292 = vmatprep.subr.bf16.mxu0 %v7291_v20  ;;  %v7351_v62 = vpack.c.bf16 %v4582_v43, %v4581_v42  ;;  %v4583_v20 = vld [vmem:[%s10833_s6 + $0x460] sm:$0xff] }
 0xbad   : > { %v7355_v7 = vpack.c.bf16 %v4584_v27, %v4583_v20 }
 0xbae   : > { %7310 = vmatpush3.bf16.msra.mxu1 %v7309_v51 }
 0xbaf   : > { %7294 = vmatpush3.bf16.msra.mxu0 %v7293_v35  ;;  %7312 = vmatprep.subr.bf16.mxu1 %v7311_v49  ;;  %v5736_v49 = vld [vmem:[%s10834_s7 + $0x240] ss:$0 sm:$0xff] }
 0xbb0   : > { %7296 = vmatprep.subr.bf16.mxu0 %v7295_v1 }
 0xbb2   : > { %7314 = vmatpush3.bf16.msra.mxu1 %v7313_v61 }
 0xbb3   : > { %7298 = vmatpush3.bf16.msra.mxu0 %v7297_v8  ;;  %7316 = vmatprep.subr.bf16.mxu1 %v7315_v29 }
 0xbb4   : > { %7332 = vmatprep.subr.bf16.mxu0 %v7331_v36 }
 0xbb6   : > { %4807 = vmatmul.mubr.f32.vlgmr.msra.gmra.mrb[122].mxu0 %v10309_v57  ;;  %7318 = vmatpush3.bf16.msra.mxu1 %v7317_v52  ;;  %v4569_v57 = vld [vmem:[%s10833_s6 + $0x3f0] sm:$0xff] }
 0xbb7   : > { %4811 = vmatprep.mubr.f32.mxu0 %v4439_v45  ;;  %7334 = vmatpush3.bf16.msra.mxu0 %v7331_v36  ;;  %v7327_v38 = vpack.c.bf16 %v4570_v2, %v4569_v57 }
 0xbb8   : > { %7320 = vmatprep.subr.bf16.mxu1 %v7319_v23  ;;  %7336 = vmatprep.subr.bf16.mxu0 %v7335_v13 }
 0xbba   : > { %4812 = vmatmul.mubr.f32.gmra.mrb[124].mxu0 %v4438_v37  ;;  %7322 = vmatpush3.bf16.msra.mxu1 %v7321_v18 }
 0xbbb   : > { %7338 = vmatpush3.bf16.msra.mxu0 %v7335_v13  ;;  %6663 = vmatprep.mubr.f32.mxu0 %v4439_v45 }
 0xbbc   : > { %7324 = vmatprep.subr.bf16.mxu1 %v7323_v26  ;;  %7340 = vmatprep.subr.bf16.mxu0 %v7339_v22 }
 0xbbe   : > { %7326 = vmatpush3.bf16.msra.mxu1 %v7325_v33 }
 0xbbf   : > { %7342 = vmatpush3.bf16.msra.mxu0 %v7339_v22  ;;  %7328 = vmatprep.subr.bf16.mxu1 %v7327_v38 }
 0xbc0   : > { %7344 = vmatprep.subr.bf16.mxu0 %v7343_v34 }
 0xbc2   : > { %7330 = vmatpush3.bf16.msra.mxu1 %v7329_v41 }
 0xbc3   : > { %7346 = vmatpush3.bf16.msra.mxu0 %v7343_v34  ;;  %7363 = vmatprep.subr.bf16.mxu1 %v7880_v3  ;;  %v4585_v3 = vld [vmem:[%s10833_s6 + $0x470] sm:$0xff] }
 0xbc4   : > { %7348 = vmatprep.subr.bf16.mxu0 %v7347_v14 }
 0xbc5   : > { %4882 = vmatmul.mubr.f32.vlgmr.msra.gmra.mrb[122].mxu1 %v10412_v40  ;;  %v4586_v40 = vld [vmem:[%s10833_s6 + $0x478] sm:$0xff] }
 0xbc6   : > { %4886 = vmatprep.mubr.f32.mxu1 %v4441_v44  ;;  %v7359_v37 = vpack.c.bf16 %v4586_v40, %v4585_v3 }
 0xbc7   : > { %7350 = vmatpush3.bf16.msra.mxu0 %v7347_v14 }
 0xbc8   : > { %7352 = vmatprep.subr.bf16.mxu0 %v7351_v62 }
 0xbc9   : > { %4887 = vmatmul.mubr.f32.gmra.mrb[124].mxu1 %v4440_v47 }
 0xbca   : > { %6670 = vmatprep.mubr.msk.f32.mxu1 %vm7889_vm11, %v7890_v59 }
 0xbcb   : > { %7354 = vmatpush3.bf16.msra.mxu0 %v7351_v62 }
 0xbcc   : > { %7356 = vmatprep.subr.bf16.mxu0 %v7355_v7 }
 0xbcf   : > { %7358 = vmatpush3.bf16.msra.mxu0 %v7355_v7 }
 0xbd0   : > { %7360 = vmatprep.subr.bf16.mxu0 %v7359_v37 }
 0xbd3   : > { %7362 = vmatpush3.bf16.msra.mxu0 %v7359_v37 }
 0xbd6   : > { %6664 = vmatmul.mubr.f32.vlgmr.msra.gmra.mrb[126].mxu0 %v4442_v0 }
 0xc41   : > { %v6141_v48 = vpop.f32.mrb[106].mxu1 }
 0xc42   : > { %v6142_v51 = vpop.f32.mrb[107].mxu1 }
 0xc43   : > { %v6143_v35 = vadd.f32 %v6142_v51, %v6141_v48 }
 0xc45   : > { %v4239_v17 = vadd.f32 %v6143_v35, %v5736_v49 }
 0xc48   : > { %v6185_v11 = vpop.f32.mrb[110].mxu0 }
 0xc49   : > { %v6186_v50 = vpop.f32.mrb[111].mxu0 }
 0xc4a   : > { %v6187_v1 = vadd.f32 %v6186_v50, %v6185_v11 }
 0xc4c   : > { %v6144_v54 = vpop.f32.mrb[108].mxu1  ;;  %v4324_v56 = vadd.f32 %v6187_v1, %v4239_v17 }
 0xc4d   : > { %v6145_v58 = vpop.f32.mrb[109].mxu1 }
 0xc4e   : > { %v6146_v60 = vadd.f32 %v6145_v58, %v6144_v54 }
 0xc4f   : > { %v6188_v10 = vpop.f32.mrb[112].mxu0 }
 0xc50   : > { %v4244_v61 = vadd.f32 %v6146_v60, %v5736_v49  ;;  %v6147_v8 = vpop.f32.mrb[110].mxu1  ;;  %v6189_v29 = vpop.f32.mrb[113].mxu0 }
 0xc51   : > { %v6190_v5 = vadd.f32 %v6189_v29, %v6188_v10  ;;  %v6148_v63 = vpop.f32.mrb[111].mxu1 }
 0xc52   : > { %v6149_v36 = vadd.f32 %v6148_v63, %v6147_v8 }
 0xc53   : > { %v6191_v31 = vpop.f32.mrb[114].mxu0  ;;  %v4329_v4 = vadd.f32 %v6190_v5, %v4244_v61 }
 0xc54   : > { %v4249_v46 = vadd.f32 %v6149_v36, %v5736_v49  ;;  %v6150_v16 = vpop.f32.mrb[112].mxu1  ;;  %v6192_v52 = vpop.f32.mrb[115].mxu0  ;;  %v4969_v36 = vld [vmem:[%s10841_s14] sm:$0xff] }
 0xc55   : > { %v6193_v21 = vadd.f32 %v6192_v52, %v6191_v31  ;;  %v6151_v53 = vpop.f32.mrb[113].mxu1  ;;  %v4970_v31 = vld [vmem:[%s10841_s14 + $0x8] sm:$0xff] }
 0xc56   : > { %v6152_v23 = vadd.f32 %v6151_v53, %v6150_v16  ;;  %v4973_v16 = vld [vmem:[%s10841_s14 + $0x20] sm:$0xff]  ;;  %v4974_v52 = vld [vmem:[%s10841_s14 + $0x28] sm:$0xff] }
 0xc57   : > { %v6194_v13 = vpop.f32.mrb[116].mxu0  ;;  %v4334_v15 = vadd.f32 %v6193_v21, %v4249_v46  ;;  %v4972_v46 = vld [vmem:[%s10841_s14 + $0x18] sm:$0xff]  ;;  %v4975_v21 = vld [vmem:[%s10841_s14 + $0x30] sm:$0xff]  ;;  %v5266_v53 = vld [vmem:[%s10835_s8 + $0x100] sm:$0xff] }
 0xc58   : > { %v4254_v19 = vadd.f32 %v6152_v23, %v5736_v49  ;;  %v6195_v55 = vpop.f32.mrb[117].mxu0  ;;  %v6627_v24 = vpop.f32.mrb[114].mxu1  ;;  %v5267_v23 = vld [vmem:[%s10835_s8 + $0x108] sm:$0xff] }
 0xc59   : > { %v6196_v45 = vadd.f32 %v6195_v55, %v6194_v13  ;;  %v10562_v18 = vadd.f32 %v6627_v24, %v4329_v4  ;;  %v4408_v12 = vpop.f32.mrb[115].mxu1  ;;  %v4971_v4 = vld [vmem:[%s10841_s14 + $0x10] sm:$0xff]  ;;  %v7398_v13 = vpack.c.bf16 %v5267_v23, %v5266_v53  ;;  %v5250_v55 = vld [vmem:[%s10835_s8 + $0x80] sm:$0xff]  ;;  %v5251_v24 = vld [vmem:[%s10835_s8 + $0x88] sm:$0xff] }
 0xc5a   : > { %v10564_v25 = vadd.f32 %v4408_v12, %v4324_v56  ;;  %v7366_v12 = vpack.c.bf16 %v5251_v24, %v5250_v55 }
 0xc5b   : > { %v4339_v26 = vadd.f32 %v6196_v45, %v4254_v19  ;;  %7399 = vmatprep.subr.bf16.mxu0 %v7398_v13  ;;  %v5234_v45 = vld [vmem:[%s10835_s8] sm:$0xff] }
 0xc5c   : > { %v6630_v22 = vpop.f32.mrb[116].mxu1  ;;  %7401 = vmatpush3.bf16.msra.mxu0 %v7398_v13 }
 0xc5d   : > { %v10566_v57 = vadd.f32 %v6630_v22, %v4339_v26  ;;  %v4418_v2 = vpop.f32.mrb[117].mxu1  ;;  %v5235_v26 = vld [vmem:[%s10835_s8 + $0x8] sm:$0xff]  ;;  %v5252_v22 = vld [vmem:[%s10835_s8 + $0x90] sm:$0xff] }
 0xc5e   : > { %v10568_v9 = vadd.f32 %v4418_v2, %v4334_v15  ;;  %v5269_v15 = vld [vmem:[%s10835_s8 + $0x118] sm:$0xff] }
 0xc5f   : > { %v5253_v2 = vld [vmem:[%s10835_s8 + $0x98] sm:$0xff] }
 0xc68   : > { %v6241_v32 = vpop.f32.mrb[118].mxu0 }
 0xc69   : > { %v6242_v33 = vpop.f32.mrb[119].mxu0 }
 0xc6a   : > { %v6243_v38 = vadd.f32 %v6242_v33, %v6241_v32  ;;  %v7368_v32 = vpack.c.bf16 %v5235_v26, %v5234_v45  ;;  %v7370_v33 = vpack.c.bf16 %v5253_v2, %v5252_v22 }
 0xc6c   : > { %v6244_v28 = vpop.f32.mrb[120].mxu0  ;;  %v4659_v14 = vadd.f32 %v6243_v38, %v5741_v30  ;;  %v5236_v38 = vld [vmem:[%s10835_s8 + $0x10] sm:$0xff] }
 0xc6d   : > { %v6245_v39 = vpop.f32.mrb[121].mxu0 }
 0xc6e   : > { %v6246_v34 = vadd.f32 %v6245_v39, %v6244_v28  ;;  %v5237_v28 = vld [vmem:[%s10835_s8 + $0x18] sm:$0xff]  ;;  %v5254_v39 = vld [vmem:[%s10835_s8 + $0xa0] sm:$0xff] }
 0xc70   : > { %v4664_v20 = vadd.f32 %v6246_v34, %v5741_v30  ;;  %v5255_v34 = vld [vmem:[%s10835_s8 + $0xa8] sm:$0xff]  ;;  %v7372_v30 = vpack.c.bf16 %v5237_v28, %v5236_v38 }
 0xc78   : > { %v6279_v6 = vpop.f32.mrb[118].mxu1 }
 0xc79   : > { %v6280_v41 = vpop.f32.mrb[119].mxu1 }
 0xc7a   : > { %v6281_v42 = vadd.f32 %v6280_v41, %v6279_v6  ;;  %v7374_v6 = vpack.c.bf16 %v5255_v34, %v5254_v39  ;;  %v5238_v41 = vld [vmem:[%s10835_s8 + $0x20] sm:$0xff] }
 0xc7c   : > { %v4734_v43 = vadd.f32 %v6281_v42, %v4659_v14  ;;  %v6282_v62 = vpop.f32.mrb[120].mxu1  ;;  %v5239_v14 = vld [vmem:[%s10835_s8 + $0x28] sm:$0xff]  ;;  %v5256_v42 = vld [vmem:[%s10835_s8 + $0xb0] sm:$0xff] }
 0xc7d   : > { %v6283_v44 = vpop.f32.mrb[121].mxu1 }
 0xc7e   : > { %v6284_v27 = vadd.f32 %v6283_v44, %v6282_v62  ;;  %v7376_v62 = vpack.c.bf16 %v5239_v14, %v5238_v41 }
 0xc80   : > { %v4739_v47 = vadd.f32 %v6284_v27, %v4664_v20  ;;  %v5240_v20 = vld [vmem:[%s10835_s8 + $0x30] sm:$0xff]  ;;  %v5241_v27 = vld [vmem:[%s10835_s8 + $0x38] sm:$0xff] }
 0xc89   : > { %v6317_v7 = vpop.f32.mrb[122].mxu0 }
 0xc8a   : > { %v6318_v3 = vpop.f32.mrb[123].mxu0 }
 0xc8b   : > { %v6319_v40 = vadd.f32 %v6318_v3, %v6317_v7  ;;  %v5259_v7 = vld [vmem:[%s10835_s8 + $0xc8] sm:$0xff]  ;;  %v7380_v3 = vpack.c.bf16 %v5241_v27, %v5240_v20 }
 0xc8d   : > { %v4809_v37 = vadd.f32 %v6319_v40, %v4734_v43  ;;  %v6320_v0 = vpop.f32.mrb[124].mxu0  ;;  %v5257_v43 = vld [vmem:[%s10835_s8 + $0xb8] sm:$0xff] }
 0xc8e   : > { %v6321_v48 = vpop.f32.mrb[125].mxu0  ;;  %v7378_v44 = vpack.c.bf16 %v5257_v43, %v5256_v42 }
 0xc8f   : > { %v6322_v51 = vadd.f32 %v6321_v48, %v6320_v0  ;;  %v5243_v0 = vld [vmem:[%s10835_s8 + $0x48] sm:$0xff]  ;;  %v5260_v48 = vld [vmem:[%s10835_s8 + $0xd0] sm:$0xff] }
 0xc91   : > { %v4814_v35 = vadd.f32 %v6322_v51, %v4739_v47  ;;  %v5258_v47 = vld [vmem:[%s10835_s8 + $0xc0] sm:$0xff]  ;;  %v5261_v51 = vld [vmem:[%s10835_s8 + $0xd8] sm:$0xff] }
 0xc92   : > { %v7382_v40 = vpack.c.bf16 %v5259_v7, %v5258_v47 }
 0xc98   : > { %v6355_v49 = vpop.f32.mrb[122].mxu1 }
 0xc99   : > { %v6356_v11 = vpop.f32.mrb[123].mxu1 }
 0xc9a   : > { %v6357_v50 = vadd.f32 %v6356_v11, %v6355_v49  ;;  %v7386_v49 = vpack.c.bf16 %v5261_v51, %v5260_v48  ;;  %v5244_v11 = vld [vmem:[%s10835_s8 + $0x50] sm:$0xff] }
 0xc9c   : > { %v6358_v17 = vpop.f32.mrb[124].mxu1  ;;  %v4884_v1 = vadd.f32 %v6357_v50, %v4809_v37  ;;  %v5242_v37 = vld [vmem:[%s10835_s8 + $0x40] sm:$0xff]  ;;  %v5245_v50 = vld [vmem:[%s10835_s8 + $0x58] sm:$0xff] }
 0xc9d   : > { %v6359_v54 = vpop.f32.mrb[125].mxu1 }
 0xc9e   : > { %v6360_v56 = vadd.f32 %v6359_v54, %v6358_v17  ;;  %v7388_v17 = vpack.c.bf16 %v5245_v50, %v5244_v11 }
 0xca0   : > { %v4889_v58 = vadd.f32 %v6360_v56, %v4814_v35  ;;  %v7384_v35 = vpack.c.bf16 %v5243_v0, %v5242_v37 }
 0xca9   : > { %v6665_v60 = vpop.f32.mrb[126].mxu0 }
 0xcaa   : > { %v4964_v10 = vadd.f32 %v6665_v60, %v4889_v58  ;;  %v4958_v61 = vpop.f32.mrb[127].mxu0  ;;  %v5262_v60 = vld [vmem:[%s10835_s8 + $0xe0] sm:$0xff] }
 0xcab   : > { %v4959_v8 = vadd.f32 %v4958_v61, %v4884_v1 }
 0xcac   : > { %v4968_v29 = vmax.f32 %v4964_v10, 0.0  ;;  %v5263_v10 = vld [vmem:[%s10835_s8 + $0xe8] sm:$0xff] }
 0xcad   : > { %v4967_v5 = vmax.f32 %v4959_v8, 0.0  ;;  %v7390_v61 = vpack.c.bf16 %v5263_v10, %v5262_v60  ;;  %v5246_v8 = vld [vmem:[%s10835_s8 + $0x60] sm:$0xff] }
 0xcaf   : > { %v7364_v63 = vpack.c.bf16 %v4968_v29, %v4967_v5  ;;  %v5247_v29 = vld [vmem:[%s10835_s8 + $0x68] sm:$0xff] }
 0xcb1   : > { %7365 = vmatpush3.bf16.msra.mxu1 %v7364_v63  ;;  %v7392_v63 = vpack.c.bf16 %v5247_v29, %v5246_v8 }
 0xcb2   : > { %7367 = vmatprep.subr.bf16.mxu1 %v7366_v12 }
 0xcb4   : > { %6671 = vmatmul.mubr.msk.f32.vlgmr.msra.gmra.mrb[126].mxu1 %vm582_vm0, %v4969_v36 }
 0xcb5   : > { %6673 = vmatprep.mubr.msk.f32.mxu1 %vm7889_vm11, %v7890_v59  ;;  %7369 = vmatpush3.bf16.msra.mxu1 %v7368_v32 }
 0xcb6   : > { %7371 = vmatprep.subr.bf16.mxu1 %v7370_v33 }
 0xcb8   : > { %6674 = vmatmul.mubr.msk.f32.gmra.mrb[128].mxu1 %vm582_vm0, %v4970_v31  ;;  %v5264_v31 = vld [vmem:[%s10835_s8 + $0xf0] sm:$0xff] }
 0xcb9   : > { %6676 = vmatprep.mubr.msk.f32.mxu1 %vm7889_vm11, %v7890_v59  ;;  %7373 = vmatpush3.bf16.msra.mxu1 %v7372_v30 }
 0xcba   : > { %7375 = vmatprep.subr.bf16.mxu1 %v7374_v6 }
 0xcbc   : > { %6677 = vmatmul.mubr.msk.f32.gmra.mrb[130].mxu1 %vm582_vm0, %v4971_v4  ;;  %v5265_v4 = vld [vmem:[%s10835_s8 + $0xf8] sm:$0xff] }
 0xcbd   : > { %6679 = vmatprep.mubr.msk.f32.mxu1 %vm7889_vm11, %v7890_v59  ;;  %7377 = vmatpush3.bf16.msra.mxu1 %v7376_v62 }
 0xcbe   : > { %7379 = vmatprep.subr.bf16.mxu1 %v7378_v44 }
 0xcc0   : > { %6680 = vmatmul.mubr.msk.f32.gmra.mrb[132].mxu1 %vm582_vm0, %v4972_v46  ;;  %v5248_v46 = vld [vmem:[%s10835_s8 + $0x70] sm:$0xff] }
 0xcc1   : > { %6682 = vmatprep.mubr.msk.f32.mxu1 %vm7889_vm11, %v7890_v59  ;;  %7381 = vmatpush3.bf16.msra.mxu1 %v7380_v3 }
 0xcc2   : > { %7383 = vmatprep.subr.bf16.mxu1 %v7382_v40 }
 0xcc4   : > { %6683 = vmatmul.mubr.msk.f32.gmra.mrb[134].mxu1 %vm582_vm0, %v4973_v16  ;;  %v7394_v16 = vpack.c.bf16 %v5265_v4, %v5264_v31 }
 0xcc5   : > { %6685 = vmatprep.mubr.msk.f32.mxu1 %vm7889_vm11, %v7890_v59  ;;  %7385 = vmatpush3.bf16.msra.mxu1 %v7384_v35 }
 0xcc6   : > { %7387 = vmatprep.subr.bf16.mxu1 %v7386_v49 }
 0xcc8   : > { %6686 = vmatmul.mubr.msk.f32.gmra.mrb[136].mxu1 %vm582_vm0, %v4974_v52  ;;  %v5249_v52 = vld [vmem:[%s10835_s8 + $0x78] sm:$0xff] }
 0xcc9   : > { %6688 = vmatprep.mubr.msk.f32.mxu1 %vm7889_vm11, %v7890_v59  ;;  %v5268_v59 = vld [vmem:[%s10835_s8 + $0x110] sm:$0xff]  ;;  %7389 = vmatpush3.bf16.msra.mxu1 %v7388_v17  ;;  %v7396_v53 = vpack.c.bf16 %v5249_v52, %v5248_v46 }
 0xcca   : > { %v7402_v19 = vpack.c.bf16 %v5269_v15, %v5268_v59  ;;  %7391 = vmatprep.subr.bf16.mxu1 %v7390_v61 }
 0xccc   : > { %6689 = vmatmul.mubr.msk.f32.gmra.mrb[138].mxu1 %vm582_vm0, %v4975_v21  ;;  %7403 = vmatprep.subr.bf16.mxu0 %v7402_v19 }
 0xccd   : > { %7405 = vmatpush3.bf16.msra.mxu0 %v7402_v19  ;;  %7393 = vmatpush3.bf16.msra.mxu1 %v7392_v63 }
 0xcce   : > { %7395 = vmatprep.subr.bf16.mxu1 %v7394_v16 }
 0xcd1   : > { %7397 = vmatpush3.bf16.msra.mxu1 %v7396_v53 }
 0xd87   : > { %v5063_v1 = vpop.f32.mrb[126].mxu1 }
 0xd88   : > { %5097 = vst.msk [vmem:[#allocation7] sm:$0xff] %vm1884_vm5, %v5063_v1  ;;  %v6672_v54 = vpop.f32.mrb[127].mxu1 }
 0xd8b   : > { %v5068_v56 = vpop.f32.mrb[128].mxu1 }
 0xd8c   : > { %5098 = vst.msk [vmem:[#allocation7 + $0x8] sm:$0xff] %vm1884_vm5, %v5068_v56  ;;  %v6675_v58 = vpop.f32.mrb[129].mxu1 }
 0xd8f   : > { %v5073_v5 = vpop.f32.mrb[130].mxu1  ;;  %v5104_v17 = vld [vmem:[#allocation7] sm:$0xff] }
 0xd90   : > { %5099 = vst.msk [vmem:[#allocation7 + $0x10] sm:$0xff] %vm1884_vm5, %v5073_v5  ;;  %v6678_v36 = vpop.f32.mrb[131].mxu1 }
 0xd93   : > { %v5078_v21 = vpop.f32.mrb[132].mxu1  ;;  %v5108_v13 = vld [vmem:[#allocation7 + $0x1] sm:$0xff] }
 0xd94   : > { %5100 = vst.msk [vmem:[#allocation7 + $0x18] sm:$0xff] %vm1884_vm5, %v5078_v21  ;;  %v6681_v23 = vpop.f32.mrb[133].mxu1  ;;  %v5112_v55 = vld [vmem:[#allocation7 + $0x2] sm:$0xff] }
 0xd95   : > { %v10731_v26 = vld [vmem:[#allocation7 + $0x8] sm:$0xff] }
 0xd97   : > { %v5083_v59 = vpop.f32.mrb[134].mxu1  ;;  %v5113_v15 = vld [vmem:[#allocation7 + $0xa] sm:$0xff] }
 0xd98   : > { %v10725_v19 = vld [vmem:[#allocation7 + $0x10] sm:$0xff]  ;;  %5101 = vst.msk [vmem:[#allocation7 + $0x20] sm:$0xff] %vm1884_vm5, %v5083_v59  ;;  %v7812_v24 = vpack.i.bf16 %v5108_v13, %v5113_v15  ;;  %v6684_v12 = vpop.f32.mrb[135].mxu1 }
 0xd99   : > { %v7817_v45 = vpack.i.bf16 %v5112_v55, %v10725_v19  ;;  %v5109_v22 = vld [vmem:[#allocation7 + $0x9] sm:$0xff] }
 0xd9a   : > { %7813 = vrot.lane.b32.xlu0 %v7812_v24, %s10855_s16 }
 0xd9b   : > { %7818 = vrot.lane.b32.xlu1 %v7817_v45, %s10854_s23  ;;  %v5114_v2 = vld [vmem:[#allocation7 + $0x12] sm:$0xff]  ;;  %v5088_v33 = vpop.f32.mrb[136].mxu1 }
 0xd9c   : > { %v10733_v32 = vld [vmem:[#allocation7 + $0x11] sm:$0xff]  ;;  %v7827_v38 = vpack.i.bf16 %v5109_v22, %v5114_v2  ;;  %5102 = vst.msk [vmem:[#allocation7 + $0x28] sm:$0xff] %vm1884_vm5, %v5088_v33  ;;  %v6687_v39 = vpop.f32.mrb[137].mxu1  ;;  %6699 = vmatprep.mubr.msk.f32.mxu0 %vm1884_vm5, %v5114_v2 }
 0xd9d   : > { %v7822_v28 = vpack.i.bf16 %v10731_v26, %v10733_v32  ;;  %v10739_v34 = vld [vmem:[#allocation7 + $0x18] sm:$0xff] }
 0xd9e   : > { %v7832_v14 = vpack.i.bf16 %v5113_v15, %v10739_v34 }
 0xd9f   : > { %7828 = vrot.lane.b32.xlu1 %v7827_v38, %s10855_s16  ;;  %7823 = vrot.lane.b32.xlu0 %v7822_v28, %s10853_s17  ;;  %v10743_v30 = vld [vmem:[#allocation7 + $0x19] sm:$0xff]  ;;  %v5093_v6 = vpop.f32.mrb[138].mxu1 }
 0xda0   : > { %v5115_v41 = vld [vmem:[#allocation7 + $0x1a] sm:$0xff]  ;;  %v7837_v42 = vpack.i.bf16 %v10725_v19, %v10743_v30  ;;  %5103 = vst.msk [vmem:[#allocation7 + $0x30] sm:$0xff] %vm1884_vm5, %v5093_v6  ;;  %v6690_v43 = vpop.f32.mrb[139].mxu1 }
 0xda1   : > { %6700 = vmatmul.mubr.msk.f32.vlgmr.msra.gmra.mrb[128].mxu0 %vm1884_vm5, %v5115_v41  ;;  %v5116_v62 = vld [vmem:[#allocation7 + $0x20] sm:$0xff]  ;;  %v7842_v20 = vpack.i.bf16 %v10733_v32, %v5115_v41 }
 0xda2   : > { %v7847_v27 = vpack.i.bf16 %v5114_v2, %v5116_v62 }
 0xda3   : > { %7833 = vrot.lane.b32.xlu0 %v7832_v14, %s10854_s23  ;;  %7838 = vrot.lane.b32.xlu1 %v7837_v42, %s10853_s17  ;;  %v5118_v44 = vld [vmem:[#allocation7 + $0x22] sm:$0xff] }
 0xda4   : > { %6702 = vmatprep.mubr.msk.f32.mxu0 %vm1884_vm5, %v5118_v44  ;;  %v10754_v47 = vld [vmem:[#allocation7 + $0x21] sm:$0xff]  ;;  %v7857_v3 = vpack.i.bf16 %v10743_v30, %v5118_v44 }
 0xda5   : > { %v7852_v40 = vpack.i.bf16 %v10739_v34, %v10754_v47  ;;  %v5119_v0 = vld [vmem:[#allocation7 + $0x28] sm:$0xff] }
 0xda6   : > { %v7862_v51 = vpack.i.bf16 %v5115_v41, %v5119_v0 }
 0xda7   : > { %7843 = vrot.lane.b32.xlu0 %v7842_v20, %s10855_s16  ;;  %7848 = vrot.lane.b32.xlu1 %v7847_v27, %s10854_s23  ;;  %v5121_v7 = vld [vmem:[#allocation7 + $0x2a] sm:$0xff] }
 0xda8   : > { %6703 = vmatmul.mubr.msk.f32.gmra.mrb[130].mxu0 %vm1884_vm5, %v5121_v7  ;;  %v5120_v37 = vld [vmem:[#allocation7 + $0x29] sm:$0xff] }
 0xda9   : > { %v7867_v48 = vpack.i.bf16 %v5116_v62, %v5120_v37 }
 0xdab   : > { %7858 = vrot.lane.b32.xlu1 %v7857_v3, %s10855_s16  ;;  %7853 = vrot.lane.b32.xlu0 %v7852_v40, %s10853_s17 }
 0xdaf   : > { %7863 = vrot.lane.b32.xlu0 %v7862_v51, %s10854_s23  ;;  %7868 = vrot.lane.b32.xlu1 %v7867_v48, %s10853_s17 }
 0xe0c   : > { %v7814_v35 = vpop.permute.xlu0 %7813 }
 0xe0d   : > { %v7819_v49 = vpop.permute.xlu1 %7818  ;;  %v7816_v11 = vunpack.i.h.bf16 %v7814_v35  ;;  %v7815_v50 = vunpack.i.l.bf16 %v7814_v35 }
 0xe0e   : > { %v7821_v1 = vunpack.i.h.bf16 %v7819_v49  ;;  %v7820_v54 = vunpack.i.l.bf16 %v7819_v49 }
 0xe0f   : > { %v5210_v56 = vsel %vm1884_vm5, %v5104_v17, %v7816_v11  ;;  %v5222_v58 = vsel %vm1884_vm5, %v5109_v22, %v7815_v50 }
 0xe10   : > { %v5214_v29 = vsel %vm1918_vm7, %v5210_v56, %v7821_v1  ;;  %v5226_v36 = vsel %vm1918_vm7, %v5222_v58, %v7820_v54  ;;  %v5462_v1 = vld [vmem:[%s10836_s9] sm:$0xff] }
 0xe11   : > { %v7829_v60 = vpop.permute.xlu1 %7828  ;;  %v7824_v10 = vpop.permute.xlu0 %7823 }
 0xe12   : > { %v7826_v61 = vunpack.i.h.bf16 %v7824_v10  ;;  %v7825_v8 = vunpack.i.l.bf16 %v7824_v10  ;;  %v7831_v5 = vunpack.i.h.bf16 %v7829_v60  ;;  %v7830_v63 = vunpack.i.l.bf16 %v7829_v60  ;;  %v5749_v60 = vld [vmem:[%s10835_s8 + $0x120] ss:$0 sm:$0xff] }
 0xe14   : > { %v5230_v31 = vsel %vm1952_vm9, %v5226_v36, %v7825_v8  ;;  %v5218_v4 = vsel %vm1952_vm9, %v5214_v29, %v7826_v61  ;;  %v5223_v13 = vsel %vm1884_vm5, %v10733_v32, %v7830_v63  ;;  %v5211_v59 = vsel %vm1884_vm5, %v10731_v26, %v7831_v5 }
 0xe15   : > { %5348 = vmatprep.mubr.f32.mxu1 %v5230_v31  ;;  %v7834_v46 = vpop.permute.xlu0 %7833  ;;  %v7839_v16 = vpop.permute.xlu1 %7838  ;;  %v4427_v31 = vmax.f32 %v10564_v25, 0.0 }
 0xe16   : > { %v7836_v52 = vunpack.i.h.bf16 %v7834_v46  ;;  %v7835_v21 = vunpack.i.l.bf16 %v7834_v46  ;;  %v7841_v53 = vunpack.i.h.bf16 %v7839_v16  ;;  %v7840_v23 = vunpack.i.l.bf16 %v7839_v16  ;;  %5349 = vmatmul.mubr.f32.vlgmr.msra.gmra.mrb[140].mxu1 %v5218_v4 }
 0xe18   : > { %v5227_v15 = vsel %vm1918_vm7, %v5223_v13, %v7835_v21  ;;  %v5215_v55 = vsel %vm1918_vm7, %v5211_v59, %v7836_v52 }
 0xe19   : > { %v7844_v24 = vpop.permute.xlu0 %7843  ;;  %v7849_v45 = vpop.permute.xlu1 %7848  ;;  %v5231_v12 = vsel %vm1952_vm9, %v5227_v15, %v7840_v23  ;;  %v5219_v22 = vsel %vm1952_vm9, %v5215_v55, %v7841_v53  ;;  %v4428_v53 = vmax.f32 %v10562_v18, 0.0  ;;  %v4430_v18 = vmax.f32 %v10566_v57, 0.0 }
 0xe1a   : > { %v7846_v2 = vunpack.i.h.bf16 %v7844_v24  ;;  %v7845_v33 = vunpack.i.l.bf16 %v7844_v24  ;;  %5353 = vmatprep.mubr.f32.mxu1 %v5231_v12  ;;  %v7851_v38 = vunpack.i.h.bf16 %v7849_v45  ;;  %v7850_v28 = vunpack.i.l.bf16 %v7849_v45 }
 0xe1b   : > { %5354 = vmatmul.mubr.f32.gmra.mrb[142].mxu1 %v5219_v22  ;;  %v4429_v22 = vmax.f32 %v10568_v9, 0.0 }
 0xe1c   : > { %v5224_v32 = vsel %vm1884_vm5, %v10743_v30, %v7845_v33  ;;  %v5212_v26 = vsel %vm1884_vm5, %v10725_v19, %v7846_v2 }
 0xe1d   : > { %v7859_v39 = vpop.permute.xlu1 %7858  ;;  %v7854_v6 = vpop.permute.xlu0 %7853  ;;  %v5228_v62 = vsel %vm1918_vm7, %v5224_v32, %v7850_v28  ;;  %v5216_v44 = vsel %vm1918_vm7, %v5212_v26, %v7851_v38 }
 0xe1e   : > { %v7856_v41 = vunpack.i.h.bf16 %v7854_v6  ;;  %v7855_v14 = vunpack.i.l.bf16 %v7854_v6  ;;  %v7861_v42 = vunpack.i.h.bf16 %v7859_v39  ;;  %v7860_v43 = vunpack.i.l.bf16 %v7859_v39  ;;  %v5754_v39 = vld [vmem:[%s10836_s9 + $0x10] ss:$0 sm:$0xff] }
 0xe20   : > { %v5232_v20 = vsel %vm1952_vm9, %v5228_v62, %v7855_v14  ;;  %v5220_v27 = vsel %vm1952_vm9, %v5216_v44, %v7856_v41  ;;  %v5225_v0 = vsel %vm1884_vm5, %v10754_v47, %v7860_v43  ;;  %v5213_v48 = vsel %vm1884_vm5, %v10739_v34, %v7861_v42  ;;  %v5463_v34 = vld [vmem:[%s10836_s9 + $0x8] sm:$0xff] }
 0xe21   : > { %v7864_v7 = vpop.permute.xlu0 %7863  ;;  %5358 = vmatprep.mubr.f32.mxu1 %v5232_v20  ;;  %v7869_v30 = vpop.permute.xlu1 %7868  ;;  %v7406_v47 = vpack.c.bf16 %v5463_v34, %v5462_v1 }
 0xe22   : > { %v7866_v3 = vunpack.i.h.bf16 %v7864_v7  ;;  %v7865_v40 = vunpack.i.l.bf16 %v7864_v7  ;;  %5359 = vmatmul.mubr.f32.gmra.mrb[144].mxu1 %v5220_v27  ;;  %v7871_v19 = vunpack.i.h.bf16 %v7869_v30  ;;  %v7870_v37 = vunpack.i.l.bf16 %v7869_v30 }
 0xe23   : > { %7407 = vmatprep.subr.bf16.mxu0 %v7406_v47 }
 0xe24   : > { %v5229_v51 = vsel %vm1918_vm7, %v5225_v0, %v7865_v40  ;;  %v5217_v35 = vsel %vm1918_vm7, %v5213_v48, %v7866_v3  ;;  %7409 = vmatpush3.bf16.msra.mxu0 %v7406_v47 }
 0xe25   : > { %v5233_v49 = vsel %vm1952_vm9, %v5229_v51, %v7870_v37  ;;  %v5221_v11 = vsel %vm1952_vm9, %v5217_v35, %v7871_v19 }
 0xe26   : > { %5363 = vmatprep.mubr.f32.mxu1 %v5233_v49 }
 0xe27   : > { %5364 = vmatmul.mubr.f32.gmra.mrb[146].mxu1 %v5221_v11 }
 0xe74   : > { %v6701_v50 = vpop.f32.mrb[128].mxu0 }
 0xe75   : > { %v5435_v17 = vpop.f32.mrb[129].mxu0 }
 0xe7b   : > { %v6704_v54 = vpop.f32.mrb[130].mxu0 }
 0xe7c   : > { %v5445_v56 = vpop.f32.mrb[131].mxu0 }
 0xee9   : > { %v6420_v58 = vpop.f32.mrb[140].mxu1 }
 0xeea   : > { %v6421_v10 = vpop.f32.mrb[141].mxu1 }
 0xeeb   : > { %v6422_v61 = vadd.f32 %v6421_v10, %v6420_v58 }
 0xeed   : > { %v5351_v8 = vadd.f32 %v6422_v61, %v5749_v60 }
 0xeee   : > { %v6423_v29 = vpop.f32.mrb[142].mxu1 }
 0xeef   : > { %v5436_v5 = vadd.f32 %v5435_v17, %v5351_v8  ;;  %v6424_v63 = vpop.f32.mrb[143].mxu1 }
 0xef0   : > { %v6425_v36 = vadd.f32 %v6424_v63, %v6423_v29 }
 0xef1   : > { %v5454_v4 = vmax.f32 %v5436_v5, 0.0 }
 0xef2   : > { %v5356_v46 = vadd.f32 %v6425_v36, %v5749_v60 }
 0xef3   : > { %v5458_v16 = vadd.f32 %v5454_v4, %v4427_v31 }
 0xef4   : > { %v5441_v52 = vadd.f32 %v6701_v50, %v5356_v46 }
 0xef5   : > { %v6426_v21 = vpop.f32.mrb[144].mxu1  ;;  %6709 = vmatprep.mubr.msk.f32.mxu0 %vm582_vm0, %v5458_v16 }
 0xef6   : > { %v5455_v23 = vmax.f32 %v5441_v52, 0.0  ;;  %v6427_v13 = vpop.f32.mrb[145].mxu1 }
 0xef7   : > { %v6428_v59 = vadd.f32 %v6427_v13, %v6426_v21 }
 0xef8   : > { %v5459_v15 = vadd.f32 %v5455_v23, %v4428_v53 }
 0xef9   : > { %v5361_v55 = vadd.f32 %v6428_v59, %v5749_v60 }
 0xefa   : > { %v6429_v24 = vpop.f32.mrb[146].mxu1  ;;  %6710 = vmatmul.mubr.msk.f32.vlgmr.msra.gmra.mrb[132].mxu0 %vm582_vm0, %v5459_v15 }
 0xefb   : > { %v5446_v45 = vadd.f32 %v5445_v56, %v5361_v55  ;;  %v6430_v25 = vpop.f32.mrb[147].mxu1 }
 0xefc   : > { %v6431_v12 = vadd.f32 %v6430_v25, %v6429_v24 }
 0xefd   : > { %v5456_v2 = vmax.f32 %v5446_v45, 0.0 }
 0xefe   : > { %v5366_v33 = vadd.f32 %v6431_v12, %v5749_v60 }
 0xeff   : > { %v5460_v38 = vadd.f32 %v5456_v2, %v4429_v22 }
 0xf00   : > { %v5451_v28 = vadd.f32 %v6704_v54, %v5366_v33 }
 0xf01   : > { %6712 = vmatprep.mubr.msk.f32.mxu0 %vm582_vm0, %v5460_v38 }
 0xf02   : > { %v5457_v32 = vmax.f32 %v5451_v28, 0.0 }
 0xf04   : > { %v5461_v26 = vadd.f32 %v5457_v32, %v4430_v18 }
 0xf06   : > { %6713 = vmatmul.mubr.msk.f32.gmra.mrb[134].mxu0 %vm582_vm0, %v5461_v26 }
 0xfcd   : > { %v6711_v9 = vpop.f32.mrb[132].mxu0 }
 0xfce   : > { %v5553_v6 = vadd.f32 %v6711_v9, %v5754_v39  ;;  %v5547_v41 = vpop.f32.mrb[133].mxu0 }
 0xfcf   : > { %v5548_v14 = vadd.f32 %v5754_v39, %v5547_v41 }
 0xfd0   : > { %5567 = vst.msk [vmem:[%s494_s21 + $0x8] sm:$0xff] %vm582_vm0, %v5553_v6 }
 0xfd1   : > { %5566 = vst.msk [vmem:[%s494_s21] sm:$0xff] %vm582_vm0, %v5548_v14 }
 0xfd9   : > { %v6714_v57 = vpop.f32.mrb[134].mxu0 }
 0xfda   : > { %v5563_v42 = vadd.f32 %v6714_v57, %v5754_v39  ;;  %v5557_v43 = vpop.f32.mrb[135].mxu0 }
 0xfdb   : > { %v5558_v62 = vadd.f32 %v5754_v39, %v5557_v43 }
 0xfdc   : > { %5569 = vst.msk [vmem:[%s494_s21 + $0x18] sm:$0xff] %vm582_vm0, %v5563_v42 }
 0xfdd   : > { %5568 = vst.msk [vmem:[%s494_s21 + $0x10] sm:$0xff] %vm582_vm0, %v5558_v62 }
 0xfde PF: > { %s25_s18 = sadd.s32 1, %s7878_s18  }
 0xfdf   : > { %p22_p4 = scmp.ge.s32.totalorder %s25_s18, 4  }
 0xfe1   :  { %24 = sbr.rel (!%p22_p4) target bundleno = 2 (0x2), region = 110 }

</bundles_post_ra>
